<compile_context>
chip_gen: v7x
topology: tpu7x:2x2x1
jax: 0.10.0
libtpu: 0.0.40
codegen_flags: <defaults>
</compile_context>

<pallas_src>
import functools

import jax
import jax.numpy as jnp
from jax.experimental import pallas as pl
from jax.experimental.pallas import tpu as pltpu

EPS = 1e-5


def _resnet_kernel(*refs, B, T, chans, ksizes):
    """Fully fused forward pass of all residual blocks.

    refs layout:
      refs[0]            x       (B*T, chans[0])  f32  (channels-last, rows = B*T)
      refs[1:1+8*nb]     per block: w1c, gb1, w2c, gb2, w3c, gb3, wsc, gbs
                           wXc : (K*Cin, Cout)  im2col-reshaped conv weight
                           gbX : (2, Cout)      [gamma; beta] of the BatchNorm
      refs[1+8*nb]       out     (B*T, chans[-1]) f32
      refs[2+8*nb]       col     (B*T, KCmax)     f32  VMEM scratch (im2col LHS)
    """
    nb = len(chans) - 1
    x_ref = refs[0]
    prm = refs[1:1 + 8 * nb]
    out_ref = refs[1 + 8 * nb]
    col_ref = refs[2 + 8 * nb]

    def conv_bn(h, w_ref, gb_ref, K, cin, relu, res=None):
        """h: (B*T, cin) f32 value -> (B*T, Cout) f32 value.

        'same' conv (width K, zero pad K//2) as a single im2col matmul, then
        training-mode BatchNorm (batch stats over all B*T rows per channel),
        optional residual add and ReLU.  The conv bias is omitted: a constant
        per-channel shift cancels exactly in the BN mean subtraction.
        """
        p = K // 2
        if K == 1:
            col = h                           # 1x1 skip conv: no halo, no im2col
        else:
            # Zero fill provides the halo padding; then scatter K shifted windows.
            col_ref[...] = jnp.zeros_like(col_ref)
            for k in range(K):                # static unroll (K in {3,5,9})
                lo, hi = max(0, p - k), min(T, T + p - k)
                sh = k - p
                for b in range(B):            # static unroll (tiny B)
                    col_ref[b * T + lo:b * T + hi, k * cin:(k + 1) * cin] = (
                        h[b * T + lo + sh:b * T + hi + sh, :])
            col = col_ref[:, :K * cin]
        # One MXU matmul: (B*T, K*cin) @ (K*cin, Cout), fp32 accumulation.
        acc = jnp.dot(col, w_ref[...], preferred_element_type=jnp.float32)
        # Training-mode BatchNorm2d: stats over (N, H, W) == all B*T rows.
        mean = jnp.mean(acc, axis=0, keepdims=True)
        ctr = acc - mean
        var = jnp.mean(ctr * ctr, axis=0, keepdims=True)       # biased variance
        y = ctr * (gb_ref[0:1, :] * jax.lax.rsqrt(var + EPS)) + gb_ref[1:2, :]
        if res is not None:
            y = y + res
        return jnp.maximum(y, 0.0) if relu else y

    k0, k1, k2 = ksizes
    h = x_ref[...].astype(jnp.float32)
    for i in range(nb):
        cin, cout = chans[i], chans[i + 1]
        w1, gb1, w2, gb2, w3, gb3, ws, gbs = prm[8 * i:8 * (i + 1)]
        s = conv_bn(h, ws, gbs, 1, cin, relu=False)             # norm_skip(conv_skip(x))
        h = conv_bn(h, w1, gb1, k0, cin, relu=True)             # relu(norm1(conv1(pad(x))))
        h = conv_bn(h, w2, gb2, k1, cout, relu=True)            # relu(norm2(conv2(pad(h))))
        h = conv_bn(h, w3, gb3, k2, cout, relu=True, res=s)     # relu(norm3(conv3(pad(h))) + s)
    out_ref[...] = h.astype(out_ref.dtype)


def resnet_forward(x_nct, params, kernel_sizes=(9, 5, 3)):
    """x_nct: (B, C, T) as PyTorch gives it. Returns (B, C_out, 1, T) like the module."""
    ks = tuple(kernel_sizes)
    B, cin0, T = x_nct.shape
    chans = (cin0,) + tuple(p["w1"].shape[2] for p in params)
    nb = len(params)

    # NCHW (H==1 after unsqueeze) -> channels-last, flattened to 2D rows (B*T, C).
    x2d = jnp.transpose(x_nct, (0, 2, 1)).reshape(B * T, cin0)

    inputs = [x2d]
    for p in params:
        for wname, gname, bname in (("w1", "g1", "be1"), ("w2", "g2", "be2"),
                                    ("w3", "g3", "be3"), ("ws", "gs", "bes")):
            w = p[wname]
            K, ci, co = w.shape
            inputs.append(w.reshape(K * ci, co))            # im2col weight (K*Cin, Cout)
            inputs.append(jnp.stack([p[gname], p[bname]]))  # (2, Cout) [gamma; beta]
    # NOTE: conv biases (b1/b2/b3/bs) are intentionally NOT passed to the kernel:
    # a per-channel constant shift before training-mode BatchNorm cancels exactly
    # in the mean subtraction, so the forward output is identical without them.

    kcmax = max(max(ks[0] * chans[i], ks[1] * chans[i + 1], ks[2] * chans[i + 1])
                for i in range(nb))

    kernel = functools.partial(_resnet_kernel, B=B, T=T, chans=chans, ksizes=ks)
    out2d = pl.pallas_call(
        kernel,
        out_shape=jax.ShapeDtypeStruct((B * T, chans[-1]), jnp.float32),
        in_specs=[pl.BlockSpec(memory_space=pltpu.MemorySpace.VMEM)] * len(inputs),
        out_specs=pl.BlockSpec(memory_space=pltpu.MemorySpace.VMEM),
        scratch_shapes=[pltpu.VMEM((B * T, kcmax), jnp.float32)],
    )(*inputs)

    # back to PyTorch layout (B, C_out, 1, T)
    return jnp.transpose(out2d.reshape(B, T, chans[-1]), (0, 2, 1))[:, :, None, :]


def init_block_params(key, cin, cout, kernel_sizes=(9, 5, 3), scale=0.1):
    k0, k1, k2 = kernel_sizes
    ks = jax.random.split(key, 8)
    f32 = jnp.float32
    return {
        "w1": scale * jax.random.normal(ks[0], (k0, cin, cout), f32),
        "b1": scale * jax.random.normal(ks[1], (cout,), f32),   # unused: cancels in BN
        "w2": scale * jax.random.normal(ks[2], (k1, cout, cout), f32),
        "b2": scale * jax.random.normal(ks[3], (cout,), f32),   # unused: cancels in BN
        "w3": scale * jax.random.normal(ks[4], (k2, cout, cout), f32),
        "b3": scale * jax.random.normal(ks[5], (cout,), f32),   # unused: cancels in BN
        "ws": scale * jax.random.normal(ks[6], (1, cin, cout), f32),
        "bs": scale * jax.random.normal(ks[7], (cout,), f32),   # unused: cancels in BN
        # BatchNorm affine params at PyTorch default init (weight=1, bias=0)
        "g1": jnp.ones((cout,), f32), "be1": jnp.zeros((cout,), f32),
        "g2": jnp.ones((cout,), f32), "be2": jnp.zeros((cout,), f32),
        "g3": jnp.ones((cout,), f32), "be3": jnp.zeros((cout,), f32),
        "gs": jnp.ones((cout,), f32), "bes": jnp.zeros((cout,), f32),
    }


if __name__ == "__main__":
    # Small shapes consistent with the module: batch=2, input_size=4, num_segments=16
    B, C_IN, T = 2, 4, 16
    HIDDEN = [8, 16, 32]
    KSIZES = (9, 5, 3)

    key = jax.random.PRNGKey(0)
    kx, k1, k2, k3 = jax.random.split(key, 4)
    x = jax.random.normal(kx, (B, C_IN, T), jnp.float32)

    params = [
        init_block_params(k1, C_IN, HIDDEN[0], KSIZES),
        init_block_params(k2, HIDDEN[0], HIDDEN[1], KSIZES),
        init_block_params(k3, HIDDEN[1], HIDDEN[2], KSIZES),
    ]

    out = jax.jit(resnet_forward, static_argnums=(2,))(x, params, KSIZES)
    out = jax.block_until_ready(out)
    assert out.shape == (B, HIDDEN[-1], 1, T), out.shape
    assert bool(jnp.all(jnp.isfinite(out)))
    print("KERNEL_OK")
</pallas_src>

<mosaic_0001>
module attributes {stable_mosaic.version = 11 : i64} {
  func.func @_resnet_kernel(%arg0: memref<32x4xf32, #tpu.memory_space<vmem>>, %arg1: memref<36x8xf32, #tpu.memory_space<vmem>>, %arg2: memref<2x8xf32, #tpu.memory_space<vmem>>, %arg3: memref<40x8xf32, #tpu.memory_space<vmem>>, %arg4: memref<2x8xf32, #tpu.memory_space<vmem>>, %arg5: memref<24x8xf32, #tpu.memory_space<vmem>>, %arg6: memref<2x8xf32, #tpu.memory_space<vmem>>, %arg7: memref<4x8xf32, #tpu.memory_space<vmem>>, %arg8: memref<2x8xf32, #tpu.memory_space<vmem>>, %arg9: memref<72x16xf32, #tpu.memory_space<vmem>>, %arg10: memref<2x16xf32, #tpu.memory_space<vmem>>, %arg11: memref<80x16xf32, #tpu.memory_space<vmem>>, %arg12: memref<2x16xf32, #tpu.memory_space<vmem>>, %arg13: memref<48x16xf32, #tpu.memory_space<vmem>>, %arg14: memref<2x16xf32, #tpu.memory_space<vmem>>, %arg15: memref<8x16xf32, #tpu.memory_space<vmem>>, %arg16: memref<2x16xf32, #tpu.memory_space<vmem>>, %arg17: memref<144x32xf32, #tpu.memory_space<vmem>>, %arg18: memref<2x32xf32, #tpu.memory_space<vmem>>, %arg19: memref<160x32xf32, #tpu.memory_space<vmem>>, %arg20: memref<2x32xf32, #tpu.memory_space<vmem>>, %arg21: memref<96x32xf32, #tpu.memory_space<vmem>>, %arg22: memref<2x32xf32, #tpu.memory_space<vmem>>, %arg23: memref<16x32xf32, #tpu.memory_space<vmem>>, %arg24: memref<2x32xf32, #tpu.memory_space<vmem>>, %arg25: memref<32x32xf32, #tpu.memory_space<vmem>>, %arg26: memref<32x160xf32, #tpu.memory_space<vmem>>) attributes {dimension_semantics = [], scalar_prefetch = 0 : i64, scratch_operands = 1 : i64, tpu.core_type = #tpu.core_type<tc>} {
    %c0 = arith.constant 0 : index
    %c0_0 = arith.constant 0 : index
    %0 = vector.load %arg0[%c0, %c0_0] : memref<32x4xf32, #tpu.memory_space<vmem>>, vector<32x4xf32>
    %c0_1 = arith.constant 0 : index
    %c0_2 = arith.constant 0 : index
    %1 = vector.load %arg7[%c0_1, %c0_2] : memref<4x8xf32, #tpu.memory_space<vmem>>, vector<4x8xf32>
    %cst = arith.constant dense<0.000000e+00> : vector<32x8xf32>
    %2 = tpu.matmul %0, %1, %cst {dimension_numbers = #tpu.dot_dimension_numbers<[1], [0], [0], [1], [0, 0, 1, 1], [], []>} : vector<32x4xf32>, vector<4x8xf32>, vector<32x8xf32> -> vector<32x8xf32>
    %cst_3 = arith.constant dense<0.000000e+00> : vector<8xf32>
    %3 = vector.multi_reduction <add>, %2, %cst_3 [0] : vector<32x8xf32> to vector<8xf32>
    %4 = vector.shape_cast %3 : vector<8xf32> to vector<1x8xf32>
    %cst_4 = arith.constant 3.200000e+01 : f32
    %5 = vector.broadcast %cst_4 : f32 to vector<1x8xf32>
    %6 = arith.divf %4, %5 : vector<1x8xf32>
    %7 = vector.broadcast %6 : vector<1x8xf32> to vector<32x8xf32>
    %8 = arith.subf %2, %7 : vector<32x8xf32>
    %9 = arith.mulf %8, %8 : vector<32x8xf32>
    %cst_5 = arith.constant dense<0.000000e+00> : vector<8xf32>
    %10 = vector.multi_reduction <add>, %9, %cst_5 [0] : vector<32x8xf32> to vector<8xf32>
    %11 = vector.shape_cast %10 : vector<8xf32> to vector<1x8xf32>
    %cst_6 = arith.constant 3.200000e+01 : f32
    %12 = vector.broadcast %cst_6 : f32 to vector<1x8xf32>
    %13 = arith.divf %11, %12 : vector<1x8xf32>
    %c0_7 = arith.constant 0 : index
    %c0_8 = arith.constant 0 : index
    %14 = vector.load %arg8[%c0_7, %c0_8] : memref<2x8xf32, #tpu.memory_space<vmem>>, vector<1x8xf32>
    %cst_9 = arith.constant 9.99999974E-6 : f32
    %15 = vector.broadcast %cst_9 : f32 to vector<1x8xf32>
    %16 = arith.addf %13, %15 : vector<1x8xf32>
    %17 = math.rsqrt %16 : vector<1x8xf32>
    %18 = arith.mulf %14, %17 : vector<1x8xf32>
    %19 = vector.broadcast %18 : vector<1x8xf32> to vector<32x8xf32>
    %20 = arith.mulf %8, %19 : vector<32x8xf32>
    %c1 = arith.constant 1 : index
    %c0_10 = arith.constant 0 : index
    %21 = vector.load %arg8[%c1, %c0_10] : memref<2x8xf32, #tpu.memory_space<vmem>>, vector<1x8xf32>
    %22 = vector.broadcast %21 : vector<1x8xf32> to vector<32x8xf32>
    %23 = arith.addf %20, %22 : vector<32x8xf32>
    %cst_11 = arith.constant 0.000000e+00 : f32
    %24 = vector.broadcast %cst_11 : f32 to vector<32x160xf32>
    %c0_12 = arith.constant 0 : index
    %c0_13 = arith.constant 0 : index
    %25 = vector.load %arg26[%c0_12, %c0_13] : memref<32x160xf32, #tpu.memory_space<vmem>>, vector<32x160xf32>
    tpu.vector_store %arg26[%c0_12, %c0_13], %24 {strides = array<i32>} : memref<32x160xf32, #tpu.memory_space<vmem>>, vector<32x160xf32>,
    %26 = vector.extract_strided_slice %0 {offsets = [0, 0], sizes = [12, 4], strides = [1, 1]} : vector<32x4xf32> to vector<12x4xf32>
    %c4 = arith.constant 4 : index
    %c0_14 = arith.constant 0 : index
    %27 = vector.load %arg26[%c4, %c0_14] : memref<32x160xf32, #tpu.memory_space<vmem>>, vector<12x4xf32>
    tpu.vector_store %arg26[%c4, %c0_14], %26 {strides = array<i32>} : memref<32x160xf32, #tpu.memory_space<vmem>>, vector<12x4xf32>,
    %28 = vector.extract_strided_slice %0 {offsets = [16, 0], sizes = [12, 4], strides = [1, 1]} : vector<32x4xf32> to vector<12x4xf32>
    %c20 = arith.constant 20 : index
    %c0_15 = arith.constant 0 : index
    %29 = vector.load %arg26[%c20, %c0_15] : memref<32x160xf32, #tpu.memory_space<vmem>>, vector<12x4xf32>
    tpu.vector_store %arg26[%c20, %c0_15], %28 {strides = array<i32>} : memref<32x160xf32, #tpu.memory_space<vmem>>, vector<12x4xf32>,
    %30 = vector.extract_strided_slice %0 {offsets = [0, 0], sizes = [13, 4], strides = [1, 1]} : vector<32x4xf32> to vector<13x4xf32>
    %c3 = arith.constant 3 : index
    %c4_16 = arith.constant 4 : index
    %31 = vector.load %arg26[%c3, %c4_16] : memref<32x160xf32, #tpu.memory_space<vmem>>, vector<13x4xf32>
    tpu.vector_store %arg26[%c3, %c4_16], %30 {strides = array<i32>} : memref<32x160xf32, #tpu.memory_space<vmem>>, vector<13x4xf32>,
    %32 = vector.extract_strided_slice %0 {offsets = [16, 0], sizes = [13, 4], strides = [1, 1]} : vector<32x4xf32> to vector<13x4xf32>
    %c19 = arith.constant 19 : index
    %c4_17 = arith.constant 4 : index
    %33 = vector.load %arg26[%c19, %c4_17] : memref<32x160xf32, #tpu.memory_space<vmem>>, vector<13x4xf32>
    tpu.vector_store %arg26[%c19, %c4_17], %32 {strides = array<i32>} : memref<32x160xf32, #tpu.memory_space<vmem>>, vector<13x4xf32>,
    %34 = vector.extract_strided_slice %0 {offsets = [0, 0], sizes = [14, 4], strides = [1, 1]} : vector<32x4xf32> to vector<14x4xf32>
    %c2 = arith.constant 2 : index
    %c8 = arith.constant 8 : index
    %35 = vector.load %arg26[%c2, %c8] : memref<32x160xf32, #tpu.memory_space<vmem>>, vector<14x4xf32>
    tpu.vector_store %arg26[%c2, %c8], %34 {strides = array<i32>} : memref<32x160xf32, #tpu.memory_space<vmem>>, vector<14x4xf32>,
    %36 = vector.extract_strided_slice %0 {offsets = [16, 0], sizes = [14, 4], strides = [1, 1]} : vector<32x4xf32> to vector<14x4xf32>
    %c18 = arith.constant 18 : index
    %c8_18 = arith.constant 8 : index
    %37 = vector.load %arg26[%c18, %c8_18] : memref<32x160xf32, #tpu.memory_space<vmem>>, vector<14x4xf32>
    tpu.vector_store %arg26[%c18, %c8_18], %36 {strides = array<i32>} : memref<32x160xf32, #tpu.memory_space<vmem>>, vector<14x4xf32>,
    %38 = vector.extract_strided_slice %0 {offsets = [0, 0], sizes = [15, 4], strides = [1, 1]} : vector<32x4xf32> to vector<15x4xf32>
    %c1_19 = arith.constant 1 : index
    %c12 = arith.constant 12 : index
    %39 = vector.load %arg26[%c1_19, %c12] : memref<32x160xf32, #tpu.memory_space<vmem>>, vector<15x4xf32>
    tpu.vector_store %arg26[%c1_19, %c12], %38 {strides = array<i32>} : memref<32x160xf32, #tpu.memory_space<vmem>>, vector<15x4xf32>,
    %40 = vector.extract_strided_slice %0 {offsets = [16, 0], sizes = [15, 4], strides = [1, 1]} : vector<32x4xf32> to vector<15x4xf32>
    %c17 = arith.constant 17 : index
    %c12_20 = arith.constant 12 : index
    %41 = vector.load %arg26[%c17, %c12_20] : memref<32x160xf32, #tpu.memory_space<vmem>>, vector<15x4xf32>
    tpu.vector_store %arg26[%c17, %c12_20], %40 {strides = array<i32>} : memref<32x160xf32, #tpu.memory_space<vmem>>, vector<15x4xf32>,
    %42 = vector.extract_strided_slice %0 {offsets = [0, 0], sizes = [16, 4], strides = [1, 1]} : vector<32x4xf32> to vector<16x4xf32>
    %c0_21 = arith.constant 0 : index
    %c16 = arith.constant 16 : index
    %43 = vector.load %arg26[%c0_21, %c16] : memref<32x160xf32, #tpu.memory_space<vmem>>, vector<16x4xf32>
    tpu.vector_store %arg26[%c0_21, %c16], %42 {strides = array<i32>} : memref<32x160xf32, #tpu.memory_space<vmem>>, vector<16x4xf32>,
    %44 = vector.extract_strided_slice %0 {offsets = [16, 0], sizes = [16, 4], strides = [1, 1]} : vector<32x4xf32> to vector<16x4xf32>
    %c16_22 = arith.constant 16 : index
    %c16_23 = arith.constant 16 : index
    %45 = vector.load %arg26[%c16_22, %c16_23] : memref<32x160xf32, #tpu.memory_space<vmem>>, vector<16x4xf32>
    tpu.vector_store %arg26[%c16_22, %c16_23], %44 {strides = array<i32>} : memref<32x160xf32, #tpu.memory_space<vmem>>, vector<16x4xf32>,
    %46 = vector.extract_strided_slice %0 {offsets = [1, 0], sizes = [15, 4], strides = [1, 1]} : vector<32x4xf32> to vector<15x4xf32>
    %c0_24 = arith.constant 0 : index
    %c20_25 = arith.constant 20 : index
    %47 = vector.load %arg26[%c0_24, %c20_25] : memref<32x160xf32, #tpu.memory_space<vmem>>, vector<15x4xf32>
    tpu.vector_store %arg26[%c0_24, %c20_25], %46 {strides = array<i32>} : memref<32x160xf32, #tpu.memory_space<vmem>>, vector<15x4xf32>,
    %48 = vector.extract_strided_slice %0 {offsets = [17, 0], sizes = [15, 4], strides = [1, 1]} : vector<32x4xf32> to vector<15x4xf32>
    %c16_26 = arith.constant 16 : index
    %c20_27 = arith.constant 20 : index
    %49 = vector.load %arg26[%c16_26, %c20_27] : memref<32x160xf32, #tpu.memory_space<vmem>>, vector<15x4xf32>
    tpu.vector_store %arg26[%c16_26, %c20_27], %48 {strides = array<i32>} : memref<32x160xf32, #tpu.memory_space<vmem>>, vector<15x4xf32>,
    %50 = vector.extract_strided_slice %0 {offsets = [2, 0], sizes = [14, 4], strides = [1, 1]} : vector<32x4xf32> to vector<14x4xf32>
    %c0_28 = arith.constant 0 : index
    %c24 = arith.constant 24 : index
    %51 = vector.load %arg26[%c0_28, %c24] : memref<32x160xf32, #tpu.memory_space<vmem>>, vector<14x4xf32>
    tpu.vector_store %arg26[%c0_28, %c24], %50 {strides = array<i32>} : memref<32x160xf32, #tpu.memory_space<vmem>>, vector<14x4xf32>,
    %52 = vector.extract_strided_slice %0 {offsets = [18, 0], sizes = [14, 4], strides = [1, 1]} : vector<32x4xf32> to vector<14x4xf32>
    %c16_29 = arith.constant 16 : index
    %c24_30 = arith.constant 24 : index
    %53 = vector.load %arg26[%c16_29, %c24_30] : memref<32x160xf32, #tpu.memory_space<vmem>>, vector<14x4xf32>
    tpu.vector_store %arg26[%c16_29, %c24_30], %52 {strides = array<i32>} : memref<32x160xf32, #tpu.memory_space<vmem>>, vector<14x4xf32>,
    %54 = vector.extract_strided_slice %0 {offsets = [3, 0], sizes = [13, 4], strides = [1, 1]} : vector<32x4xf32> to vector<13x4xf32>
    %c0_31 = arith.constant 0 : index
    %c28 = arith.constant 28 : index
    %55 = vector.load %arg26[%c0_31, %c28] : memref<32x160xf32, #tpu.memory_space<vmem>>, vector<13x4xf32>
    tpu.vector_store %arg26[%c0_31, %c28], %54 {strides = array<i32>} : memref<32x160xf32, #tpu.memory_space<vmem>>, vector<13x4xf32>,
    %56 = vector.extract_strided_slice %0 {offsets = [19, 0], sizes = [13, 4], strides = [1, 1]} : vector<32x4xf32> to vector<13x4xf32>
    %c16_32 = arith.constant 16 : index
    %c28_33 = arith.constant 28 : index
    %57 = vector.load %arg26[%c16_32, %c28_33] : memref<32x160xf32, #tpu.memory_space<vmem>>, vector<13x4xf32>
    tpu.vector_store %arg26[%c16_32, %c28_33], %56 {strides = array<i32>} : memref<32x160xf32, #tpu.memory_space<vmem>>, vector<13x4xf32>,
    %58 = vector.extract_strided_slice %0 {offsets = [4, 0], sizes = [12, 4], strides = [1, 1]} : vector<32x4xf32> to vector<12x4xf32>
    %c0_34 = arith.constant 0 : index
    %c32 = arith.constant 32 : index
    %59 = vector.load %arg26[%c0_34, %c32] : memref<32x160xf32, #tpu.memory_space<vmem>>, vector<12x4xf32>
    tpu.vector_store %arg26[%c0_34, %c32], %58 {strides = array<i32>} : memref<32x160xf32, #tpu.memory_space<vmem>>, vector<12x4xf32>,
    %60 = vector.extract_strided_slice %0 {offsets = [20, 0], sizes = [12, 4], strides = [1, 1]} : vector<32x4xf32> to vector<12x4xf32>
    %c16_35 = arith.constant 16 : index
    %c32_36 = arith.constant 32 : index
    %61 = vector.load %arg26[%c16_35, %c32_36] : memref<32x160xf32, #tpu.memory_space<vmem>>, vector<12x4xf32>
    tpu.vector_store %arg26[%c16_35, %c32_36], %60 {strides = array<i32>} : memref<32x160xf32, #tpu.memory_space<vmem>>, vector<12x4xf32>,
    %c0_37 = arith.constant 0 : index
    %c0_38 = arith.constant 0 : index
    %62 = vector.load %arg26[%c0_37, %c0_38] : memref<32x160xf32, #tpu.memory_space<vmem>>, vector<32x36xf32>
    %c0_39 = arith.constant 0 : index
    %c0_40 = arith.constant 0 : index
    %63 = vector.load %arg1[%c0_39, %c0_40] : memref<36x8xf32, #tpu.memory_space<vmem>>, vector<36x8xf32>
    %cst_41 = arith.constant dense<0.000000e+00> : vector<32x8xf32>
    %64 = tpu.matmul %62, %63, %cst_41 {dimension_numbers = #tpu.dot_dimension_numbers<[1], [0], [0], [1], [0, 0, 1, 1], [], []>} : vector<32x36xf32>, vector<36x8xf32>, vector<32x8xf32> -> vector<32x8xf32>
    %cst_42 = arith.constant dense<0.000000e+00> : vector<8xf32>
    %65 = vector.multi_reduction <add>, %64, %cst_42 [0] : vector<32x8xf32> to vector<8xf32>
    %66 = vector.shape_cast %65 : vector<8xf32> to vector<1x8xf32>
    %cst_43 = arith.constant 3.200000e+01 : f32
    %67 = vector.broadcast %cst_43 : f32 to vector<1x8xf32>
    %68 = arith.divf %66, %67 : vector<1x8xf32>
    %69 = vector.broadcast %68 : vector<1x8xf32> to vector<32x8xf32>
    %70 = arith.subf %64, %69 : vector<32x8xf32>
    %71 = arith.mulf %70, %70 : vector<32x8xf32>
    %cst_44 = arith.constant dense<0.000000e+00> : vector<8xf32>
    %72 = vector.multi_reduction <add>, %71, %cst_44 [0] : vector<32x8xf32> to vector<8xf32>
    %73 = vector.shape_cast %72 : vector<8xf32> to vector<1x8xf32>
    %cst_45 = arith.constant 3.200000e+01 : f32
    %74 = vector.broadcast %cst_45 : f32 to vector<1x8xf32>
    %75 = arith.divf %73, %74 : vector<1x8xf32>
    %c0_46 = arith.constant 0 : index
    %c0_47 = arith.constant 0 : index
    %76 = vector.load %arg2[%c0_46, %c0_47] : memref<2x8xf32, #tpu.memory_space<vmem>>, vector<1x8xf32>
    %cst_48 = arith.constant 9.99999974E-6 : f32
    %77 = vector.broadcast %cst_48 : f32 to vector<1x8xf32>
    %78 = arith.addf %75, %77 : vector<1x8xf32>
    %79 = math.rsqrt %78 : vector<1x8xf32>
    %80 = arith.mulf %76, %79 : vector<1x8xf32>
    %81 = vector.broadcast %80 : vector<1x8xf32> to vector<32x8xf32>
    %82 = arith.mulf %70, %81 : vector<32x8xf32>
    %c1_49 = arith.constant 1 : index
    %c0_50 = arith.constant 0 : index
    %83 = vector.load %arg2[%c1_49, %c0_50] : memref<2x8xf32, #tpu.memory_space<vmem>>, vector<1x8xf32>
    %84 = vector.broadcast %83 : vector<1x8xf32> to vector<32x8xf32>
    %85 = arith.addf %82, %84 : vector<32x8xf32>
    %cst_51 = arith.constant 0.000000e+00 : f32
    %86 = vector.broadcast %cst_51 : f32 to vector<32x8xf32>
    %87 = arith.maximumf %85, %86 : vector<32x8xf32>
    %cst_52 = arith.constant 0.000000e+00 : f32
    %88 = vector.broadcast %cst_52 : f32 to vector<32x160xf32>
    %c0_53 = arith.constant 0 : index
    %c0_54 = arith.constant 0 : index
    %89 = vector.load %arg26[%c0_53, %c0_54] : memref<32x160xf32, #tpu.memory_space<vmem>>, vector<32x160xf32>
    tpu.vector_store %arg26[%c0_53, %c0_54], %88 {strides = array<i32>} : memref<32x160xf32, #tpu.memory_space<vmem>>, vector<32x160xf32>,
    %90 = vector.extract_strided_slice %87 {offsets = [0, 0], sizes = [14, 8], strides = [1, 1]} : vector<32x8xf32> to vector<14x8xf32>
    %c2_55 = arith.constant 2 : index
    %c0_56 = arith.constant 0 : index
    %91 = vector.load %arg26[%c2_55, %c0_56] : memref<32x160xf32, #tpu.memory_space<vmem>>, vector<14x8xf32>
    tpu.vector_store %arg26[%c2_55, %c0_56], %90 {strides = array<i32>} : memref<32x160xf32, #tpu.memory_space<vmem>>, vector<14x8xf32>,
    %92 = vector.extract_strided_slice %87 {offsets = [16, 0], sizes = [14, 8], strides = [1, 1]} : vector<32x8xf32> to vector<14x8xf32>
    %c18_57 = arith.constant 18 : index
    %c0_58 = arith.constant 0 : index
    %93 = vector.load %arg26[%c18_57, %c0_58] : memref<32x160xf32, #tpu.memory_space<vmem>>, vector<14x8xf32>
    tpu.vector_store %arg26[%c18_57, %c0_58], %92 {strides = array<i32>} : memref<32x160xf32, #tpu.memory_space<vmem>>, vector<14x8xf32>,
    %94 = vector.extract_strided_slice %87 {offsets = [0, 0], sizes = [15, 8], strides = [1, 1]} : vector<32x8xf32> to vector<15x8xf32>
    %c1_59 = arith.constant 1 : index
    %c8_60 = arith.constant 8 : index
    %95 = vector.load %arg26[%c1_59, %c8_60] : memref<32x160xf32, #tpu.memory_space<vmem>>, vector<15x8xf32>
    tpu.vector_store %arg26[%c1_59, %c8_60], %94 {strides = array<i32>} : memref<32x160xf32, #tpu.memory_space<vmem>>, vector<15x8xf32>,
    %96 = vector.extract_strided_slice %87 {offsets = [16, 0], sizes = [15, 8], strides = [1, 1]} : vector<32x8xf32> to vector<15x8xf32>
    %c17_61 = arith.constant 17 : index
    %c8_62 = arith.constant 8 : index
    %97 = vector.load %arg26[%c17_61, %c8_62] : memref<32x160xf32, #tpu.memory_space<vmem>>, vector<15x8xf32>
    tpu.vector_store %arg26[%c17_61, %c8_62], %96 {strides = array<i32>} : memref<32x160xf32, #tpu.memory_space<vmem>>, vector<15x8xf32>,
    %98 = vector.extract_strided_slice %87 {offsets = [0, 0], sizes = [16, 8], strides = [1, 1]} : vector<32x8xf32> to vector<16x8xf32>
    %c0_63 = arith.constant 0 : index
    %c16_64 = arith.constant 16 : index
    %99 = vector.load %arg26[%c0_63, %c16_64] : memref<32x160xf32, #tpu.memory_space<vmem>>, vector<16x8xf32>
    tpu.vector_store %arg26[%c0_63, %c16_64], %98 {strides = array<i32>} : memref<32x160xf32, #tpu.memory_space<vmem>>, vector<16x8xf32>,
    %100 = vector.extract_strided_slice %87 {offsets = [16, 0], sizes = [16, 8], strides = [1, 1]} : vector<32x8xf32> to vector<16x8xf32>
    %c16_65 = arith.constant 16 : index
    %c16_66 = arith.constant 16 : index
    %101 = vector.load %arg26[%c16_65, %c16_66] : memref<32x160xf32, #tpu.memory_space<vmem>>, vector<16x8xf32>
    tpu.vector_store %arg26[%c16_65, %c16_66], %100 {strides = array<i32>} : memref<32x160xf32, #tpu.memory_space<vmem>>, vector<16x8xf32>,
    %102 = vector.extract_strided_slice %87 {offsets = [1, 0], sizes = [15, 8], strides = [1, 1]} : vector<32x8xf32> to vector<15x8xf32>
    %c0_67 = arith.constant 0 : index
    %c24_68 = arith.constant 24 : index
    %103 = vector.load %arg26[%c0_67, %c24_68] : memref<32x160xf32, #tpu.memory_space<vmem>>, vector<15x8xf32>
    tpu.vector_store %arg26[%c0_67, %c24_68], %102 {strides = array<i32>} : memref<32x160xf32, #tpu.memory_space<vmem>>, vector<15x8xf32>,
    %104 = vector.extract_strided_slice %87 {offsets = [17, 0], sizes = [15, 8], strides = [1, 1]} : vector<32x8xf32> to vector<15x8xf32>
    %c16_69 = arith.constant 16 : index
    %c24_70 = arith.constant 24 : index
    %105 = vector.load %arg26[%c16_69, %c24_70] : memref<32x160xf32, #tpu.memory_space<vmem>>, vector<15x8xf32>
    tpu.vector_store %arg26[%c16_69, %c24_70], %104 {strides = array<i32>} : memref<32x160xf32, #tpu.memory_space<vmem>>, vector<15x8xf32>,
    %106 = vector.extract_strided_slice %87 {offsets = [2, 0], sizes = [14, 8], strides = [1, 1]} : vector<32x8xf32> to vector<14x8xf32>
    %c0_71 = arith.constant 0 : index
    %c32_72 = arith.constant 32 : index
    %107 = vector.load %arg26[%c0_71, %c32_72] : memref<32x160xf32, #tpu.memory_space<vmem>>, vector<14x8xf32>
    tpu.vector_store %arg26[%c0_71, %c32_72], %106 {strides = array<i32>} : memref<32x160xf32, #tpu.memory_space<vmem>>, vector<14x8xf32>,
    %108 = vector.extract_strided_slice %87 {offsets = [18, 0], sizes = [14, 8], strides = [1, 1]} : vector<32x8xf32> to vector<14x8xf32>
    %c16_73 = arith.constant 16 : index
    %c32_74 = arith.constant 32 : index
    %109 = vector.load %arg26[%c16_73, %c32_74] : memref<32x160xf32, #tpu.memory_space<vmem>>, vector<14x8xf32>
    tpu.vector_store %arg26[%c16_73, %c32_74], %108 {strides = array<i32>} : memref<32x160xf32, #tpu.memory_space<vmem>>, vector<14x8xf32>,
    %c0_75 = arith.constant 0 : index
    %c0_76 = arith.constant 0 : index
    %110 = vector.load %arg26[%c0_75, %c0_76] : memref<32x160xf32, #tpu.memory_space<vmem>>, vector<32x40xf32>
    %c0_77 = arith.constant 0 : index
    %c0_78 = arith.constant 0 : index
    %111 = vector.load %arg3[%c0_77, %c0_78] : memref<40x8xf32, #tpu.memory_space<vmem>>, vector<40x8xf32>
    %cst_79 = arith.constant dense<0.000000e+00> : vector<32x8xf32>
    %112 = tpu.matmul %110, %111, %cst_79 {dimension_numbers = #tpu.dot_dimension_numbers<[1], [0], [0], [1], [0, 0, 1, 1], [], []>} : vector<32x40xf32>, vector<40x8xf32>, vector<32x8xf32> -> vector<32x8xf32>
    %cst_80 = arith.constant dense<0.000000e+00> : vector<8xf32>
    %113 = vector.multi_reduction <add>, %112, %cst_80 [0] : vector<32x8xf32> to vector<8xf32>
    %114 = vector.shape_cast %113 : vector<8xf32> to vector<1x8xf32>
    %cst_81 = arith.constant 3.200000e+01 : f32
    %115 = vector.broadcast %cst_81 : f32 to vector<1x8xf32>
    %116 = arith.divf %114, %115 : vector<1x8xf32>
    %117 = vector.broadcast %116 : vector<1x8xf32> to vector<32x8xf32>
    %118 = arith.subf %112, %117 : vector<32x8xf32>
    %119 = arith.mulf %118, %118 : vector<32x8xf32>
    %cst_82 = arith.constant dense<0.000000e+00> : vector<8xf32>
    %120 = vector.multi_reduction <add>, %119, %cst_82 [0] : vector<32x8xf32> to vector<8xf32>
    %121 = vector.shape_cast %120 : vector<8xf32> to vector<1x8xf32>
    %cst_83 = arith.constant 3.200000e+01 : f32
    %122 = vector.broadcast %cst_83 : f32 to vector<1x8xf32>
    %123 = arith.divf %121, %122 : vector<1x8xf32>
    %c0_84 = arith.constant 0 : index
    %c0_85 = arith.constant 0 : index
    %124 = vector.load %arg4[%c0_84, %c0_85] : memref<2x8xf32, #tpu.memory_space<vmem>>, vector<1x8xf32>
    %cst_86 = arith.constant 9.99999974E-6 : f32
    %125 = vector.broadcast %cst_86 : f32 to vector<1x8xf32>
    %126 = arith.addf %123, %125 : vector<1x8xf32>
    %127 = math.rsqrt %126 : vector<1x8xf32>
    %128 = arith.mulf %124, %127 : vector<1x8xf32>
    %129 = vector.broadcast %128 : vector<1x8xf32> to vector<32x8xf32>
    %130 = arith.mulf %118, %129 : vector<32x8xf32>
    %c1_87 = arith.constant 1 : index
    %c0_88 = arith.constant 0 : index
    %131 = vector.load %arg4[%c1_87, %c0_88] : memref<2x8xf32, #tpu.memory_space<vmem>>, vector<1x8xf32>
    %132 = vector.broadcast %131 : vector<1x8xf32> to vector<32x8xf32>
    %133 = arith.addf %130, %132 : vector<32x8xf32>
    %cst_89 = arith.constant 0.000000e+00 : f32
    %134 = vector.broadcast %cst_89 : f32 to vector<32x8xf32>
    %135 = arith.maximumf %133, %134 : vector<32x8xf32>
    %cst_90 = arith.constant 0.000000e+00 : f32
    %136 = vector.broadcast %cst_90 : f32 to vector<32x160xf32>
    %c0_91 = arith.constant 0 : index
    %c0_92 = arith.constant 0 : index
    %137 = vector.load %arg26[%c0_91, %c0_92] : memref<32x160xf32, #tpu.memory_space<vmem>>, vector<32x160xf32>
    tpu.vector_store %arg26[%c0_91, %c0_92], %136 {strides = array<i32>} : memref<32x160xf32, #tpu.memory_space<vmem>>, vector<32x160xf32>,
    %138 = vector.extract_strided_slice %135 {offsets = [0, 0], sizes = [15, 8], strides = [1, 1]} : vector<32x8xf32> to vector<15x8xf32>
    %c1_93 = arith.constant 1 : index
    %c0_94 = arith.constant 0 : index
    %139 = vector.load %arg26[%c1_93, %c0_94] : memref<32x160xf32, #tpu.memory_space<vmem>>, vector<15x8xf32>
    tpu.vector_store %arg26[%c1_93, %c0_94], %138 {strides = array<i32>} : memref<32x160xf32, #tpu.memory_space<vmem>>, vector<15x8xf32>,
    %140 = vector.extract_strided_slice %135 {offsets = [16, 0], sizes = [15, 8], strides = [1, 1]} : vector<32x8xf32> to vector<15x8xf32>
    %c17_95 = arith.constant 17 : index
    %c0_96 = arith.constant 0 : index
    %141 = vector.load %arg26[%c17_95, %c0_96] : memref<32x160xf32, #tpu.memory_space<vmem>>, vector<15x8xf32>
    tpu.vector_store %arg26[%c17_95, %c0_96], %140 {strides = array<i32>} : memref<32x160xf32, #tpu.memory_space<vmem>>, vector<15x8xf32>,
    %142 = vector.extract_strided_slice %135 {offsets = [0, 0], sizes = [16, 8], strides = [1, 1]} : vector<32x8xf32> to vector<16x8xf32>
    %c0_97 = arith.constant 0 : index
    %c8_98 = arith.constant 8 : index
    %143 = vector.load %arg26[%c0_97, %c8_98] : memref<32x160xf32, #tpu.memory_space<vmem>>, vector<16x8xf32>
    tpu.vector_store %arg26[%c0_97, %c8_98], %142 {strides = array<i32>} : memref<32x160xf32, #tpu.memory_space<vmem>>, vector<16x8xf32>,
    %144 = vector.extract_strided_slice %135 {offsets = [16, 0], sizes = [16, 8], strides = [1, 1]} : vector<32x8xf32> to vector<16x8xf32>
    %c16_99 = arith.constant 16 : index
    %c8_100 = arith.constant 8 : index
    %145 = vector.load %arg26[%c16_99, %c8_100] : memref<32x160xf32, #tpu.memory_space<vmem>>, vector<16x8xf32>
    tpu.vector_store %arg26[%c16_99, %c8_100], %144 {strides = array<i32>} : memref<32x160xf32, #tpu.memory_space<vmem>>, vector<16x8xf32>,
    %146 = vector.extract_strided_slice %135 {offsets = [1, 0], sizes = [15, 8], strides = [1, 1]} : vector<32x8xf32> to vector<15x8xf32>
    %c0_101 = arith.constant 0 : index
    %c16_102 = arith.constant 16 : index
    %147 = vector.load %arg26[%c0_101, %c16_102] : memref<32x160xf32, #tpu.memory_space<vmem>>, vector<15x8xf32>
    tpu.vector_store %arg26[%c0_101, %c16_102], %146 {strides = array<i32>} : memref<32x160xf32, #tpu.memory_space<vmem>>, vector<15x8xf32>,
    %148 = vector.extract_strided_slice %135 {offsets = [17, 0], sizes = [15, 8], strides = [1, 1]} : vector<32x8xf32> to vector<15x8xf32>
    %c16_103 = arith.constant 16 : index
    %c16_104 = arith.constant 16 : index
    %149 = vector.load %arg26[%c16_103, %c16_104] : memref<32x160xf32, #tpu.memory_space<vmem>>, vector<15x8xf32>
    tpu.vector_store %arg26[%c16_103, %c16_104], %148 {strides = array<i32>} : memref<32x160xf32, #tpu.memory_space<vmem>>, vector<15x8xf32>,
    %c0_105 = arith.constant 0 : index
    %c0_106 = arith.constant 0 : index
    %150 = vector.load %arg26[%c0_105, %c0_106] : memref<32x160xf32, #tpu.memory_space<vmem>>, vector<32x24xf32>
    %c0_107 = arith.constant 0 : index
    %c0_108 = arith.constant 0 : index
    %151 = vector.load %arg5[%c0_107, %c0_108] : memref<24x8xf32, #tpu.memory_space<vmem>>, vector<24x8xf32>
    %cst_109 = arith.constant dense<0.000000e+00> : vector<32x8xf32>
    %152 = tpu.matmul %150, %151, %cst_109 {dimension_numbers = #tpu.dot_dimension_numbers<[1], [0], [0], [1], [0, 0, 1, 1], [], []>} : vector<32x24xf32>, vector<24x8xf32>, vector<32x8xf32> -> vector<32x8xf32>
    %cst_110 = arith.constant dense<0.000000e+00> : vector<8xf32>
    %153 = vector.multi_reduction <add>, %152, %cst_110 [0] : vector<32x8xf32> to vector<8xf32>
    %154 = vector.shape_cast %153 : vector<8xf32> to vector<1x8xf32>
    %cst_111 = arith.constant 3.200000e+01 : f32
    %155 = vector.broadcast %cst_111 : f32 to vector<1x8xf32>
    %156 = arith.divf %154, %155 : vector<1x8xf32>
    %157 = vector.broadcast %156 : vector<1x8xf32> to vector<32x8xf32>
    %158 = arith.subf %152, %157 : vector<32x8xf32>
    %159 = arith.mulf %158, %158 : vector<32x8xf32>
    %cst_112 = arith.constant dense<0.000000e+00> : vector<8xf32>
    %160 = vector.multi_reduction <add>, %159, %cst_112 [0] : vector<32x8xf32> to vector<8xf32>
    %161 = vector.shape_cast %160 : vector<8xf32> to vector<1x8xf32>
    %cst_113 = arith.constant 3.200000e+01 : f32
    %162 = vector.broadcast %cst_113 : f32 to vector<1x8xf32>
    %163 = arith.divf %161, %162 : vector<1x8xf32>
    %c0_114 = arith.constant 0 : index
    %c0_115 = arith.constant 0 : index
    %164 = vector.load %arg6[%c0_114, %c0_115] : memref<2x8xf32, #tpu.memory_space<vmem>>, vector<1x8xf32>
    %cst_116 = arith.constant 9.99999974E-6 : f32
    %165 = vector.broadcast %cst_116 : f32 to vector<1x8xf32>
    %166 = arith.addf %163, %165 : vector<1x8xf32>
    %167 = math.rsqrt %166 : vector<1x8xf32>
    %168 = arith.mulf %164, %167 : vector<1x8xf32>
    %169 = vector.broadcast %168 : vector<1x8xf32> to vector<32x8xf32>
    %170 = arith.mulf %158, %169 : vector<32x8xf32>
    %c1_117 = arith.constant 1 : index
    %c0_118 = arith.constant 0 : index
    %171 = vector.load %arg6[%c1_117, %c0_118] : memref<2x8xf32, #tpu.memory_space<vmem>>, vector<1x8xf32>
    %172 = vector.broadcast %171 : vector<1x8xf32> to vector<32x8xf32>
    %173 = arith.addf %170, %172 : vector<32x8xf32>
    %174 = arith.addf %173, %23 : vector<32x8xf32>
    %cst_119 = arith.constant 0.000000e+00 : f32
    %175 = vector.broadcast %cst_119 : f32 to vector<32x8xf32>
    %176 = arith.maximumf %174, %175 : vector<32x8xf32>
    %c0_120 = arith.constant 0 : index
    %c0_121 = arith.constant 0 : index
    %177 = vector.load %arg15[%c0_120, %c0_121] : memref<8x16xf32, #tpu.memory_space<vmem>>, vector<8x16xf32>
    %cst_122 = arith.constant dense<0.000000e+00> : vector<32x16xf32>
    %178 = tpu.matmul %176, %177, %cst_122 {dimension_numbers = #tpu.dot_dimension_numbers<[1], [0], [0], [1], [0, 0, 1, 1], [], []>} : vector<32x8xf32>, vector<8x16xf32>, vector<32x16xf32> -> vector<32x16xf32>
    %cst_123 = arith.constant dense<0.000000e+00> : vector<16xf32>
    %179 = vector.multi_reduction <add>, %178, %cst_123 [0] : vector<32x16xf32> to vector<16xf32>
    %180 = vector.shape_cast %179 : vector<16xf32> to vector<1x16xf32>
    %cst_124 = arith.constant 3.200000e+01 : f32
    %181 = vector.broadcast %cst_124 : f32 to vector<1x16xf32>
    %182 = arith.divf %180, %181 : vector<1x16xf32>
    %183 = vector.broadcast %182 : vector<1x16xf32> to vector<32x16xf32>
    %184 = arith.subf %178, %183 : vector<32x16xf32>
    %185 = arith.mulf %184, %184 : vector<32x16xf32>
    %cst_125 = arith.constant dense<0.000000e+00> : vector<16xf32>
    %186 = vector.multi_reduction <add>, %185, %cst_125 [0] : vector<32x16xf32> to vector<16xf32>
    %187 = vector.shape_cast %186 : vector<16xf32> to vector<1x16xf32>
    %cst_126 = arith.constant 3.200000e+01 : f32
    %188 = vector.broadcast %cst_126 : f32 to vector<1x16xf32>
    %189 = arith.divf %187, %188 : vector<1x16xf32>
    %c0_127 = arith.constant 0 : index
    %c0_128 = arith.constant 0 : index
    %190 = vector.load %arg16[%c0_127, %c0_128] : memref<2x16xf32, #tpu.memory_space<vmem>>, vector<1x16xf32>
    %cst_129 = arith.constant 9.99999974E-6 : f32
    %191 = vector.broadcast %cst_129 : f32 to vector<1x16xf32>
    %192 = arith.addf %189, %191 : vector<1x16xf32>
    %193 = math.rsqrt %192 : vector<1x16xf32>
    %194 = arith.mulf %190, %193 : vector<1x16xf32>
    %195 = vector.broadcast %194 : vector<1x16xf32> to vector<32x16xf32>
    %196 = arith.mulf %184, %195 : vector<32x16xf32>
    %c1_130 = arith.constant 1 : index
    %c0_131 = arith.constant 0 : index
    %197 = vector.load %arg16[%c1_130, %c0_131] : memref<2x16xf32, #tpu.memory_space<vmem>>, vector<1x16xf32>
    %198 = vector.broadcast %197 : vector<1x16xf32> to vector<32x16xf32>
    %199 = arith.addf %196, %198 : vector<32x16xf32>
    %cst_132 = arith.constant 0.000000e+00 : f32
    %200 = vector.broadcast %cst_132 : f32 to vector<32x160xf32>
    %c0_133 = arith.constant 0 : index
    %c0_134 = arith.constant 0 : index
    %201 = vector.load %arg26[%c0_133, %c0_134] : memref<32x160xf32, #tpu.memory_space<vmem>>, vector<32x160xf32>
    tpu.vector_store %arg26[%c0_133, %c0_134], %200 {strides = array<i32>} : memref<32x160xf32, #tpu.memory_space<vmem>>, vector<32x160xf32>,
    %202 = vector.extract_strided_slice %176 {offsets = [0, 0], sizes = [12, 8], strides = [1, 1]} : vector<32x8xf32> to vector<12x8xf32>
    %c4_135 = arith.constant 4 : index
    %c0_136 = arith.constant 0 : index
    %203 = vector.load %arg26[%c4_135, %c0_136] : memref<32x160xf32, #tpu.memory_space<vmem>>, vector<12x8xf32>
    tpu.vector_store %arg26[%c4_135, %c0_136], %202 {strides = array<i32>} : memref<32x160xf32, #tpu.memory_space<vmem>>, vector<12x8xf32>,
    %204 = vector.extract_strided_slice %176 {offsets = [16, 0], sizes = [12, 8], strides = [1, 1]} : vector<32x8xf32> to vector<12x8xf32>
    %c20_137 = arith.constant 20 : index
    %c0_138 = arith.constant 0 : index
    %205 = vector.load %arg26[%c20_137, %c0_138] : memref<32x160xf32, #tpu.memory_space<vmem>>, vector<12x8xf32>
    tpu.vector_store %arg26[%c20_137, %c0_138], %204 {strides = array<i32>} : memref<32x160xf32, #tpu.memory_space<vmem>>, vector<12x8xf32>,
    %206 = vector.extract_strided_slice %176 {offsets = [0, 0], sizes = [13, 8], strides = [1, 1]} : vector<32x8xf32> to vector<13x8xf32>
    %c3_139 = arith.constant 3 : index
    %c8_140 = arith.constant 8 : index
    %207 = vector.load %arg26[%c3_139, %c8_140] : memref<32x160xf32, #tpu.memory_space<vmem>>, vector<13x8xf32>
    tpu.vector_store %arg26[%c3_139, %c8_140], %206 {strides = array<i32>} : memref<32x160xf32, #tpu.memory_space<vmem>>, vector<13x8xf32>,
    %208 = vector.extract_strided_slice %176 {offsets = [16, 0], sizes = [13, 8], strides = [1, 1]} : vector<32x8xf32> to vector<13x8xf32>
    %c19_141 = arith.constant 19 : index
    %c8_142 = arith.constant 8 : index
    %209 = vector.load %arg26[%c19_141, %c8_142] : memref<32x160xf32, #tpu.memory_space<vmem>>, vector<13x8xf32>
    tpu.vector_store %arg26[%c19_141, %c8_142], %208 {strides = array<i32>} : memref<32x160xf32, #tpu.memory_space<vmem>>, vector<13x8xf32>,
    %210 = vector.extract_strided_slice %176 {offsets = [0, 0], sizes = [14, 8], strides = [1, 1]} : vector<32x8xf32> to vector<14x8xf32>
    %c2_143 = arith.constant 2 : index
    %c16_144 = arith.constant 16 : index
    %211 = vector.load %arg26[%c2_143, %c16_144] : memref<32x160xf32, #tpu.memory_space<vmem>>, vector<14x8xf32>
    tpu.vector_store %arg26[%c2_143, %c16_144], %210 {strides = array<i32>} : memref<32x160xf32, #tpu.memory_space<vmem>>, vector<14x8xf32>,
    %212 = vector.extract_strided_slice %176 {offsets = [16, 0], sizes = [14, 8], strides = [1, 1]} : vector<32x8xf32> to vector<14x8xf32>
    %c18_145 = arith.constant 18 : index
    %c16_146 = arith.constant 16 : index
    %213 = vector.load %arg26[%c18_145, %c16_146] : memref<32x160xf32, #tpu.memory_space<vmem>>, vector<14x8xf32>
    tpu.vector_store %arg26[%c18_145, %c16_146], %212 {strides = array<i32>} : memref<32x160xf32, #tpu.memory_space<vmem>>, vector<14x8xf32>,
    %214 = vector.extract_strided_slice %176 {offsets = [0, 0], sizes = [15, 8], strides = [1, 1]} : vector<32x8xf32> to vector<15x8xf32>
    %c1_147 = arith.constant 1 : index
    %c24_148 = arith.constant 24 : index
    %215 = vector.load %arg26[%c1_147, %c24_148] : memref<32x160xf32, #tpu.memory_space<vmem>>, vector<15x8xf32>
    tpu.vector_store %arg26[%c1_147, %c24_148], %214 {strides = array<i32>} : memref<32x160xf32, #tpu.memory_space<vmem>>, vector<15x8xf32>,
    %216 = vector.extract_strided_slice %176 {offsets = [16, 0], sizes = [15, 8], strides = [1, 1]} : vector<32x8xf32> to vector<15x8xf32>
    %c17_149 = arith.constant 17 : index
    %c24_150 = arith.constant 24 : index
    %217 = vector.load %arg26[%c17_149, %c24_150] : memref<32x160xf32, #tpu.memory_space<vmem>>, vector<15x8xf32>
    tpu.vector_store %arg26[%c17_149, %c24_150], %216 {strides = array<i32>} : memref<32x160xf32, #tpu.memory_space<vmem>>, vector<15x8xf32>,
    %218 = vector.extract_strided_slice %176 {offsets = [0, 0], sizes = [16, 8], strides = [1, 1]} : vector<32x8xf32> to vector<16x8xf32>
    %c0_151 = arith.constant 0 : index
    %c32_152 = arith.constant 32 : index
    %219 = vector.load %arg26[%c0_151, %c32_152] : memref<32x160xf32, #tpu.memory_space<vmem>>, vector<16x8xf32>
    tpu.vector_store %arg26[%c0_151, %c32_152], %218 {strides = array<i32>} : memref<32x160xf32, #tpu.memory_space<vmem>>, vector<16x8xf32>,
    %220 = vector.extract_strided_slice %176 {offsets = [16, 0], sizes = [16, 8], strides = [1, 1]} : vector<32x8xf32> to vector<16x8xf32>
    %c16_153 = arith.constant 16 : index
    %c32_154 = arith.constant 32 : index
    %221 = vector.load %arg26[%c16_153, %c32_154] : memref<32x160xf32, #tpu.memory_space<vmem>>, vector<16x8xf32>
    tpu.vector_store %arg26[%c16_153, %c32_154], %220 {strides = array<i32>} : memref<32x160xf32, #tpu.memory_space<vmem>>, vector<16x8xf32>,
    %222 = vector.extract_strided_slice %176 {offsets = [1, 0], sizes = [15, 8], strides = [1, 1]} : vector<32x8xf32> to vector<15x8xf32>
    %c0_155 = arith.constant 0 : index
    %c40 = arith.constant 40 : index
    %223 = vector.load %arg26[%c0_155, %c40] : memref<32x160xf32, #tpu.memory_space<vmem>>, vector<15x8xf32>
    tpu.vector_store %arg26[%c0_155, %c40], %222 {strides = array<i32>} : memref<32x160xf32, #tpu.memory_space<vmem>>, vector<15x8xf32>,
    %224 = vector.extract_strided_slice %176 {offsets = [17, 0], sizes = [15, 8], strides = [1, 1]} : vector<32x8xf32> to vector<15x8xf32>
    %c16_156 = arith.constant 16 : index
    %c40_157 = arith.constant 40 : index
    %225 = vector.load %arg26[%c16_156, %c40_157] : memref<32x160xf32, #tpu.memory_space<vmem>>, vector<15x8xf32>
    tpu.vector_store %arg26[%c16_156, %c40_157], %224 {strides = array<i32>} : memref<32x160xf32, #tpu.memory_space<vmem>>, vector<15x8xf32>,
    %226 = vector.extract_strided_slice %176 {offsets = [2, 0], sizes = [14, 8], strides = [1, 1]} : vector<32x8xf32> to vector<14x8xf32>
    %c0_158 = arith.constant 0 : index
    %c48 = arith.constant 48 : index
    %227 = vector.load %arg26[%c0_158, %c48] : memref<32x160xf32, #tpu.memory_space<vmem>>, vector<14x8xf32>
    tpu.vector_store %arg26[%c0_158, %c48], %226 {strides = array<i32>} : memref<32x160xf32, #tpu.memory_space<vmem>>, vector<14x8xf32>,
    %228 = vector.extract_strided_slice %176 {offsets = [18, 0], sizes = [14, 8], strides = [1, 1]} : vector<32x8xf32> to vector<14x8xf32>
    %c16_159 = arith.constant 16 : index
    %c48_160 = arith.constant 48 : index
    %229 = vector.load %arg26[%c16_159, %c48_160] : memref<32x160xf32, #tpu.memory_space<vmem>>, vector<14x8xf32>
    tpu.vector_store %arg26[%c16_159, %c48_160], %228 {strides = array<i32>} : memref<32x160xf32, #tpu.memory_space<vmem>>, vector<14x8xf32>,
    %230 = vector.extract_strided_slice %176 {offsets = [3, 0], sizes = [13, 8], strides = [1, 1]} : vector<32x8xf32> to vector<13x8xf32>
    %c0_161 = arith.constant 0 : index
    %c56 = arith.constant 56 : index
    %231 = vector.load %arg26[%c0_161, %c56] : memref<32x160xf32, #tpu.memory_space<vmem>>, vector<13x8xf32>
    tpu.vector_store %arg26[%c0_161, %c56], %230 {strides = array<i32>} : memref<32x160xf32, #tpu.memory_space<vmem>>, vector<13x8xf32>,
    %232 = vector.extract_strided_slice %176 {offsets = [19, 0], sizes = [13, 8], strides = [1, 1]} : vector<32x8xf32> to vector<13x8xf32>
    %c16_162 = arith.constant 16 : index
    %c56_163 = arith.constant 56 : index
    %233 = vector.load %arg26[%c16_162, %c56_163] : memref<32x160xf32, #tpu.memory_space<vmem>>, vector<13x8xf32>
    tpu.vector_store %arg26[%c16_162, %c56_163], %232 {strides = array<i32>} : memref<32x160xf32, #tpu.memory_space<vmem>>, vector<13x8xf32>,
    %234 = vector.extract_strided_slice %176 {offsets = [4, 0], sizes = [12, 8], strides = [1, 1]} : vector<32x8xf32> to vector<12x8xf32>
    %c0_164 = arith.constant 0 : index
    %c64 = arith.constant 64 : index
    %235 = vector.load %arg26[%c0_164, %c64] : memref<32x160xf32, #tpu.memory_space<vmem>>, vector<12x8xf32>
    tpu.vector_store %arg26[%c0_164, %c64], %234 {strides = array<i32>} : memref<32x160xf32, #tpu.memory_space<vmem>>, vector<12x8xf32>,
    %236 = vector.extract_strided_slice %176 {offsets = [20, 0], sizes = [12, 8], strides = [1, 1]} : vector<32x8xf32> to vector<12x8xf32>
    %c16_165 = arith.constant 16 : index
    %c64_166 = arith.constant 64 : index
    %237 = vector.load %arg26[%c16_165, %c64_166] : memref<32x160xf32, #tpu.memory_space<vmem>>, vector<12x8xf32>
    tpu.vector_store %arg26[%c16_165, %c64_166], %236 {strides = array<i32>} : memref<32x160xf32, #tpu.memory_space<vmem>>, vector<12x8xf32>,
    %c0_167 = arith.constant 0 : index
    %c0_168 = arith.constant 0 : index
    %238 = vector.load %arg26[%c0_167, %c0_168] : memref<32x160xf32, #tpu.memory_space<vmem>>, vector<32x72xf32>
    %c0_169 = arith.constant 0 : index
    %c0_170 = arith.constant 0 : index
    %239 = vector.load %arg9[%c0_169, %c0_170] : memref<72x16xf32, #tpu.memory_space<vmem>>, vector<72x16xf32>
    %cst_171 = arith.constant dense<0.000000e+00> : vector<32x16xf32>
    %240 = tpu.matmul %238, %239, %cst_171 {dimension_numbers = #tpu.dot_dimension_numbers<[1], [0], [0], [1], [0, 0, 1, 1], [], []>} : vector<32x72xf32>, vector<72x16xf32>, vector<32x16xf32> -> vector<32x16xf32>
    %cst_172 = arith.constant dense<0.000000e+00> : vector<16xf32>
    %241 = vector.multi_reduction <add>, %240, %cst_172 [0] : vector<32x16xf32> to vector<16xf32>
    %242 = vector.shape_cast %241 : vector<16xf32> to vector<1x16xf32>
    %cst_173 = arith.constant 3.200000e+01 : f32
    %243 = vector.broadcast %cst_173 : f32 to vector<1x16xf32>
    %244 = arith.divf %242, %243 : vector<1x16xf32>
    %245 = vector.broadcast %244 : vector<1x16xf32> to vector<32x16xf32>
    %246 = arith.subf %240, %245 : vector<32x16xf32>
    %247 = arith.mulf %246, %246 : vector<32x16xf32>
    %cst_174 = arith.constant dense<0.000000e+00> : vector<16xf32>
    %248 = vector.multi_reduction <add>, %247, %cst_174 [0] : vector<32x16xf32> to vector<16xf32>
    %249 = vector.shape_cast %248 : vector<16xf32> to vector<1x16xf32>
    %cst_175 = arith.constant 3.200000e+01 : f32
    %250 = vector.broadcast %cst_175 : f32 to vector<1x16xf32>
    %251 = arith.divf %249, %250 : vector<1x16xf32>
    %c0_176 = arith.constant 0 : index
    %c0_177 = arith.constant 0 : index
    %252 = vector.load %arg10[%c0_176, %c0_177] : memref<2x16xf32, #tpu.memory_space<vmem>>, vector<1x16xf32>
    %cst_178 = arith.constant 9.99999974E-6 : f32
    %253 = vector.broadcast %cst_178 : f32 to vector<1x16xf32>
    %254 = arith.addf %251, %253 : vector<1x16xf32>
    %255 = math.rsqrt %254 : vector<1x16xf32>
    %256 = arith.mulf %252, %255 : vector<1x16xf32>
    %257 = vector.broadcast %256 : vector<1x16xf32> to vector<32x16xf32>
    %258 = arith.mulf %246, %257 : vector<32x16xf32>
    %c1_179 = arith.constant 1 : index
    %c0_180 = arith.constant 0 : index
    %259 = vector.load %arg10[%c1_179, %c0_180] : memref<2x16xf32, #tpu.memory_space<vmem>>, vector<1x16xf32>
    %260 = vector.broadcast %259 : vector<1x16xf32> to vector<32x16xf32>
    %261 = arith.addf %258, %260 : vector<32x16xf32>
    %cst_181 = arith.constant 0.000000e+00 : f32
    %262 = vector.broadcast %cst_181 : f32 to vector<32x16xf32>
    %263 = arith.maximumf %261, %262 : vector<32x16xf32>
    %cst_182 = arith.constant 0.000000e+00 : f32
    %264 = vector.broadcast %cst_182 : f32 to vector<32x160xf32>
    %c0_183 = arith.constant 0 : index
    %c0_184 = arith.constant 0 : index
    %265 = vector.load %arg26[%c0_183, %c0_184] : memref<32x160xf32, #tpu.memory_space<vmem>>, vector<32x160xf32>
    tpu.vector_store %arg26[%c0_183, %c0_184], %264 {strides = array<i32>} : memref<32x160xf32, #tpu.memory_space<vmem>>, vector<32x160xf32>,
    %266 = vector.extract_strided_slice %263 {offsets = [0, 0], sizes = [14, 16], strides = [1, 1]} : vector<32x16xf32> to vector<14x16xf32>
    %c2_185 = arith.constant 2 : index
    %c0_186 = arith.constant 0 : index
    %267 = vector.load %arg26[%c2_185, %c0_186] : memref<32x160xf32, #tpu.memory_space<vmem>>, vector<14x16xf32>
    tpu.vector_store %arg26[%c2_185, %c0_186], %266 {strides = array<i32>} : memref<32x160xf32, #tpu.memory_space<vmem>>, vector<14x16xf32>,
    %268 = vector.extract_strided_slice %263 {offsets = [16, 0], sizes = [14, 16], strides = [1, 1]} : vector<32x16xf32> to vector<14x16xf32>
    %c18_187 = arith.constant 18 : index
    %c0_188 = arith.constant 0 : index
    %269 = vector.load %arg26[%c18_187, %c0_188] : memref<32x160xf32, #tpu.memory_space<vmem>>, vector<14x16xf32>
    tpu.vector_store %arg26[%c18_187, %c0_188], %268 {strides = array<i32>} : memref<32x160xf32, #tpu.memory_space<vmem>>, vector<14x16xf32>,
    %270 = vector.extract_strided_slice %263 {offsets = [0, 0], sizes = [15, 16], strides = [1, 1]} : vector<32x16xf32> to vector<15x16xf32>
    %c1_189 = arith.constant 1 : index
    %c16_190 = arith.constant 16 : index
    %271 = vector.load %arg26[%c1_189, %c16_190] : memref<32x160xf32, #tpu.memory_space<vmem>>, vector<15x16xf32>
    tpu.vector_store %arg26[%c1_189, %c16_190], %270 {strides = array<i32>} : memref<32x160xf32, #tpu.memory_space<vmem>>, vector<15x16xf32>,
    %272 = vector.extract_strided_slice %263 {offsets = [16, 0], sizes = [15, 16], strides = [1, 1]} : vector<32x16xf32> to vector<15x16xf32>
    %c17_191 = arith.constant 17 : index
    %c16_192 = arith.constant 16 : index
    %273 = vector.load %arg26[%c17_191, %c16_192] : memref<32x160xf32, #tpu.memory_space<vmem>>, vector<15x16xf32>
    tpu.vector_store %arg26[%c17_191, %c16_192], %272 {strides = array<i32>} : memref<32x160xf32, #tpu.memory_space<vmem>>, vector<15x16xf32>,
    %274 = vector.extract_strided_slice %263 {offsets = [0, 0], sizes = [16, 16], strides = [1, 1]} : vector<32x16xf32> to vector<16x16xf32>
    %c0_193 = arith.constant 0 : index
    %c32_194 = arith.constant 32 : index
    %275 = vector.load %arg26[%c0_193, %c32_194] : memref<32x160xf32, #tpu.memory_space<vmem>>, vector<16x16xf32>
    tpu.vector_store %arg26[%c0_193, %c32_194], %274 {strides = array<i32>} : memref<32x160xf32, #tpu.memory_space<vmem>>, vector<16x16xf32>,
    %276 = vector.extract_strided_slice %263 {offsets = [16, 0], sizes = [16, 16], strides = [1, 1]} : vector<32x16xf32> to vector<16x16xf32>
    %c16_195 = arith.constant 16 : index
    %c32_196 = arith.constant 32 : index
    %277 = vector.load %arg26[%c16_195, %c32_196] : memref<32x160xf32, #tpu.memory_space<vmem>>, vector<16x16xf32>
    tpu.vector_store %arg26[%c16_195, %c32_196], %276 {strides = array<i32>} : memref<32x160xf32, #tpu.memory_space<vmem>>, vector<16x16xf32>,
    %278 = vector.extract_strided_slice %263 {offsets = [1, 0], sizes = [15, 16], strides = [1, 1]} : vector<32x16xf32> to vector<15x16xf32>
    %c0_197 = arith.constant 0 : index
    %c48_198 = arith.constant 48 : index
    %279 = vector.load %arg26[%c0_197, %c48_198] : memref<32x160xf32, #tpu.memory_space<vmem>>, vector<15x16xf32>
    tpu.vector_store %arg26[%c0_197, %c48_198], %278 {strides = array<i32>} : memref<32x160xf32, #tpu.memory_space<vmem>>, vector<15x16xf32>,
    %280 = vector.extract_strided_slice %263 {offsets = [17, 0], sizes = [15, 16], strides = [1, 1]} : vector<32x16xf32> to vector<15x16xf32>
    %c16_199 = arith.constant 16 : index
    %c48_200 = arith.constant 48 : index
    %281 = vector.load %arg26[%c16_199, %c48_200] : memref<32x160xf32, #tpu.memory_space<vmem>>, vector<15x16xf32>
    tpu.vector_store %arg26[%c16_199, %c48_200], %280 {strides = array<i32>} : memref<32x160xf32, #tpu.memory_space<vmem>>, vector<15x16xf32>,
    %282 = vector.extract_strided_slice %263 {offsets = [2, 0], sizes = [14, 16], strides = [1, 1]} : vector<32x16xf32> to vector<14x16xf32>
    %c0_201 = arith.constant 0 : index
    %c64_202 = arith.constant 64 : index
    %283 = vector.load %arg26[%c0_201, %c64_202] : memref<32x160xf32, #tpu.memory_space<vmem>>, vector<14x16xf32>
    tpu.vector_store %arg26[%c0_201, %c64_202], %282 {strides = array<i32>} : memref<32x160xf32, #tpu.memory_space<vmem>>, vector<14x16xf32>,
    %284 = vector.extract_strided_slice %263 {offsets = [18, 0], sizes = [14, 16], strides = [1, 1]} : vector<32x16xf32> to vector<14x16xf32>
    %c16_203 = arith.constant 16 : index
    %c64_204 = arith.constant 64 : index
    %285 = vector.load %arg26[%c16_203, %c64_204] : memref<32x160xf32, #tpu.memory_space<vmem>>, vector<14x16xf32>
    tpu.vector_store %arg26[%c16_203, %c64_204], %284 {strides = array<i32>} : memref<32x160xf32, #tpu.memory_space<vmem>>, vector<14x16xf32>,
    %c0_205 = arith.constant 0 : index
    %c0_206 = arith.constant 0 : index
    %286 = vector.load %arg26[%c0_205, %c0_206] : memref<32x160xf32, #tpu.memory_space<vmem>>, vector<32x80xf32>
    %c0_207 = arith.constant 0 : index
    %c0_208 = arith.constant 0 : index
    %287 = vector.load %arg11[%c0_207, %c0_208] : memref<80x16xf32, #tpu.memory_space<vmem>>, vector<80x16xf32>
    %cst_209 = arith.constant dense<0.000000e+00> : vector<32x16xf32>
    %288 = tpu.matmul %286, %287, %cst_209 {dimension_numbers = #tpu.dot_dimension_numbers<[1], [0], [0], [1], [0, 0, 1, 1], [], []>} : vector<32x80xf32>, vector<80x16xf32>, vector<32x16xf32> -> vector<32x16xf32>
    %cst_210 = arith.constant dense<0.000000e+00> : vector<16xf32>
    %289 = vector.multi_reduction <add>, %288, %cst_210 [0] : vector<32x16xf32> to vector<16xf32>
    %290 = vector.shape_cast %289 : vector<16xf32> to vector<1x16xf32>
    %cst_211 = arith.constant 3.200000e+01 : f32
    %291 = vector.broadcast %cst_211 : f32 to vector<1x16xf32>
    %292 = arith.divf %290, %291 : vector<1x16xf32>
    %293 = vector.broadcast %292 : vector<1x16xf32> to vector<32x16xf32>
    %294 = arith.subf %288, %293 : vector<32x16xf32>
    %295 = arith.mulf %294, %294 : vector<32x16xf32>
    %cst_212 = arith.constant dense<0.000000e+00> : vector<16xf32>
    %296 = vector.multi_reduction <add>, %295, %cst_212 [0] : vector<32x16xf32> to vector<16xf32>
    %297 = vector.shape_cast %296 : vector<16xf32> to vector<1x16xf32>
    %cst_213 = arith.constant 3.200000e+01 : f32
    %298 = vector.broadcast %cst_213 : f32 to vector<1x16xf32>
    %299 = arith.divf %297, %298 : vector<1x16xf32>
    %c0_214 = arith.constant 0 : index
    %c0_215 = arith.constant 0 : index
    %300 = vector.load %arg12[%c0_214, %c0_215] : memref<2x16xf32, #tpu.memory_space<vmem>>, vector<1x16xf32>
    %cst_216 = arith.constant 9.99999974E-6 : f32
    %301 = vector.broadcast %cst_216 : f32 to vector<1x16xf32>
    %302 = arith.addf %299, %301 : vector<1x16xf32>
    %303 = math.rsqrt %302 : vector<1x16xf32>
    %304 = arith.mulf %300, %303 : vector<1x16xf32>
    %305 = vector.broadcast %304 : vector<1x16xf32> to vector<32x16xf32>
    %306 = arith.mulf %294, %305 : vector<32x16xf32>
    %c1_217 = arith.constant 1 : index
    %c0_218 = arith.constant 0 : index
    %307 = vector.load %arg12[%c1_217, %c0_218] : memref<2x16xf32, #tpu.memory_space<vmem>>, vector<1x16xf32>
    %308 = vector.broadcast %307 : vector<1x16xf32> to vector<32x16xf32>
    %309 = arith.addf %306, %308 : vector<32x16xf32>
    %cst_219 = arith.constant 0.000000e+00 : f32
    %310 = vector.broadcast %cst_219 : f32 to vector<32x16xf32>
    %311 = arith.maximumf %309, %310 : vector<32x16xf32>
    %cst_220 = arith.constant 0.000000e+00 : f32
    %312 = vector.broadcast %cst_220 : f32 to vector<32x160xf32>
    %c0_221 = arith.constant 0 : index
    %c0_222 = arith.constant 0 : index
    %313 = vector.load %arg26[%c0_221, %c0_222] : memref<32x160xf32, #tpu.memory_space<vmem>>, vector<32x160xf32>
    tpu.vector_store %arg26[%c0_221, %c0_222], %312 {strides = array<i32>} : memref<32x160xf32, #tpu.memory_space<vmem>>, vector<32x160xf32>,
    %314 = vector.extract_strided_slice %311 {offsets = [0, 0], sizes = [15, 16], strides = [1, 1]} : vector<32x16xf32> to vector<15x16xf32>
    %c1_223 = arith.constant 1 : index
    %c0_224 = arith.constant 0 : index
    %315 = vector.load %arg26[%c1_223, %c0_224] : memref<32x160xf32, #tpu.memory_space<vmem>>, vector<15x16xf32>
    tpu.vector_store %arg26[%c1_223, %c0_224], %314 {strides = array<i32>} : memref<32x160xf32, #tpu.memory_space<vmem>>, vector<15x16xf32>,
    %316 = vector.extract_strided_slice %311 {offsets = [16, 0], sizes = [15, 16], strides = [1, 1]} : vector<32x16xf32> to vector<15x16xf32>
    %c17_225 = arith.constant 17 : index
    %c0_226 = arith.constant 0 : index
    %317 = vector.load %arg26[%c17_225, %c0_226] : memref<32x160xf32, #tpu.memory_space<vmem>>, vector<15x16xf32>
    tpu.vector_store %arg26[%c17_225, %c0_226], %316 {strides = array<i32>} : memref<32x160xf32, #tpu.memory_space<vmem>>, vector<15x16xf32>,
    %318 = vector.extract_strided_slice %311 {offsets = [0, 0], sizes = [16, 16], strides = [1, 1]} : vector<32x16xf32> to vector<16x16xf32>
    %c0_227 = arith.constant 0 : index
    %c16_228 = arith.constant 16 : index
    %319 = vector.load %arg26[%c0_227, %c16_228] : memref<32x160xf32, #tpu.memory_space<vmem>>, vector<16x16xf32>
    tpu.vector_store %arg26[%c0_227, %c16_228], %318 {strides = array<i32>} : memref<32x160xf32, #tpu.memory_space<vmem>>, vector<16x16xf32>,
    %320 = vector.extract_strided_slice %311 {offsets = [16, 0], sizes = [16, 16], strides = [1, 1]} : vector<32x16xf32> to vector<16x16xf32>
    %c16_229 = arith.constant 16 : index
    %c16_230 = arith.constant 16 : index
    %321 = vector.load %arg26[%c16_229, %c16_230] : memref<32x160xf32, #tpu.memory_space<vmem>>, vector<16x16xf32>
    tpu.vector_store %arg26[%c16_229, %c16_230], %320 {strides = array<i32>} : memref<32x160xf32, #tpu.memory_space<vmem>>, vector<16x16xf32>,
    %322 = vector.extract_strided_slice %311 {offsets = [1, 0], sizes = [15, 16], strides = [1, 1]} : vector<32x16xf32> to vector<15x16xf32>
    %c0_231 = arith.constant 0 : index
    %c32_232 = arith.constant 32 : index
    %323 = vector.load %arg26[%c0_231, %c32_232] : memref<32x160xf32, #tpu.memory_space<vmem>>, vector<15x16xf32>
    tpu.vector_store %arg26[%c0_231, %c32_232], %322 {strides = array<i32>} : memref<32x160xf32, #tpu.memory_space<vmem>>, vector<15x16xf32>,
    %324 = vector.extract_strided_slice %311 {offsets = [17, 0], sizes = [15, 16], strides = [1, 1]} : vector<32x16xf32> to vector<15x16xf32>
    %c16_233 = arith.constant 16 : index
    %c32_234 = arith.constant 32 : index
    %325 = vector.load %arg26[%c16_233, %c32_234] : memref<32x160xf32, #tpu.memory_space<vmem>>, vector<15x16xf32>
    tpu.vector_store %arg26[%c16_233, %c32_234], %324 {strides = array<i32>} : memref<32x160xf32, #tpu.memory_space<vmem>>, vector<15x16xf32>,
    %c0_235 = arith.constant 0 : index
    %c0_236 = arith.constant 0 : index
    %326 = vector.load %arg26[%c0_235, %c0_236] : memref<32x160xf32, #tpu.memory_space<vmem>>, vector<32x48xf32>
    %c0_237 = arith.constant 0 : index
    %c0_238 = arith.constant 0 : index
    %327 = vector.load %arg13[%c0_237, %c0_238] : memref<48x16xf32, #tpu.memory_space<vmem>>, vector<48x16xf32>
    %cst_239 = arith.constant dense<0.000000e+00> : vector<32x16xf32>
    %328 = tpu.matmul %326, %327, %cst_239 {dimension_numbers = #tpu.dot_dimension_numbers<[1], [0], [0], [1], [0, 0, 1, 1], [], []>} : vector<32x48xf32>, vector<48x16xf32>, vector<32x16xf32> -> vector<32x16xf32>
    %cst_240 = arith.constant dense<0.000000e+00> : vector<16xf32>
    %329 = vector.multi_reduction <add>, %328, %cst_240 [0] : vector<32x16xf32> to vector<16xf32>
    %330 = vector.shape_cast %329 : vector<16xf32> to vector<1x16xf32>
    %cst_241 = arith.constant 3.200000e+01 : f32
    %331 = vector.broadcast %cst_241 : f32 to vector<1x16xf32>
    %332 = arith.divf %330, %331 : vector<1x16xf32>
    %333 = vector.broadcast %332 : vector<1x16xf32> to vector<32x16xf32>
    %334 = arith.subf %328, %333 : vector<32x16xf32>
    %335 = arith.mulf %334, %334 : vector<32x16xf32>
    %cst_242 = arith.constant dense<0.000000e+00> : vector<16xf32>
    %336 = vector.multi_reduction <add>, %335, %cst_242 [0] : vector<32x16xf32> to vector<16xf32>
    %337 = vector.shape_cast %336 : vector<16xf32> to vector<1x16xf32>
    %cst_243 = arith.constant 3.200000e+01 : f32
    %338 = vector.broadcast %cst_243 : f32 to vector<1x16xf32>
    %339 = arith.divf %337, %338 : vector<1x16xf32>
    %c0_244 = arith.constant 0 : index
    %c0_245 = arith.constant 0 : index
    %340 = vector.load %arg14[%c0_244, %c0_245] : memref<2x16xf32, #tpu.memory_space<vmem>>, vector<1x16xf32>
    %cst_246 = arith.constant 9.99999974E-6 : f32
    %341 = vector.broadcast %cst_246 : f32 to vector<1x16xf32>
    %342 = arith.addf %339, %341 : vector<1x16xf32>
    %343 = math.rsqrt %342 : vector<1x16xf32>
    %344 = arith.mulf %340, %343 : vector<1x16xf32>
    %345 = vector.broadcast %344 : vector<1x16xf32> to vector<32x16xf32>
    %346 = arith.mulf %334, %345 : vector<32x16xf32>
    %c1_247 = arith.constant 1 : index
    %c0_248 = arith.constant 0 : index
    %347 = vector.load %arg14[%c1_247, %c0_248] : memref<2x16xf32, #tpu.memory_space<vmem>>, vector<1x16xf32>
    %348 = vector.broadcast %347 : vector<1x16xf32> to vector<32x16xf32>
    %349 = arith.addf %346, %348 : vector<32x16xf32>
    %350 = arith.addf %349, %199 : vector<32x16xf32>
    %cst_249 = arith.constant 0.000000e+00 : f32
    %351 = vector.broadcast %cst_249 : f32 to vector<32x16xf32>
    %352 = arith.maximumf %350, %351 : vector<32x16xf32>
    %c0_250 = arith.constant 0 : index
    %c0_251 = arith.constant 0 : index
    %353 = vector.load %arg23[%c0_250, %c0_251] : memref<16x32xf32, #tpu.memory_space<vmem>>, vector<16x32xf32>
    %cst_252 = arith.constant dense<0.000000e+00> : vector<32x32xf32>
    %354 = tpu.matmul %352, %353, %cst_252 {dimension_numbers = #tpu.dot_dimension_numbers<[1], [0], [0], [1], [0, 0, 1, 1], [], []>} : vector<32x16xf32>, vector<16x32xf32>, vector<32x32xf32> -> vector<32x32xf32>
    %cst_253 = arith.constant dense<0.000000e+00> : vector<32xf32>
    %355 = vector.multi_reduction <add>, %354, %cst_253 [0] : vector<32x32xf32> to vector<32xf32>
    %356 = vector.shape_cast %355 : vector<32xf32> to vector<1x32xf32>
    %cst_254 = arith.constant 3.200000e+01 : f32
    %357 = vector.broadcast %cst_254 : f32 to vector<1x32xf32>
    %358 = arith.divf %356, %357 : vector<1x32xf32>
    %359 = vector.broadcast %358 : vector<1x32xf32> to vector<32x32xf32>
    %360 = arith.subf %354, %359 : vector<32x32xf32>
    %361 = arith.mulf %360, %360 : vector<32x32xf32>
    %cst_255 = arith.constant dense<0.000000e+00> : vector<32xf32>
    %362 = vector.multi_reduction <add>, %361, %cst_255 [0] : vector<32x32xf32> to vector<32xf32>
    %363 = vector.shape_cast %362 : vector<32xf32> to vector<1x32xf32>
    %cst_256 = arith.constant 3.200000e+01 : f32
    %364 = vector.broadcast %cst_256 : f32 to vector<1x32xf32>
    %365 = arith.divf %363, %364 : vector<1x32xf32>
    %c0_257 = arith.constant 0 : index
    %c0_258 = arith.constant 0 : index
    %366 = vector.load %arg24[%c0_257, %c0_258] : memref<2x32xf32, #tpu.memory_space<vmem>>, vector<1x32xf32>
    %cst_259 = arith.constant 9.99999974E-6 : f32
    %367 = vector.broadcast %cst_259 : f32 to vector<1x32xf32>
    %368 = arith.addf %365, %367 : vector<1x32xf32>
    %369 = math.rsqrt %368 : vector<1x32xf32>
    %370 = arith.mulf %366, %369 : vector<1x32xf32>
    %371 = vector.broadcast %370 : vector<1x32xf32> to vector<32x32xf32>
    %372 = arith.mulf %360, %371 : vector<32x32xf32>
    %c1_260 = arith.constant 1 : index
    %c0_261 = arith.constant 0 : index
    %373 = vector.load %arg24[%c1_260, %c0_261] : memref<2x32xf32, #tpu.memory_space<vmem>>, vector<1x32xf32>
    %374 = vector.broadcast %373 : vector<1x32xf32> to vector<32x32xf32>
    %375 = arith.addf %372, %374 : vector<32x32xf32>
    %cst_262 = arith.constant 0.000000e+00 : f32
    %376 = vector.broadcast %cst_262 : f32 to vector<32x160xf32>
    %c0_263 = arith.constant 0 : index
    %c0_264 = arith.constant 0 : index
    %377 = vector.load %arg26[%c0_263, %c0_264] : memref<32x160xf32, #tpu.memory_space<vmem>>, vector<32x160xf32>
    tpu.vector_store %arg26[%c0_263, %c0_264], %376 {strides = array<i32>} : memref<32x160xf32, #tpu.memory_space<vmem>>, vector<32x160xf32>,
    %378 = vector.extract_strided_slice %352 {offsets = [0, 0], sizes = [12, 16], strides = [1, 1]} : vector<32x16xf32> to vector<12x16xf32>
    %c4_265 = arith.constant 4 : index
    %c0_266 = arith.constant 0 : index
    %379 = vector.load %arg26[%c4_265, %c0_266] : memref<32x160xf32, #tpu.memory_space<vmem>>, vector<12x16xf32>
    tpu.vector_store %arg26[%c4_265, %c0_266], %378 {strides = array<i32>} : memref<32x160xf32, #tpu.memory_space<vmem>>, vector<12x16xf32>,
    %380 = vector.extract_strided_slice %352 {offsets = [16, 0], sizes = [12, 16], strides = [1, 1]} : vector<32x16xf32> to vector<12x16xf32>
    %c20_267 = arith.constant 20 : index
    %c0_268 = arith.constant 0 : index
    %381 = vector.load %arg26[%c20_267, %c0_268] : memref<32x160xf32, #tpu.memory_space<vmem>>, vector<12x16xf32>
    tpu.vector_store %arg26[%c20_267, %c0_268], %380 {strides = array<i32>} : memref<32x160xf32, #tpu.memory_space<vmem>>, vector<12x16xf32>,
    %382 = vector.extract_strided_slice %352 {offsets = [0, 0], sizes = [13, 16], strides = [1, 1]} : vector<32x16xf32> to vector<13x16xf32>
    %c3_269 = arith.constant 3 : index
    %c16_270 = arith.constant 16 : index
    %383 = vector.load %arg26[%c3_269, %c16_270] : memref<32x160xf32, #tpu.memory_space<vmem>>, vector<13x16xf32>
    tpu.vector_store %arg26[%c3_269, %c16_270], %382 {strides = array<i32>} : memref<32x160xf32, #tpu.memory_space<vmem>>, vector<13x16xf32>,
    %384 = vector.extract_strided_slice %352 {offsets = [16, 0], sizes = [13, 16], strides = [1, 1]} : vector<32x16xf32> to vector<13x16xf32>
    %c19_271 = arith.constant 19 : index
    %c16_272 = arith.constant 16 : index
    %385 = vector.load %arg26[%c19_271, %c16_272] : memref<32x160xf32, #tpu.memory_space<vmem>>, vector<13x16xf32>
    tpu.vector_store %arg26[%c19_271, %c16_272], %384 {strides = array<i32>} : memref<32x160xf32, #tpu.memory_space<vmem>>, vector<13x16xf32>,
    %386 = vector.extract_strided_slice %352 {offsets = [0, 0], sizes = [14, 16], strides = [1, 1]} : vector<32x16xf32> to vector<14x16xf32>
    %c2_273 = arith.constant 2 : index
    %c32_274 = arith.constant 32 : index
    %387 = vector.load %arg26[%c2_273, %c32_274] : memref<32x160xf32, #tpu.memory_space<vmem>>, vector<14x16xf32>
    tpu.vector_store %arg26[%c2_273, %c32_274], %386 {strides = array<i32>} : memref<32x160xf32, #tpu.memory_space<vmem>>, vector<14x16xf32>,
    %388 = vector.extract_strided_slice %352 {offsets = [16, 0], sizes = [14, 16], strides = [1, 1]} : vector<32x16xf32> to vector<14x16xf32>
    %c18_275 = arith.constant 18 : index
    %c32_276 = arith.constant 32 : index
    %389 = vector.load %arg26[%c18_275, %c32_276] : memref<32x160xf32, #tpu.memory_space<vmem>>, vector<14x16xf32>
    tpu.vector_store %arg26[%c18_275, %c32_276], %388 {strides = array<i32>} : memref<32x160xf32, #tpu.memory_space<vmem>>, vector<14x16xf32>,
    %390 = vector.extract_strided_slice %352 {offsets = [0, 0], sizes = [15, 16], strides = [1, 1]} : vector<32x16xf32> to vector<15x16xf32>
    %c1_277 = arith.constant 1 : index
    %c48_278 = arith.constant 48 : index
    %391 = vector.load %arg26[%c1_277, %c48_278] : memref<32x160xf32, #tpu.memory_space<vmem>>, vector<15x16xf32>
    tpu.vector_store %arg26[%c1_277, %c48_278], %390 {strides = array<i32>} : memref<32x160xf32, #tpu.memory_space<vmem>>, vector<15x16xf32>,
    %392 = vector.extract_strided_slice %352 {offsets = [16, 0], sizes = [15, 16], strides = [1, 1]} : vector<32x16xf32> to vector<15x16xf32>
    %c17_279 = arith.constant 17 : index
    %c48_280 = arith.constant 48 : index
    %393 = vector.load %arg26[%c17_279, %c48_280] : memref<32x160xf32, #tpu.memory_space<vmem>>, vector<15x16xf32>
    tpu.vector_store %arg26[%c17_279, %c48_280], %392 {strides = array<i32>} : memref<32x160xf32, #tpu.memory_space<vmem>>, vector<15x16xf32>,
    %394 = vector.extract_strided_slice %352 {offsets = [0, 0], sizes = [16, 16], strides = [1, 1]} : vector<32x16xf32> to vector<16x16xf32>
    %c0_281 = arith.constant 0 : index
    %c64_282 = arith.constant 64 : index
    %395 = vector.load %arg26[%c0_281, %c64_282] : memref<32x160xf32, #tpu.memory_space<vmem>>, vector<16x16xf32>
    tpu.vector_store %arg26[%c0_281, %c64_282], %394 {strides = array<i32>} : memref<32x160xf32, #tpu.memory_space<vmem>>, vector<16x16xf32>,
    %396 = vector.extract_strided_slice %352 {offsets = [16, 0], sizes = [16, 16], strides = [1, 1]} : vector<32x16xf32> to vector<16x16xf32>
    %c16_283 = arith.constant 16 : index
    %c64_284 = arith.constant 64 : index
    %397 = vector.load %arg26[%c16_283, %c64_284] : memref<32x160xf32, #tpu.memory_space<vmem>>, vector<16x16xf32>
    tpu.vector_store %arg26[%c16_283, %c64_284], %396 {strides = array<i32>} : memref<32x160xf32, #tpu.memory_space<vmem>>, vector<16x16xf32>,
    %398 = vector.extract_strided_slice %352 {offsets = [1, 0], sizes = [15, 16], strides = [1, 1]} : vector<32x16xf32> to vector<15x16xf32>
    %c0_285 = arith.constant 0 : index
    %c80 = arith.constant 80 : index
    %399 = vector.load %arg26[%c0_285, %c80] : memref<32x160xf32, #tpu.memory_space<vmem>>, vector<15x16xf32>
    tpu.vector_store %arg26[%c0_285, %c80], %398 {strides = array<i32>} : memref<32x160xf32, #tpu.memory_space<vmem>>, vector<15x16xf32>,
    %400 = vector.extract_strided_slice %352 {offsets = [17, 0], sizes = [15, 16], strides = [1, 1]} : vector<32x16xf32> to vector<15x16xf32>
    %c16_286 = arith.constant 16 : index
    %c80_287 = arith.constant 80 : index
    %401 = vector.load %arg26[%c16_286, %c80_287] : memref<32x160xf32, #tpu.memory_space<vmem>>, vector<15x16xf32>
    tpu.vector_store %arg26[%c16_286, %c80_287], %400 {strides = array<i32>} : memref<32x160xf32, #tpu.memory_space<vmem>>, vector<15x16xf32>,
    %402 = vector.extract_strided_slice %352 {offsets = [2, 0], sizes = [14, 16], strides = [1, 1]} : vector<32x16xf32> to vector<14x16xf32>
    %c0_288 = arith.constant 0 : index
    %c96 = arith.constant 96 : index
    %403 = vector.load %arg26[%c0_288, %c96] : memref<32x160xf32, #tpu.memory_space<vmem>>, vector<14x16xf32>
    tpu.vector_store %arg26[%c0_288, %c96], %402 {strides = array<i32>} : memref<32x160xf32, #tpu.memory_space<vmem>>, vector<14x16xf32>,
    %404 = vector.extract_strided_slice %352 {offsets = [18, 0], sizes = [14, 16], strides = [1, 1]} : vector<32x16xf32> to vector<14x16xf32>
    %c16_289 = arith.constant 16 : index
    %c96_290 = arith.constant 96 : index
    %405 = vector.load %arg26[%c16_289, %c96_290] : memref<32x160xf32, #tpu.memory_space<vmem>>, vector<14x16xf32>
    tpu.vector_store %arg26[%c16_289, %c96_290], %404 {strides = array<i32>} : memref<32x160xf32, #tpu.memory_space<vmem>>, vector<14x16xf32>,
    %406 = vector.extract_strided_slice %352 {offsets = [3, 0], sizes = [13, 16], strides = [1, 1]} : vector<32x16xf32> to vector<13x16xf32>
    %c0_291 = arith.constant 0 : index
    %c112 = arith.constant 112 : index
    %407 = vector.load %arg26[%c0_291, %c112] : memref<32x160xf32, #tpu.memory_space<vmem>>, vector<13x16xf32>
    tpu.vector_store %arg26[%c0_291, %c112], %406 {strides = array<i32>} : memref<32x160xf32, #tpu.memory_space<vmem>>, vector<13x16xf32>,
    %408 = vector.extract_strided_slice %352 {offsets = [19, 0], sizes = [13, 16], strides = [1, 1]} : vector<32x16xf32> to vector<13x16xf32>
    %c16_292 = arith.constant 16 : index
    %c112_293 = arith.constant 112 : index
    %409 = vector.load %arg26[%c16_292, %c112_293] : memref<32x160xf32, #tpu.memory_space<vmem>>, vector<13x16xf32>
    tpu.vector_store %arg26[%c16_292, %c112_293], %408 {strides = array<i32>} : memref<32x160xf32, #tpu.memory_space<vmem>>, vector<13x16xf32>,
    %410 = vector.extract_strided_slice %352 {offsets = [4, 0], sizes = [12, 16], strides = [1, 1]} : vector<32x16xf32> to vector<12x16xf32>
    %c0_294 = arith.constant 0 : index
    %c128 = arith.constant 128 : index
    %411 = vector.load %arg26[%c0_294, %c128] : memref<32x160xf32, #tpu.memory_space<vmem>>, vector<12x16xf32>
    tpu.vector_store %arg26[%c0_294, %c128], %410 {strides = array<i32>} : memref<32x160xf32, #tpu.memory_space<vmem>>, vector<12x16xf32>,
    %412 = vector.extract_strided_slice %352 {offsets = [20, 0], sizes = [12, 16], strides = [1, 1]} : vector<32x16xf32> to vector<12x16xf32>
    %c16_295 = arith.constant 16 : index
    %c128_296 = arith.constant 128 : index
    %413 = vector.load %arg26[%c16_295, %c128_296] : memref<32x160xf32, #tpu.memory_space<vmem>>, vector<12x16xf32>
    tpu.vector_store %arg26[%c16_295, %c128_296], %412 {strides = array<i32>} : memref<32x160xf32, #tpu.memory_space<vmem>>, vector<12x16xf32>,
    %c0_297 = arith.constant 0 : index
    %c0_298 = arith.constant 0 : index
    %414 = vector.load %arg26[%c0_297, %c0_298] : memref<32x160xf32, #tpu.memory_space<vmem>>, vector<32x144xf32>
    %c0_299 = arith.constant 0 : index
    %c0_300 = arith.constant 0 : index
    %415 = vector.load %arg17[%c0_299, %c0_300] : memref<144x32xf32, #tpu.memory_space<vmem>>, vector<144x32xf32>
    %cst_301 = arith.constant dense<0.000000e+00> : vector<32x32xf32>
    %416 = tpu.matmul %414, %415, %cst_301 {dimension_numbers = #tpu.dot_dimension_numbers<[1], [0], [0], [1], [0, 0, 1, 1], [], []>} : vector<32x144xf32>, vector<144x32xf32>, vector<32x32xf32> -> vector<32x32xf32>
    %cst_302 = arith.constant dense<0.000000e+00> : vector<32xf32>
    %417 = vector.multi_reduction <add>, %416, %cst_302 [0] : vector<32x32xf32> to vector<32xf32>
    %418 = vector.shape_cast %417 : vector<32xf32> to vector<1x32xf32>
    %cst_303 = arith.constant 3.200000e+01 : f32
    %419 = vector.broadcast %cst_303 : f32 to vector<1x32xf32>
    %420 = arith.divf %418, %419 : vector<1x32xf32>
    %421 = vector.broadcast %420 : vector<1x32xf32> to vector<32x32xf32>
    %422 = arith.subf %416, %421 : vector<32x32xf32>
    %423 = arith.mulf %422, %422 : vector<32x32xf32>
    %cst_304 = arith.constant dense<0.000000e+00> : vector<32xf32>
    %424 = vector.multi_reduction <add>, %423, %cst_304 [0] : vector<32x32xf32> to vector<32xf32>
    %425 = vector.shape_cast %424 : vector<32xf32> to vector<1x32xf32>
    %cst_305 = arith.constant 3.200000e+01 : f32
    %426 = vector.broadcast %cst_305 : f32 to vector<1x32xf32>
    %427 = arith.divf %425, %426 : vector<1x32xf32>
    %c0_306 = arith.constant 0 : index
    %c0_307 = arith.constant 0 : index
    %428 = vector.load %arg18[%c0_306, %c0_307] : memref<2x32xf32, #tpu.memory_space<vmem>>, vector<1x32xf32>
    %cst_308 = arith.constant 9.99999974E-6 : f32
    %429 = vector.broadcast %cst_308 : f32 to vector<1x32xf32>
    %430 = arith.addf %427, %429 : vector<1x32xf32>
    %431 = math.rsqrt %430 : vector<1x32xf32>
    %432 = arith.mulf %428, %431 : vector<1x32xf32>
    %433 = vector.broadcast %432 : vector<1x32xf32> to vector<32x32xf32>
    %434 = arith.mulf %422, %433 : vector<32x32xf32>
    %c1_309 = arith.constant 1 : index
    %c0_310 = arith.constant 0 : index
    %435 = vector.load %arg18[%c1_309, %c0_310] : memref<2x32xf32, #tpu.memory_space<vmem>>, vector<1x32xf32>
    %436 = vector.broadcast %435 : vector<1x32xf32> to vector<32x32xf32>
    %437 = arith.addf %434, %436 : vector<32x32xf32>
    %cst_311 = arith.constant 0.000000e+00 : f32
    %438 = vector.broadcast %cst_311 : f32 to vector<32x32xf32>
    %439 = arith.maximumf %437, %438 : vector<32x32xf32>
    %cst_312 = arith.constant 0.000000e+00 : f32
    %440 = vector.broadcast %cst_312 : f32 to vector<32x160xf32>
    %c0_313 = arith.constant 0 : index
    %c0_314 = arith.constant 0 : index
    %441 = vector.load %arg26[%c0_313, %c0_314] : memref<32x160xf32, #tpu.memory_space<vmem>>, vector<32x160xf32>
    tpu.vector_store %arg26[%c0_313, %c0_314], %440 {strides = array<i32>} : memref<32x160xf32, #tpu.memory_space<vmem>>, vector<32x160xf32>,
    %442 = vector.extract_strided_slice %439 {offsets = [0, 0], sizes = [14, 32], strides = [1, 1]} : vector<32x32xf32> to vector<14x32xf32>
    %c2_315 = arith.constant 2 : index
    %c0_316 = arith.constant 0 : index
    %443 = vector.load %arg26[%c2_315, %c0_316] : memref<32x160xf32, #tpu.memory_space<vmem>>, vector<14x32xf32>
    tpu.vector_store %arg26[%c2_315, %c0_316], %442 {strides = array<i32>} : memref<32x160xf32, #tpu.memory_space<vmem>>, vector<14x32xf32>,
    %444 = vector.extract_strided_slice %439 {offsets = [16, 0], sizes = [14, 32], strides = [1, 1]} : vector<32x32xf32> to vector<14x32xf32>
    %c18_317 = arith.constant 18 : index
    %c0_318 = arith.constant 0 : index
    %445 = vector.load %arg26[%c18_317, %c0_318] : memref<32x160xf32, #tpu.memory_space<vmem>>, vector<14x32xf32>
    tpu.vector_store %arg26[%c18_317, %c0_318], %444 {strides = array<i32>} : memref<32x160xf32, #tpu.memory_space<vmem>>, vector<14x32xf32>,
    %446 = vector.extract_strided_slice %439 {offsets = [0, 0], sizes = [15, 32], strides = [1, 1]} : vector<32x32xf32> to vector<15x32xf32>
    %c1_319 = arith.constant 1 : index
    %c32_320 = arith.constant 32 : index
    %447 = vector.load %arg26[%c1_319, %c32_320] : memref<32x160xf32, #tpu.memory_space<vmem>>, vector<15x32xf32>
    tpu.vector_store %arg26[%c1_319, %c32_320], %446 {strides = array<i32>} : memref<32x160xf32, #tpu.memory_space<vmem>>, vector<15x32xf32>,
    %448 = vector.extract_strided_slice %439 {offsets = [16, 0], sizes = [15, 32], strides = [1, 1]} : vector<32x32xf32> to vector<15x32xf32>
    %c17_321 = arith.constant 17 : index
    %c32_322 = arith.constant 32 : index
    %449 = vector.load %arg26[%c17_321, %c32_322] : memref<32x160xf32, #tpu.memory_space<vmem>>, vector<15x32xf32>
    tpu.vector_store %arg26[%c17_321, %c32_322], %448 {strides = array<i32>} : memref<32x160xf32, #tpu.memory_space<vmem>>, vector<15x32xf32>,
    %450 = vector.extract_strided_slice %439 {offsets = [0, 0], sizes = [16, 32], strides = [1, 1]} : vector<32x32xf32> to vector<16x32xf32>
    %c0_323 = arith.constant 0 : index
    %c64_324 = arith.constant 64 : index
    %451 = vector.load %arg26[%c0_323, %c64_324] : memref<32x160xf32, #tpu.memory_space<vmem>>, vector<16x32xf32>
    tpu.vector_store %arg26[%c0_323, %c64_324], %450 {strides = array<i32>} : memref<32x160xf32, #tpu.memory_space<vmem>>, vector<16x32xf32>,
    %452 = vector.extract_strided_slice %439 {offsets = [16, 0], sizes = [16, 32], strides = [1, 1]} : vector<32x32xf32> to vector<16x32xf32>
    %c16_325 = arith.constant 16 : index
    %c64_326 = arith.constant 64 : index
    %453 = vector.load %arg26[%c16_325, %c64_326] : memref<32x160xf32, #tpu.memory_space<vmem>>, vector<16x32xf32>
    tpu.vector_store %arg26[%c16_325, %c64_326], %452 {strides = array<i32>} : memref<32x160xf32, #tpu.memory_space<vmem>>, vector<16x32xf32>,
    %454 = vector.extract_strided_slice %439 {offsets = [1, 0], sizes = [15, 32], strides = [1, 1]} : vector<32x32xf32> to vector<15x32xf32>
    %c0_327 = arith.constant 0 : index
    %c96_328 = arith.constant 96 : index
    %455 = vector.load %arg26[%c0_327, %c96_328] : memref<32x160xf32, #tpu.memory_space<vmem>>, vector<15x32xf32>
    tpu.vector_store %arg26[%c0_327, %c96_328], %454 {strides = array<i32>} : memref<32x160xf32, #tpu.memory_space<vmem>>, vector<15x32xf32>,
    %456 = vector.extract_strided_slice %439 {offsets = [17, 0], sizes = [15, 32], strides = [1, 1]} : vector<32x32xf32> to vector<15x32xf32>
    %c16_329 = arith.constant 16 : index
    %c96_330 = arith.constant 96 : index
    %457 = vector.load %arg26[%c16_329, %c96_330] : memref<32x160xf32, #tpu.memory_space<vmem>>, vector<15x32xf32>
    tpu.vector_store %arg26[%c16_329, %c96_330], %456 {strides = array<i32>} : memref<32x160xf32, #tpu.memory_space<vmem>>, vector<15x32xf32>,
    %458 = vector.extract_strided_slice %439 {offsets = [2, 0], sizes = [14, 32], strides = [1, 1]} : vector<32x32xf32> to vector<14x32xf32>
    %c0_331 = arith.constant 0 : index
    %c128_332 = arith.constant 128 : index
    %459 = vector.load %arg26[%c0_331, %c128_332] : memref<32x160xf32, #tpu.memory_space<vmem>>, vector<14x32xf32>
    tpu.vector_store %arg26[%c0_331, %c128_332], %458 {strides = array<i32>} : memref<32x160xf32, #tpu.memory_space<vmem>>, vector<14x32xf32>,
    %460 = vector.extract_strided_slice %439 {offsets = [18, 0], sizes = [14, 32], strides = [1, 1]} : vector<32x32xf32> to vector<14x32xf32>
    %c16_333 = arith.constant 16 : index
    %c128_334 = arith.constant 128 : index
    %461 = vector.load %arg26[%c16_333, %c128_334] : memref<32x160xf32, #tpu.memory_space<vmem>>, vector<14x32xf32>
    tpu.vector_store %arg26[%c16_333, %c128_334], %460 {strides = array<i32>} : memref<32x160xf32, #tpu.memory_space<vmem>>, vector<14x32xf32>,
    %c0_335 = arith.constant 0 : index
    %c0_336 = arith.constant 0 : index
    %462 = vector.load %arg26[%c0_335, %c0_336] : memref<32x160xf32, #tpu.memory_space<vmem>>, vector<32x160xf32>
    %c0_337 = arith.constant 0 : index
    %c0_338 = arith.constant 0 : index
    %463 = vector.load %arg19[%c0_337, %c0_338] : memref<160x32xf32, #tpu.memory_space<vmem>>, vector<160x32xf32>
    %cst_339 = arith.constant dense<0.000000e+00> : vector<32x32xf32>
    %464 = tpu.matmul %462, %463, %cst_339 {dimension_numbers = #tpu.dot_dimension_numbers<[1], [0], [0], [1], [0, 0, 1, 1], [], []>} : vector<32x160xf32>, vector<160x32xf32>, vector<32x32xf32> -> vector<32x32xf32>
    %cst_340 = arith.constant dense<0.000000e+00> : vector<32xf32>
    %465 = vector.multi_reduction <add>, %464, %cst_340 [0] : vector<32x32xf32> to vector<32xf32>
    %466 = vector.shape_cast %465 : vector<32xf32> to vector<1x32xf32>
    %cst_341 = arith.constant 3.200000e+01 : f32
    %467 = vector.broadcast %cst_341 : f32 to vector<1x32xf32>
    %468 = arith.divf %466, %467 : vector<1x32xf32>
    %469 = vector.broadcast %468 : vector<1x32xf32> to vector<32x32xf32>
    %470 = arith.subf %464, %469 : vector<32x32xf32>
    %471 = arith.mulf %470, %470 : vector<32x32xf32>
    %cst_342 = arith.constant dense<0.000000e+00> : vector<32xf32>
    %472 = vector.multi_reduction <add>, %471, %cst_342 [0] : vector<32x32xf32> to vector<32xf32>
    %473 = vector.shape_cast %472 : vector<32xf32> to vector<1x32xf32>
    %cst_343 = arith.constant 3.200000e+01 : f32
    %474 = vector.broadcast %cst_343 : f32 to vector<1x32xf32>
    %475 = arith.divf %473, %474 : vector<1x32xf32>
    %c0_344 = arith.constant 0 : index
    %c0_345 = arith.constant 0 : index
    %476 = vector.load %arg20[%c0_344, %c0_345] : memref<2x32xf32, #tpu.memory_space<vmem>>, vector<1x32xf32>
    %cst_346 = arith.constant 9.99999974E-6 : f32
    %477 = vector.broadcast %cst_346 : f32 to vector<1x32xf32>
    %478 = arith.addf %475, %477 : vector<1x32xf32>
    %479 = math.rsqrt %478 : vector<1x32xf32>
    %480 = arith.mulf %476, %479 : vector<1x32xf32>
    %481 = vector.broadcast %480 : vector<1x32xf32> to vector<32x32xf32>
    %482 = arith.mulf %470, %481 : vector<32x32xf32>
    %c1_347 = arith.constant 1 : index
    %c0_348 = arith.constant 0 : index
    %483 = vector.load %arg20[%c1_347, %c0_348] : memref<2x32xf32, #tpu.memory_space<vmem>>, vector<1x32xf32>
    %484 = vector.broadcast %483 : vector<1x32xf32> to vector<32x32xf32>
    %485 = arith.addf %482, %484 : vector<32x32xf32>
    %cst_349 = arith.constant 0.000000e+00 : f32
    %486 = vector.broadcast %cst_349 : f32 to vector<32x32xf32>
    %487 = arith.maximumf %485, %486 : vector<32x32xf32>
    %cst_350 = arith.constant 0.000000e+00 : f32
    %488 = vector.broadcast %cst_350 : f32 to vector<32x160xf32>
    %c0_351 = arith.constant 0 : index
    %c0_352 = arith.constant 0 : index
    %489 = vector.load %arg26[%c0_351, %c0_352] : memref<32x160xf32, #tpu.memory_space<vmem>>, vector<32x160xf32>
    tpu.vector_store %arg26[%c0_351, %c0_352], %488 {strides = array<i32>} : memref<32x160xf32, #tpu.memory_space<vmem>>, vector<32x160xf32>,
    %490 = vector.extract_strided_slice %487 {offsets = [0, 0], sizes = [15, 32], strides = [1, 1]} : vector<32x32xf32> to vector<15x32xf32>
    %c1_353 = arith.constant 1 : index
    %c0_354 = arith.constant 0 : index
    %491 = vector.load %arg26[%c1_353, %c0_354] : memref<32x160xf32, #tpu.memory_space<vmem>>, vector<15x32xf32>
    tpu.vector_store %arg26[%c1_353, %c0_354], %490 {strides = array<i32>} : memref<32x160xf32, #tpu.memory_space<vmem>>, vector<15x32xf32>,
    %492 = vector.extract_strided_slice %487 {offsets = [16, 0], sizes = [15, 32], strides = [1, 1]} : vector<32x32xf32> to vector<15x32xf32>
    %c17_355 = arith.constant 17 : index
    %c0_356 = arith.constant 0 : index
    %493 = vector.load %arg26[%c17_355, %c0_356] : memref<32x160xf32, #tpu.memory_space<vmem>>, vector<15x32xf32>
    tpu.vector_store %arg26[%c17_355, %c0_356], %492 {strides = array<i32>} : memref<32x160xf32, #tpu.memory_space<vmem>>, vector<15x32xf32>,
    %494 = vector.extract_strided_slice %487 {offsets = [0, 0], sizes = [16, 32], strides = [1, 1]} : vector<32x32xf32> to vector<16x32xf32>
    %c0_357 = arith.constant 0 : index
    %c32_358 = arith.constant 32 : index
    %495 = vector.load %arg26[%c0_357, %c32_358] : memref<32x160xf32, #tpu.memory_space<vmem>>, vector<16x32xf32>
    tpu.vector_store %arg26[%c0_357, %c32_358], %494 {strides = array<i32>} : memref<32x160xf32, #tpu.memory_space<vmem>>, vector<16x32xf32>,
    %496 = vector.extract_strided_slice %487 {offsets = [16, 0], sizes = [16, 32], strides = [1, 1]} : vector<32x32xf32> to vector<16x32xf32>
    %c16_359 = arith.constant 16 : index
    %c32_360 = arith.constant 32 : index
    %497 = vector.load %arg26[%c16_359, %c32_360] : memref<32x160xf32, #tpu.memory_space<vmem>>, vector<16x32xf32>
    tpu.vector_store %arg26[%c16_359, %c32_360], %496 {strides = array<i32>} : memref<32x160xf32, #tpu.memory_space<vmem>>, vector<16x32xf32>,
    %498 = vector.extract_strided_slice %487 {offsets = [1, 0], sizes = [15, 32], strides = [1, 1]} : vector<32x32xf32> to vector<15x32xf32>
    %c0_361 = arith.constant 0 : index
    %c64_362 = arith.constant 64 : index
    %499 = vector.load %arg26[%c0_361, %c64_362] : memref<32x160xf32, #tpu.memory_space<vmem>>, vector<15x32xf32>
    tpu.vector_store %arg26[%c0_361, %c64_362], %498 {strides = array<i32>} : memref<32x160xf32, #tpu.memory_space<vmem>>, vector<15x32xf32>,
    %500 = vector.extract_strided_slice %487 {offsets = [17, 0], sizes = [15, 32], strides = [1, 1]} : vector<32x32xf32> to vector<15x32xf32>
    %c16_363 = arith.constant 16 : index
    %c64_364 = arith.constant 64 : index
    %501 = vector.load %arg26[%c16_363, %c64_364] : memref<32x160xf32, #tpu.memory_space<vmem>>, vector<15x32xf32>
    tpu.vector_store %arg26[%c16_363, %c64_364], %500 {strides = array<i32>} : memref<32x160xf32, #tpu.memory_space<vmem>>, vector<15x32xf32>,
    %c0_365 = arith.constant 0 : index
    %c0_366 = arith.constant 0 : index
    %502 = vector.load %arg26[%c0_365, %c0_366] : memref<32x160xf32, #tpu.memory_space<vmem>>, vector<32x96xf32>
    %c0_367 = arith.constant 0 : index
    %c0_368 = arith.constant 0 : index
    %503 = vector.load %arg21[%c0_367, %c0_368] : memref<96x32xf32, #tpu.memory_space<vmem>>, vector<96x32xf32>
    %cst_369 = arith.constant dense<0.000000e+00> : vector<32x32xf32>
    %504 = tpu.matmul %502, %503, %cst_369 {dimension_numbers = #tpu.dot_dimension_numbers<[1], [0], [0], [1], [0, 0, 1, 1], [], []>} : vector<32x96xf32>, vector<96x32xf32>, vector<32x32xf32> -> vector<32x32xf32>
    %cst_370 = arith.constant dense<0.000000e+00> : vector<32xf32>
    %505 = vector.multi_reduction <add>, %504, %cst_370 [0] : vector<32x32xf32> to vector<32xf32>
    %506 = vector.shape_cast %505 : vector<32xf32> to vector<1x32xf32>
    %cst_371 = arith.constant 3.200000e+01 : f32
    %507 = vector.broadcast %cst_371 : f32 to vector<1x32xf32>
    %508 = arith.divf %506, %507 : vector<1x32xf32>
    %509 = vector.broadcast %508 : vector<1x32xf32> to vector<32x32xf32>
    %510 = arith.subf %504, %509 : vector<32x32xf32>
    %511 = arith.mulf %510, %510 : vector<32x32xf32>
    %cst_372 = arith.constant dense<0.000000e+00> : vector<32xf32>
    %512 = vector.multi_reduction <add>, %511, %cst_372 [0] : vector<32x32xf32> to vector<32xf32>
    %513 = vector.shape_cast %512 : vector<32xf32> to vector<1x32xf32>
    %cst_373 = arith.constant 3.200000e+01 : f32
    %514 = vector.broadcast %cst_373 : f32 to vector<1x32xf32>
    %515 = arith.divf %513, %514 : vector<1x32xf32>
    %c0_374 = arith.constant 0 : index
    %c0_375 = arith.constant 0 : index
    %516 = vector.load %arg22[%c0_374, %c0_375] : memref<2x32xf32, #tpu.memory_space<vmem>>, vector<1x32xf32>
    %cst_376 = arith.constant 9.99999974E-6 : f32
    %517 = vector.broadcast %cst_376 : f32 to vector<1x32xf32>
    %518 = arith.addf %515, %517 : vector<1x32xf32>
    %519 = math.rsqrt %518 : vector<1x32xf32>
    %520 = arith.mulf %516, %519 : vector<1x32xf32>
    %521 = vector.broadcast %520 : vector<1x32xf32> to vector<32x32xf32>
    %522 = arith.mulf %510, %521 : vector<32x32xf32>
    %c1_377 = arith.constant 1 : index
    %c0_378 = arith.constant 0 : index
    %523 = vector.load %arg22[%c1_377, %c0_378] : memref<2x32xf32, #tpu.memory_space<vmem>>, vector<1x32xf32>
    %524 = vector.broadcast %523 : vector<1x32xf32> to vector<32x32xf32>
    %525 = arith.addf %522, %524 : vector<32x32xf32>
    %526 = arith.addf %525, %375 : vector<32x32xf32>
    %cst_379 = arith.constant 0.000000e+00 : f32
    %527 = vector.broadcast %cst_379 : f32 to vector<32x32xf32>
    %528 = arith.maximumf %526, %527 : vector<32x32xf32>
    %c0_380 = arith.constant 0 : index
    %c0_381 = arith.constant 0 : index
    %529 = vector.load %arg25[%c0_380, %c0_381] : memref<32x32xf32, #tpu.memory_space<vmem>>, vector<32x32xf32>
    tpu.vector_store %arg25[%c0_380, %c0_381], %528 {strides = array<i32>} : memref<32x32xf32, #tpu.memory_space<vmem>>, vector<32x32xf32>,
    return
  }
}

</mosaic_0001>

<bundles_post_ra>
// kernel: resnet_forward.1
= control target key start
LH: loop header
LB: loop body
LE: loop exit
PB: predicated region body
PF: predicated region fallthrough
CT: control target
= control target key end

     0   :  { %s5573_s0 = inlined_call_operand.vmem [shape: f32[32,4], index: 0, kind: input, shape index: {}]   ;;  %s5574_s1 = inlined_call_operand.vmem [shape: f32[36,8], index: 1, kind: input, shape index: {}]   ;;  %s5575_s2 = inlined_call_operand.vmem [shape: f32[2,8], index: 2, kind: input, shape index: {}]   ;;  %s5576_s3 = inlined_call_operand.hbm [shape: f32[40,8], index: 3, kind: input, shape index: {}]   ;;  %s5577_s4 = inlined_call_operand.vmem [shape: f32[2,8], index: 4, kind: input, shape index: {}]   ;;  %s5578_s5 = inlined_call_operand.hbm [shape: f32[24,8], index: 5, kind: input, shape index: {}]   ;;  %s5579_s6 = inlined_call_operand.vmem [shape: f32[2,8], index: 6, kind: input, shape index: {}]   ;;  %s5580_s7 = inlined_call_operand.vmem [shape: f32[4,8], index: 7, kind: input, shape index: {}]   ;;  %s5581_s8 = inlined_call_operand.vmem [shape: f32[2,8], index: 8, kind: input, shape index: {}]   ;;  %s5582_s9 = inlined_call_operand.hbm [shape: f32[72,16], index: 9, kind: input, shape index: {}]   ;;  %s5583_s10 = inlined_call_operand.vmem [shape: f32[2,16], index: 10, kind: input, shape index: {}]   ;;  %s5584_s11 = inlined_call_operand.hbm [shape: f32[80,16], index: 11, kind: input, shape index: {}]   ;;  %s5585_s12 = inlined_call_operand.vmem [shape: f32[2,16], index: 12, kind: input, shape index: {}]   ;;  %s5586_s13 = inlined_call_operand.hbm [shape: f32[48,16], index: 13, kind: input, shape index: {}]   ;;  %s5587_s14 = inlined_call_operand.vmem [shape: f32[2,16], index: 14, kind: input, shape index: {}]   ;;  %s5588_s15 = inlined_call_operand.vmem [shape: f32[8,16], index: 15, kind: input, shape index: {}]   ;;  %s5589_s16 = inlined_call_operand.vmem [shape: f32[2,16], index: 16, kind: input, shape index: {}]   ;;  %s5590_s17 = inlined_call_operand.vmem [shape: f32[144,32], index: 17, kind: input, shape index: {}]   ;;  %s5591_s18 = inlined_call_operand.vmem [shape: f32[2,32], index: 18, kind: input, shape index: {}]   ;;  %s5592_s19 = inlined_call_operand.vmem [shape: f32[160,32], index: 19, kind: input, shape index: {}]   ;;  %s5593_s20 = inlined_call_operand.vmem [shape: f32[2,32], index: 20, kind: input, shape index: {}]   ;;  %s5594_s21 = inlined_call_operand.vmem [shape: f32[96,32], index: 21, kind: input, shape index: {}]   ;;  %s5595_s22 = inlined_call_operand.vmem [shape: f32[2,32], index: 22, kind: input, shape index: {}]   ;;  %s5596_s23 = inlined_call_operand.hbm [shape: f32[16,32], index: 23, kind: input, shape index: {}]   ;;  %s5597_s24 = inlined_call_operand.vmem [shape: f32[2,32], index: 24, kind: input, shape index: {}]   ;;  %s5598_s25 = inlined_call_operand.hbm [shape: f32[32,32], index: 25, kind: output, shape index: {}]  }
   0x1   :  { %5613 = sst [smem:[#allocation20_spill]] %s5573_s0 }
   0x2   :  { %5614 = sst [smem:[#allocation21_spill]] %s5574_s1 }
   0x3   :  { %5615 = sst [smem:[#allocation22_spill]] %s5575_s2 }
   0x4   :  { %5616 = sst [smem:[#allocation23_spill]] %s5576_s3 }
   0x5   :  { %5617 = sst [smem:[#allocation24_spill]] %s5577_s4 }
   0x6   :  { %5618 = sst [smem:[#allocation25_spill]] %s5578_s5 }
   0x7   :  { %5619 = sst [smem:[#allocation26_spill]] %s5579_s6 }
   0x8   :  { %5620 = sst [smem:[#allocation27_spill]] %s5580_s7 }
   0x9   :  { %5621 = sst [smem:[#allocation28_spill]] %s5581_s8 }
   0xa   :  { %5622 = sst [smem:[#allocation29_spill]] %s5582_s9 }
   0xb   :  { %5623 = sst [smem:[#allocation30_spill]] %s5595_s22 }
   0xc   :  { %5624 = sst [smem:[#allocation31_spill]] %s5598_s25 }
   0xd   :  { %30 = vsyncpa [#allocation4], 0 }
   0xe   :  { %31 = vsyncpa [#allocation7], 0 }
   0xf   :  { %32 = vsyncpa [#allocation10], 0 }
  0x10   :  { %33 = vsyncpa [#allocation13], 0 }
  0x11   :  { %34 = vsyncpa [#allocation5], 0  ;;  %s4068_s29 = smov [#allocation6]   ;;  %s4069_s6 = smov [#allocation9]  }
  0x12   :  { %s60_s2 = sshll.u32 %s4068_s29, 4  ;;  %s92_s30 = sshll.u32 %s4069_s6, 4  ;;  %s61_s2 = int_to_ptr.vmem [resolvable:$true] %s60_s2  ;;  %s4223_s30 = int_to_ptr.vmem [resolvable:$true] %s92_s30 }
  0x13   :  { %s5625_s26 = sld [smem:[#allocation25_spill]] }
  0x19   :  { %s3904_s1 = scalar_lea.hbm %s5625_s26, 384 }
  0x1a   :  { %p3905_p0 = scmp.ne.s32.totalorder %s5625_s26, %s3904_s1  ;;  %p3908_p1 = scmp.lt.u32.totalorder %s3904_s1, %s5625_s26 }
  0x1c   :  { %p3910_p2 = pnand %p3908_p1, %p3905_p0 }
  0x1e   :  { %3913 = shalt.err (!%p3910_p2)
}
  0x1f   :  { %s3914_s9 = scalar_lea.vmem %s61_s2, 384  ;;  %p3919_p4 = scmp.lt.s32.totalorder %s61_s2, %s61_s2 }
  0x20   :  { %p3915_p3 = scmp.ne.s32.totalorder %s61_s2, %s3914_s9  ;;  %p3920_p5 = scmp.lt.s32.totalorder %s3914_s9, %s3914_s9 }
  0x22   :  { %p3921_p6 = por %p3920_p5, %p3919_p4 }
  0x24   :  { %p3922_p7 = pnand %p3921_p6, %p3915_p3 }
  0x26   :  { %3925 = shalt.err (!%p3922_p7)
}
  0x27   :  { %s4070_s5 = smov 128   ;;  %s4071_s0 = smov 8  }
  0x28   :  { %66 = dma.hbm_to_vmem [thread:$0]  %s5625_s26, 384, %s61_s2, [#allocation7], %s4070_s5, %s4070_s5, %s4071_s0  }
  0x29   :  { %s3926_s1 = scalar_lea.hbm %s5584_s11, 1280 }
  0x2a   :  { %p3927_p8 = scmp.ne.s32.totalorder %s5584_s11, %s3926_s1  ;;  %p3930_p9 = scmp.lt.u32.totalorder %s3926_s1, %s5584_s11 }
  0x2c   :  { %p3932_p10 = pnand %p3930_p9, %p3927_p8 }
  0x2e   :  { %3935 = shalt.err (!%p3932_p10)
}
  0x2f   :  { %s3936_s9 = scalar_lea.vmem %s4223_s30, 1280  ;;  %p3941_p12 = scmp.lt.s32.totalorder %s4223_s30, %s4223_s30 }
  0x30   :  { %p3937_p11 = scmp.ne.s32.totalorder %s4223_s30, %s3936_s9  ;;  %p3942_p13 = scmp.lt.s32.totalorder %s3936_s9, %s3936_s9 }
  0x32   :  { %p3943_p0 = por %p3942_p13, %p3941_p12 }
  0x34   :  { %p3944_p1 = pnand %p3943_p0, %p3937_p11 }
  0x36   :  { %3947 = shalt.err (!%p3944_p1)
}
  0x37   :  { %98 = dma.hbm_to_vmem [thread:$0]  %s5584_s11, 1280, %s4223_s30, [#allocation10], %s4070_s5, %s4070_s5, %s4071_s0  }
  0x38   :  { %s4072_s29 = smov [#allocation3]   ;;  %s4073_s7 = smov [#allocation8]  }
  0x39   :  { %s46_s6 = sshll.u32 %s4072_s29, 4  ;;  %s78_s3 = sshll.u32 %s4073_s7, 4  ;;  %s47_s6 = int_to_ptr.vmem [resolvable:$true] %s46_s6  ;;  %s4260_s3 = int_to_ptr.vmem [resolvable:$true] %s78_s3 }
  0x3a   :  { %s5626_s27 = sld [smem:[#allocation23_spill]] }
  0x40   :  { %s3948_s4 = scalar_lea.hbm %s5626_s27, 640 }
  0x41   :  { %p3949_p2 = scmp.ne.s32.totalorder %s5626_s27, %s3948_s4  ;;  %p3952_p3 = scmp.lt.u32.totalorder %s3948_s4, %s5626_s27 }
  0x43   :  { %p3954_p4 = pnand %p3952_p3, %p3949_p2 }
  0x45   :  { %3957 = shalt.err (!%p3954_p4)
}
  0x46   :  { %s3958_s11 = scalar_lea.vmem %s47_s6, 640  ;;  %p3963_p6 = scmp.lt.s32.totalorder %s47_s6, %s47_s6 }
  0x47   :  { %p3959_p5 = scmp.ne.s32.totalorder %s47_s6, %s3958_s11  ;;  %p3964_p7 = scmp.lt.s32.totalorder %s3958_s11, %s3958_s11 }
  0x49   :  { %p3965_p8 = por %p3964_p7, %p3963_p6 }
  0x4b   :  { %p3966_p9 = pnand %p3965_p8, %p3959_p5 }
  0x4d   :  { %3969 = shalt.err (!%p3966_p9)
}
  0x4e   :  { %52 = dma.hbm_to_vmem [thread:$0]  %s5626_s27, 640, %s47_s6, [#allocation4], %s4070_s5, %s4070_s5, %s4071_s0  }
  0x4f   :  { %s5627_s22 = sld [smem:[#allocation29_spill]] }
  0x55   :  { %s3970_s25 = scalar_lea.hbm %s5627_s22, 1152 }
  0x56   :  { %p3971_p10 = scmp.ne.s32.totalorder %s5627_s22, %s3970_s25  ;;  %p3974_p11 = scmp.lt.u32.totalorder %s3970_s25, %s5627_s22 }
  0x58   :  { %p3976_p12 = pnand %p3974_p11, %p3971_p10 }
  0x5a   :  { %3979 = shalt.err (!%p3976_p12)
}
  0x5b   :  { %s3980_s28 = scalar_lea.vmem %s4260_s3, 1152  ;;  %p3985_p0 = scmp.lt.s32.totalorder %s4260_s3, %s4260_s3 }
  0x5c   :  { %p3981_p13 = scmp.ne.s32.totalorder %s4260_s3, %s3980_s28  ;;  %p3986_p1 = scmp.lt.s32.totalorder %s3980_s28, %s3980_s28 }
  0x5e   :  { %p3987_p2 = por %p3986_p1, %p3985_p0 }
  0x60   :  { %p3988_p3 = pnand %p3987_p2, %p3981_p13 }
  0x62   :  { %3991 = shalt.err (!%p3988_p3)
}
  0x63   :  { %84 = dma.hbm_to_vmem [thread:$0]  %s5627_s22, 1152, %s4260_s3, [#allocation7], %s4070_s5, %s4070_s5, %s4071_s0  }
  0x64   :  { %s4074_s9 = smov [#allocation11]   ;;  %s4075_s30 = smov [#allocation12]  }
  0x65   :  { %s106_s11 = sshll.u32 %s4074_s9, 4  ;;  %s136_s2 = sshll.u32 %s4075_s30, 4  ;;  %s107_s11 = int_to_ptr.vmem [resolvable:$true] %s106_s11  ;;  %s4297_s2 = int_to_ptr.vmem [resolvable:$true] %s136_s2 }
  0x66   :  { %s3992_s25 = scalar_lea.hbm %s5586_s13, 768 }
  0x67   :  { %p3993_p4 = scmp.ne.s32.totalorder %s5586_s13, %s3992_s25  ;;  %p3996_p5 = scmp.lt.u32.totalorder %s3992_s25, %s5586_s13 }
  0x69   :  { %p3998_p6 = pnand %p3996_p5, %p3993_p4 }
  0x6b   :  { %4001 = shalt.err (!%p3998_p6)
}
  0x6c   :  { %s4002_s3 = scalar_lea.vmem %s107_s11, 768  ;;  %p4007_p8 = scmp.lt.s32.totalorder %s107_s11, %s107_s11 }
  0x6d   :  { %p4003_p7 = scmp.ne.s32.totalorder %s107_s11, %s4002_s3  ;;  %p4008_p9 = scmp.lt.s32.totalorder %s4002_s3, %s4002_s3 }
  0x6f   :  { %p4009_p10 = por %p4008_p9, %p4007_p8 }
  0x71   :  { %p4010_p11 = pnand %p4009_p10, %p4003_p7 }
  0x73   :  { %4013 = shalt.err (!%p4010_p11)
}
  0x74   :  { %112 = dma.hbm_to_vmem [thread:$0]  %s5586_s13, 768, %s107_s11, [#allocation10], %s4070_s5, %s4070_s5, %s4071_s0  }
  0x75   :  { %s4014_s9 = scalar_lea.hbm %s5596_s23, 256 }
  0x76   :  { %p4015_p12 = scmp.ne.s32.totalorder %s5596_s23, %s4014_s9  ;;  %p4018_p13 = scmp.lt.u32.totalorder %s4014_s9, %s5596_s23 }
  0x78   :  { %p4020_p0 = pnand %p4018_p13, %p4015_p12 }
  0x7a   :  { %4023 = shalt.err (!%p4020_p0)
}
  0x7b   :  { %s4024_s7 = scalar_lea.vmem %s4297_s2, 256  ;;  %p4029_p2 = scmp.lt.s32.totalorder %s4297_s2, %s4297_s2 }
  0x7c   :  { %p4025_p1 = scmp.ne.s32.totalorder %s4297_s2, %s4024_s7  ;;  %p4030_p3 = scmp.lt.s32.totalorder %s4024_s7, %s4024_s7 }
  0x7e   :  { %p4031_p4 = por %p4030_p3, %p4029_p2 }
  0x80   :  { %p4032_p5 = pnand %p4031_p4, %p4025_p1 }
  0x82   :  { %4035 = shalt.err (!%p4032_p5)
}
  0x83   :  { %142 = dma.hbm_to_vmem [thread:$0]  %s5596_s23, 256, %s4297_s2, [#allocation13], %s4070_s5, %s4070_s5, %s4071_s0  }
  0x84   :  { %4058 = dma.done.wait [#allocation4], 640  }
  0x85   :  { %4059 = vsyncadd [#allocation4], 4294966656 }
  0x86   :  { %4060 = dma.done.wait [#allocation7], 1536  }
  0x87   :  { %4061 = vsyncadd [#allocation7], 4294965760 }
  0x88   :  { %4062 = dma.done.wait [#allocation10], 2048  }
  0x89   :  { %4063 = vsyncadd [#allocation10], 4294965248 }
  0x8a   :  { %4064 = dma.done.wait [#allocation13], 256  }
  0x8b   :  { %4065 = vsyncadd [#allocation13], 4294967040  ;;  %v4076_v0 = vmov 0.0   ;;  %s5628_s23 = sld [smem:[#allocation20_spill]]  ;;  %vm168_vm0 = vcmask 31744   ;;  %vm5612_vm1 = vcmask 1041408  }
  0x8c   :  { %332 = vst [vmem:[#allocation2 + $0x10] sm:$0xff] %v4076_v0  ;;  %329 = vst [vmem:[#allocation2] sm:$0xff] %v4076_v0  ;;  %s4077_s3 = smov 4   ;;  %vm403_vm2 = vcmask 1040384   ;;  %vm5611_vm3 = vcmask 1042432   ;;  %vm181_vm4 = vcmask 1043456  }
  0x8d   :  { %334 = vst [vmem:[#allocation2 + $0x20] sm:$0xff] %v4076_v0  ;;  %336 = vst [vmem:[#allocation2 + $0x30] sm:$0xff] %v4076_v0  ;;  %vm343_vm5 = vcmask 31748   ;;  %s4078_s22 = smov 12   ;;  %vm445_vm6 = vcmask 1046528   ;;  %s4079_s30 = smov 16  }
  0x8e   :  { %s4080_s26 = smov 20   ;;  %vm470_vm7 = vcmask 1045504   ;;  %s4081_s29 = smov 24   ;;  %vm5610_vm8 = vcmask 1044480   ;;  %vm363_vm9 = vcmask 64547   ;;  %vm388_vm10 = vcmask 97346  }
  0x8f   :  { %s5629_s13 = sld [smem:[#allocation21_spill]]  ;;  %s4082_s8 = smov 28   ;;  %vm413_vm11 = vcmask 130145   ;;  %vm365_vm12 = vcmask 64544   ;;  %vm390_vm13 = vcmask 97344   ;;  %vm415_vm14 = vcmask 130144  }
  0x90   :  { %s4083_s27 = smov 32   ;;  %vm434_vm15 = vcmask 162944   ;;  %s5634_s2 = sld [smem:[#allocation28_spill]] }
  0x91   :  { %v4341_v1 = vld [vmem:[%s5628_s23] sm:$0xff]  ;;  %v4346_v2 = vld [vmem:[%s5628_s23 + $0x8] sm:$0xff]  ;;  %v4368_v14 = vld [vmem:[%s5628_s23 + $0x10] sm:$0xff]  ;;  %s5635_s28 = sld [smem:[#allocation24_spill]]  ;;  %s5636_s7 = sld [smem:[#allocation26_spill]] }
  0x92   :  { %v379_v3 = vrot.slane %v4341_v1, 6  ;;  %v354_v4 = vrot.slane %v4341_v1, 5  ;;  %v380_v5 = vrot.slane %v4346_v2, 6  ;;  %3530 = vmatprep.mubr.msk.f32.mxu0 %vm168_vm0, %v4341_v1  ;;  %v404_v6 = vrot.slane %v4341_v1, 7  ;;  %v4373_v15 = vld [vmem:[%s5628_s23 + $0x18] sm:$0xff]  ;;  %s4084_s23 = smov 40  }
  0x93   :  { %v405_v8 = vrot.slane %v4346_v2, 7  ;;  %v355_v9 = vrot.slane %v4346_v2, 5  ;;  %v338_v10 = vrot.slane %v4341_v1, 4  ;;  %v339_v11 = vrot.slane %v4346_v2, 4  ;;  %s4086_s4 = smov 56   ;;  %s4089_s1 = smov 80  }
  0x94   :  { %382 = vrot.lane.b32.xlu1 %v379_v3, %s4071_s0  ;;  %357 = vrot.lane.b32.xlu0 %v354_v4, %s4077_s3  ;;  %v381_v7 = vsel %vm5612_vm1, %v379_v3, %v380_v5  ;;  %v346_v17 = vrot.slane %v4368_v14, 4  ;;  %v347_v18 = vrot.slane %v4373_v15, 4  ;;  %v367_v19 = vrot.slane %v4368_v14, 5  ;;  %s4091_s9 = smov 112  }
  0x95   :  { %v406_v12 = vsel %vm403_vm2, %v404_v6, %v405_v8  ;;  %v356_v13 = vsel %vm5611_vm3, %v354_v4, %v355_v9  ;;  %v4378_v16 = vsel %vm181_vm4, %v338_v10, %v339_v11  ;;  %344 = vst.msk [vmem:[#allocation2] sm:$0xf0] %vm343_vm5, %v338_v10  ;;  %v446_v20 = vrot.slane %v4341_v1, 1  ;;  %v542_v37 = vld [vmem:[%s5629_s13] sm:$0xff]  ;;  %v543_v38 = vld [vmem:[%s5629_s13 + $0x8] sm:$0xff]  ;;  %v544_v41 = vld [vmem:[%s5629_s13 + $0x10] sm:$0xff] }
  0x96   :  { %345 = vst.msk [vmem:[#allocation2 + $0x10] sm:$0xff] %vm168_vm0, %v4378_v16  ;;  %v447_v21 = vrot.slane %v4346_v2, 1  ;;  %v4393_v22 = vsel %vm181_vm4, %v346_v17, %v347_v18  ;;  %v368_v24 = vrot.slane %v4373_v15, 5  ;;  %v392_v25 = vrot.slane %v4368_v14, 6  ;;  %v545_v42 = vld [vmem:[%s5629_s13 + $0x18] sm:$0xff] }
  0x97   :  { %351 = vst.msk [vmem:[#allocation2 + $0x20] sm:$0xf0] %vm343_vm5, %v346_v17  ;;  %v471_v27 = vrot.slane %v4341_v1, 2  ;;  %v472_v28 = vrot.slane %v4346_v2, 2  ;;  %v393_v30 = vrot.slane %v4373_v15, 6  ;;  %v417_v31 = vrot.slane %v4368_v14, 7 }
  0x98   :  { %384 = vrot.lane.b32.xlu1 %v381_v7, %s4071_s0  ;;  %407 = vrot.lane.b32.xlu0 %v404_v6, %s4078_s22  ;;  %352 = vst.msk [vmem:[#allocation2 + $0x30] sm:$0xff] %vm168_vm0, %v4393_v22  ;;  %v448_v23 = vsel %vm445_vm6, %v446_v20, %v447_v21  ;;  %v369_v26 = vsel %vm5611_vm3, %v367_v19, %v368_v24  ;;  %v496_v33 = vrot.slane %v4341_v1, 3  ;;  %v497_v34 = vrot.slane %v4346_v2, 3  ;;  %v546_v46 = vld [vmem:[%s5629_s13 + $0x20] sm:$0xf]  ;;  %s5631_s13 = sld [smem:[#allocation22_spill]] }
  0x99   :  { %v473_v29 = vsel %vm470_vm7, %v471_v27, %v472_v28  ;;  %v394_v32 = vsel %vm5612_vm1, %v392_v25, %v393_v30  ;;  %v418_v36 = vrot.slane %v4373_v15, 7  ;;  %v3696_v39 = vpack.c.bf16 %v543_v38, %v542_v37 }
  0x9a   :  { %v498_v35 = vsel %vm5610_vm8, %v496_v33, %v497_v34  ;;  %v3700_v43 = vpack.c.bf16 %v545_v42, %v544_v41  ;;  %v459_v44 = vrot.slane %v4368_v14, 1  ;;  %v460_v45 = vrot.slane %v4373_v15, 1 }
  0x9b   :  { %v419_v40 = vsel %vm403_vm2, %v417_v31, %v418_v36  ;;  %3697 = vmatprep.subr.bf16.mxu1 %v3696_v39  ;;  %v484_v48 = vrot.slane %v4368_v14, 2  ;;  %v485_v49 = vrot.slane %v4373_v15, 2  ;;  %v509_v51 = vrot.slane %v4368_v14, 3 }
  0x9c   :  { %409 = vrot.lane.b32.xlu1 %v406_v12, %s4078_s22  ;;  %359 = vrot.lane.b32.xlu0 %v356_v13, %s4077_s3  ;;  %v461_v47 = vsel %vm445_vm6, %v459_v44, %v460_v45  ;;  %v510_v52 = vrot.slane %v4373_v15, 3  ;;  %vm455_vm5 = vcmask 195744   ;;  %vm457_vm3 = vcmask 194720  }
  0x9d   :  { %3699 = vmatpush3.bf16.msra.mxu1 %v3696_v39  ;;  %v486_v50 = vsel %vm470_vm7, %v484_v48, %v485_v49  ;;  %vm482_vm1 = vcmask 226496  }
  0x9e   :  { %3701 = vmatprep.subr.bf16.mxu1 %v3700_v43  ;;  %v511_v53 = vsel %vm5610_vm8, %v509_v51, %v510_v52  ;;  %vm480_vm8 = vcmask 228544  }
  0xa0   :  { %370 = vrot.lane.b32.xlu1 %v367_v19, %s4077_s3  ;;  %428 = vrot.lane.b32.xlu0 %v4341_v1, %s4079_s30 }
  0xa1   :  { %3703 = vmatpush3.bf16.msra.mxu1 %v3700_v43 }
  0xa2   :  { %3544 = vmatprep.subr.msk.mxu1 %vm181_vm4, %v546_v46 }
  0xa4   :  { %449 = vrot.lane.b32.xlu1 %v448_v23, %s4080_s26  ;;  %430 = vrot.lane.b32.xlu0 %v4346_v2, %s4079_s30 }
  0xa5   :  { %3545 = vmatpush3.msk.msra.mxu1 %vm181_vm4, %v546_v46 }
  0xa8   :  { %395 = vrot.lane.b32.xlu1 %v392_v25, %s4071_s0  ;;  %372 = vrot.lane.b32.xlu0 %v369_v26, %s4077_s3  ;;  %s4087_s3 = smov 64  }
  0xac   :  { %474 = vrot.lane.b32.xlu1 %v473_v29, %s4081_s29  ;;  %451 = vrot.lane.b32.xlu0 %v447_v21, %s4080_s26 }
  0xb0   :  { %420 = vrot.lane.b32.xlu1 %v417_v31, %s4078_s22  ;;  %397 = vrot.lane.b32.xlu0 %v394_v32, %s4071_s0 }
  0xb4   :  { %499 = vrot.lane.b32.xlu1 %v498_v35, %s4082_s8  ;;  %476 = vrot.lane.b32.xlu0 %v472_v28, %s4081_s29 }
  0xb8   :  { %437 = vrot.lane.b32.xlu1 %v4368_v14, %s4079_s30  ;;  %422 = vrot.lane.b32.xlu0 %v419_v40, %s4078_s22 }
  0xbc   :  { %501 = vrot.lane.b32.xlu0 %v497_v34, %s4082_s8  ;;  %520 = vrot.lane.b32.xlu1 %v4378_v16, %s4083_s27 }
  0xc0   :  { %439 = vrot.lane.b32.xlu0 %v4373_v15, %s4079_s30  ;;  %462 = vrot.lane.b32.xlu1 %v461_v47, %s4080_s26 }
  0xc4   :  { %522 = vrot.lane.b32.xlu0 %v339_v11, %s4083_s27  ;;  %464 = vrot.lane.b32.xlu1 %v460_v45, %s4080_s26  ;;  %s5630_s26 = sld [smem:[#allocation27_spill]] }
  0xc8   :  { %487 = vrot.lane.b32.xlu0 %v486_v50, %s4081_s29  ;;  %489 = vrot.lane.b32.xlu1 %v485_v49, %s4081_s29 }
  0xca   :  { %v167_v30 = vld [vmem:[%s5630_s26] sm:$0xf] }
  0xcb   :  { %3528 = vmatprep.subr.msk.mxu0 %vm181_vm4, %v167_v30 }
  0xcc   :  { %512 = vrot.lane.b32.xlu0 %v511_v53, %s4082_s8  ;;  %514 = vrot.lane.b32.xlu1 %v510_v52, %s4082_s8 }
  0xcd   :  { %3529 = vmatpush3.msk.msra.mxu0 %vm181_vm4, %v167_v30 }
  0xce   :  { %3531 = vmatmul.mubr.msk.f32.vlgmr.msra.gmra.mrb[0].mxu0 %vm168_vm0, %v4346_v2 }
  0xcf   :  { %3533 = vmatprep.mubr.msk.f32.mxu0 %vm168_vm0, %v4368_v14 }
  0xd0   :  { %530 = vrot.lane.b32.xlu0 %v4393_v22, %s4083_s27  ;;  %532 = vrot.lane.b32.xlu1 %v347_v18, %s4083_s27 }
  0xd2   :  { %3534 = vmatmul.mubr.msk.f32.gmra.mrb[2].mxu0 %vm168_vm0, %v4373_v15  ;;  %vm724_vm0 = vcmask 64514  }
 0x106   :  { %v383_v54 = vpop.permute.xlu1 %382  ;;  %v358_v55 = vpop.permute.xlu0 %357 }
 0x107   :  { %364 = vst.msk [vmem:[#allocation2] sm:$0xf8] %vm363_vm9, %v358_v55 }
 0x108   :  { %389 = vst.msk [vmem:[#allocation2] sm:$0xfc] %vm388_vm10, %v383_v54 }
 0x10a   :  { %v385_v56 = vpop.permute.xlu1 %384  ;;  %v408_v57 = vpop.permute.xlu0 %407 }
 0x10b   :  { %414 = vst.msk [vmem:[#allocation2] sm:$0xfe] %vm413_vm11, %v408_v57 }
 0x10e   :  { %v410_v58 = vpop.permute.xlu1 %409  ;;  %v360_v59 = vpop.permute.xlu0 %359 }
 0x10f   :  { %366 = vst.msk [vmem:[#allocation2 + $0x10] sm:$0xff] %vm365_vm12, %v360_v59 }
 0x110   :  { %391 = vst.msk [vmem:[#allocation2 + $0x10] sm:$0xff] %vm390_vm13, %v385_v56 }
 0x111   :  { %416 = vst.msk [vmem:[#allocation2 + $0x10] sm:$0xff] %vm415_vm14, %v410_v58 }
 0x112   :  { %v371_v60 = vpop.permute.xlu1 %370  ;;  %v429_v61 = vpop.permute.xlu0 %428 }
 0x113   :  { %376 = vst.msk [vmem:[#allocation2 + $0x20] sm:$0xf8] %vm363_vm9, %v371_v60  ;;  %vm505_vm9 = vcmask 261344  }
 0x114   :  { %435 = vst.msk [vmem:[#allocation2] sm:$0xff] %vm434_vm15, %v429_v61 }
 0x116   :  { %v450_v62 = vpop.permute.xlu1 %449  ;;  %v431_v63 = vpop.permute.xlu0 %430 }
 0x117   :  { %456 = vst.msk [vmem:[#allocation2] sm:$0xff] %vm455_vm5, %v450_v62 }
 0x118   :  { %436 = vst.msk [vmem:[#allocation2 + $0x10] sm:$0xff] %vm434_vm15, %v431_v63 }
 0x11a   :  { %v396_v1 = vpop.permute.xlu1 %395  ;;  %v373_v3 = vpop.permute.xlu0 %372 }
 0x11b   :  { %401 = vst.msk [vmem:[#allocation2 + $0x20] sm:$0xfc] %vm388_vm10, %v396_v1  ;;  %vm507_vm10 = vcmask 258272  }
 0x11c   :  { %377 = vst.msk [vmem:[#allocation2 + $0x30] sm:$0xff] %vm365_vm12, %v373_v3  ;;  %vm526_vm12 = vcmask 294144  }
 0x11e   :  { %v475_v4 = vpop.permute.xlu1 %474  ;;  %v452_v5 = vpop.permute.xlu0 %451 }
 0x11f   :  { %481 = vst.msk [vmem:[#allocation2] sm:$0xff] %vm480_vm8, %v475_v4 }
 0x120   :  { %458 = vst.msk [vmem:[#allocation2 + $0x10] sm:$0x7f] %vm457_vm3, %v452_v5 }
 0x122   :  { %v421_v6 = vpop.permute.xlu1 %420  ;;  %v398_v7 = vpop.permute.xlu0 %397 }
 0x123   :  { %426 = vst.msk [vmem:[#allocation2 + $0x20] sm:$0xfe] %vm413_vm11, %v421_v6  ;;  %vm528_vm11 = vcmask 290048  }
 0x124   :  { %402 = vst.msk [vmem:[#allocation2 + $0x30] sm:$0xff] %vm390_vm13, %v398_v7  ;;  %vm547_vm13 = vcmask 293888   ;;  %v312_v7 = vlaneseq }
 0x126   :  { %v500_v8 = vpop.permute.xlu1 %499  ;;  %v477_v9 = vpop.permute.xlu0 %476 }
 0x127   :  { %506 = vst.msk [vmem:[#allocation2] sm:$0xff] %vm505_vm9, %v500_v8  ;;  %v313_v8 = vshrl.u32 %v312_v7, 7 }
 0x128   :  { %483 = vst.msk [vmem:[#allocation2 + $0x10] sm:$0x3f] %vm482_vm1, %v477_v9  ;;  %v684_v9 = vld [vmem:[%s5631_s13] sm:$0x1] }
 0x12a   :  { %v438_v10 = vpop.permute.xlu1 %437  ;;  %v423_v11 = vpop.permute.xlu0 %422 }
 0x12b   :  { %443 = vst.msk [vmem:[#allocation2 + $0x20] sm:$0xff] %vm434_vm15, %v438_v10  ;;  %v4537_v10 = vsub.s32 0, %v313_v8 }
 0x12c   :  { %427 = vst.msk [vmem:[#allocation2 + $0x30] sm:$0xff] %vm415_vm14, %v423_v11  ;;  %vm745_vm14 = vcmask 130113  }
 0x12e   :  { %v502_v12 = vpop.permute.xlu0 %501  ;;  %v521_v13 = vpop.permute.xlu1 %520 }
 0x12f   :  { %508 = vst.msk [vmem:[#allocation2 + $0x10] sm:$0x1f] %vm507_vm10, %v502_v12 }
 0x130   :  { %527 = vst.msk [vmem:[#allocation2] sm:$0xff] %vm526_vm12, %v521_v13 }
 0x132   :  { %v440_v16 = vpop.permute.xlu0 %439  ;;  %v463_v17 = vpop.permute.xlu1 %462 }
 0x133   :  { %444 = vst.msk [vmem:[#allocation2 + $0x30] sm:$0xff] %vm434_vm15, %v440_v16  ;;  %v3383_v16 = vld [vmem:[%s5631_s13 + $0x1] ss:$0 sm:$0xff]  ;;  %vm766_vm15 = vcmask 195712  }
 0x134   :  { %468 = vst.msk [vmem:[#allocation2 + $0x20] sm:$0xff] %vm455_vm5, %v463_v17  ;;  %vm747_vm5 = vcmask 130112  }
 0x136   :  { %v523_v18 = vpop.permute.xlu0 %522  ;;  %v465_v19 = vpop.permute.xlu1 %464 }
 0x137   :  { %v538_v20 = vld [vmem:[#allocation2] sm:$0xff]  ;;  %529 = vst.msk [vmem:[#allocation2 + $0x10] sm:$0xf] %vm528_vm11, %v523_v18 }
 0x138   :  { %469 = vst.msk [vmem:[#allocation2 + $0x30] sm:$0x7f] %vm457_vm3, %v465_v19  ;;  %3546 = vmatprep.mubr.msk.f32.mxu1 %vm547_vm13, %v538_v20  ;;  %709 = vst [vmem:[#allocation2] sm:$0xff] %v4076_v0  ;;  %vm5632_vm3 = vcmask 1041408  }
 0x13a   :  { %v488_v21 = vpop.permute.xlu0 %487  ;;  %v490_v22 = vpop.permute.xlu1 %489 }
 0x13b   :  { %493 = vst.msk [vmem:[#allocation2 + $0x20] sm:$0xff] %vm480_vm8, %v488_v21  ;;  %vm5633_vm8 = vmmov %vm5632_vm3 }
 0x13c   :  { %494 = vst.msk [vmem:[#allocation2 + $0x30] sm:$0x3f] %vm482_vm1, %v490_v22  ;;  %vm270_vm1 = vcmask 64512  }
 0x13e   :  { %v513_v23 = vpop.permute.xlu0 %512  ;;  %v515_v24 = vpop.permute.xlu1 %514  ;;  %v539_v25 = vld [vmem:[#allocation2 + $0x10] sm:$0xff] }
 0x13f   :  { %518 = vst.msk [vmem:[#allocation2 + $0x20] sm:$0xff] %vm505_vm9, %v513_v23  ;;  %3547 = vmatmul.mubr.msk.f32.vlgmr.msra.gmra.mrb[0].mxu1 %vm547_vm13, %v539_v25  ;;  %711 = vst [vmem:[#allocation2 + $0x10] sm:$0xff] %v4076_v0  ;;  %vm788_vm9 = vcmask 260288  }
 0x140   :  { %519 = vst.msk [vmem:[#allocation2 + $0x30] sm:$0x1f] %vm507_vm10, %v515_v24  ;;  %vm786_vm10 = vcmask 261312  }
 0x142   :  { %v531_v26 = vpop.permute.xlu0 %530  ;;  %v533_v27 = vpop.permute.xlu1 %532 }
 0x143   :  { %536 = vst.msk [vmem:[#allocation2 + $0x20] sm:$0xff] %vm526_vm12, %v531_v26  ;;  %vm812_vm12 = vcmask 324864  }
 0x144   :  { %537 = vst.msk [vmem:[#allocation2 + $0x30] sm:$0xf] %vm528_vm11, %v533_v27  ;;  %vm810_vm11 = vcmask 326912  }
 0x14a   :  { %v540_v28 = vld [vmem:[#allocation2 + $0x20] sm:$0xff] }
 0x14b   :  { %v541_v29 = vld [vmem:[#allocation2 + $0x30] sm:$0xff]  ;;  %3549 = vmatprep.mubr.msk.f32.mxu1 %vm547_vm13, %v540_v28  ;;  %713 = vst [vmem:[#allocation2 + $0x20] sm:$0xff] %v4076_v0 }
 0x14c   :  { %715 = vst [vmem:[#allocation2 + $0x30] sm:$0xff] %v4076_v0  ;;  %3550 = vmatmul.mubr.msk.f32.gmra.mrb[2].mxu1 %vm547_vm13, %v541_v29  ;;  %vm834_vm13 = vcmask 326656  }
 0x212   :  { %v3548_v31 = vpop.f32.mrb[0].mxu1 }
 0x213   :  { %v649_v32 = vsel %vm270_vm1, %v3548_v31, 0.0  ;;  %v629_v33 = vpop.f32.mrb[1].mxu1 }
 0x214   :  { %v648_v34 = vsel %vm270_vm1, %v629_v33, 0.0 }
 0x215   :  { %v650_v35 = vadd.f32 %v649_v32, %v648_v34 }
 0x21f   :  { %v3551_v36 = vpop.f32.mrb[2].mxu1 }
 0x220   :  { %v639_v37 = vpop.f32.mrb[3].mxu1  ;;  %v653_v2 = vsel %vm270_vm1, %v3551_v36, 0.0 }
 0x221   :  { %v651_v38 = vsel %vm270_vm1, %v639_v37, 0.0 }
 0x222   :  { %v652_v39 = vadd.f32 %v651_v38, %v650_v35 }
 0x224   :  { %v654_v40 = vadd.f32 %v653_v2, %v652_v39 }
 0x226   :  { %v655_v14 = vrot.slane %v654_v40, 4 }
 0x228   :  { %v656_v41 = vadd.f32 %v655_v14, %v654_v40 }
 0x22a   :  { %v657_v42 = vrot.slane %v656_v41, 2 }
 0x22c   :  { %v658_v15 = vadd.f32 %v657_v42, %v656_v41 }
 0x22e   :  { %v659_v43 = vrot.slane %v658_v15, 1 }
 0x230   :  { %v660_v44 = vadd.f32 %v659_v43, %v658_v15  ;;  %v829_v15 = vld [vmem:[#allocation3] sm:$0xff]  ;;  %v830_v43 = vld [vmem:[#allocation3 + $0x8] sm:$0xff] }
 0x232   :  { %v661_v45 = vmul.f32 0.03125, %v660_v44 }
 0x234   :  { %v662_v46 = vsub.f32 %v629_v33, %v661_v45  ;;  %v663_v47 = vsub.f32 %v3548_v31, %v661_v45  ;;  %v664_v48 = vsub.f32 %v639_v37, %v661_v45  ;;  %v665_v49 = vsub.f32 %v3551_v36, %v661_v45 }
 0x236   :  { %v666_v50 = vmul.f32 %v662_v46, %v662_v46  ;;  %v667_v51 = vmul.f32 %v663_v47, %v663_v47  ;;  %v668_v52 = vmul.f32 %v664_v48, %v664_v48  ;;  %v669_v53 = vmul.f32 %v665_v49, %v665_v49 }
 0x238   :  { %v670_v54 = vsel %vm270_vm1, %v666_v50, 0.0  ;;  %v671_v55 = vsel %vm270_vm1, %v667_v51, 0.0  ;;  %v673_v57 = vsel %vm270_vm1, %v668_v52, 0.0  ;;  %v675_v59 = vsel %vm270_vm1, %v669_v53, 0.0  ;;  %v831_v53 = vld [vmem:[#allocation3 + $0x10] sm:$0xff] }
 0x239   :  { %v672_v56 = vadd.f32 %v671_v55, %v670_v54  ;;  %v832_v54 = vld [vmem:[#allocation3 + $0x18] sm:$0xff] }
 0x23a   :  { %v3708_v55 = vpack.c.bf16 %v832_v54, %v831_v53 }
 0x23b   :  { %v674_v58 = vadd.f32 %v673_v57, %v672_v56  ;;  %v833_v56 = vld [vmem:[#allocation3 + $0x20] sm:$0xff] }
 0x23d   :  { %v676_v60 = vadd.f32 %v675_v59, %v674_v58  ;;  %v3532_v59 = vpop.f32.mrb[0].mxu0 }
 0x23f   :  { %v677_v61 = vrot.slane %v676_v60, 4 }
 0x241   :  { %v678_v62 = vadd.f32 %v677_v61, %v676_v60  ;;  %v272_v60 = vsel %vm270_vm1, %v3532_v59, 0.0  ;;  %v251_v61 = vpop.f32.mrb[1].mxu0 }
 0x243   :  { %v679_v63 = vrot.slane %v678_v62, 2 }
 0x245   :  { %v680_v1 = vadd.f32 %v679_v63, %v678_v62  ;;  %v271_v62 = vsel %vm270_vm1, %v251_v61, 0.0 }
 0x247   :  { %v681_v3 = vrot.slane %v680_v1, 1 }
 0x249   :  { %v682_v4 = vadd.f32 %v681_v3, %v680_v1  ;;  %v273_v3 = vadd.f32 %v272_v60, %v271_v62 }
 0x24b   :  { %v683_v5 = vmul.f32 0.03125, %v682_v4  ;;  %v3535_v4 = vpop.f32.mrb[2].mxu0 }
 0x24d   :  { %v685_v6 = vadd.f32 1e-05, %v683_v5  ;;  %v261_v5 = vpop.f32.mrb[3].mxu0 }
 0x24e   :  { %v274_v7 = vsel %vm270_vm1, %v261_v5, 0.0 }
 0x24f   :  { %3880 = vrsqrt.f32 %v685_v6  ;;  %v276_v6 = vsel %vm270_vm1, %v3535_v4, 0.0 }
 0x259   :  { %v3881_v11 = vpop.eup %3880 }
 0x25a   :  { %v687_v12 = vmul.f32 %v3881_v11, %v684_v9  ;;  %v275_v11 = vadd.f32 %v274_v7, %v273_v3 }
 0x25c   :  { %v691_v13 = vrot.slane %v687_v12, %v4537_v10  ;;  %v277_v12 = vadd.f32 %v276_v6, %v275_v11 }
 0x25e   :  { %v694_v17 = vmul.f32 %v691_v13, %v664_v48  ;;  %v695_v18 = vmul.f32 %v691_v13, %v665_v49  ;;  %v692_v19 = vmul.f32 %v691_v13, %v662_v46  ;;  %v693_v20 = vmul.f32 %v691_v13, %v663_v47 }
 0x25f   :  { %v3704_v49 = vpack.c.bf16 %v830_v43, %v829_v15 }
 0x260   :  { %v703_v21 = vadd.f32 %v3383_v16, %v694_v17  ;;  %v704_v22 = vadd.f32 %v3383_v16, %v695_v18  ;;  %v701_v23 = vadd.f32 %v3383_v16, %v692_v19  ;;  %v702_v24 = vadd.f32 %v3383_v16, %v693_v20 }
 0x261   :  { %3705 = vmatprep.subr.bf16.mxu0 %v3704_v49  ;;  %3849 = vmatprep.subr.bf16.mxu1 %v3704_v49  ;;  %v278_v17 = vrot.slane %v277_v12, 4 }
 0x262   :  { %v707_v25 = vmax.f32 %v703_v21, 0.0  ;;  %v4543_v26 = vmax.f32 %v704_v22, 0.0  ;;  %v705_v27 = vmax.f32 %v701_v23, 0.0  ;;  %v706_v28 = vmax.f32 %v702_v24, 0.0  ;;  %3707 = vmatpush3.bf16.msra.mxu0 %v3704_v49  ;;  %3852 = vmatpush3.bf16.msra.mxu1 %v3704_v49 }
 0x263   :  { %3709 = vmatprep.subr.bf16.mxu0 %v3708_v55  ;;  %3850 = vmatprep.subr.bf16.mxu1 %v3708_v55  ;;  %v279_v18 = vadd.f32 %v278_v17, %v277_v12 }
 0x264   :  { %v729_v29 = vrot.slane %v707_v25, 6  ;;  %769 = vrot.lane.b32.xlu1 %v707_v25, %s4079_s30  ;;  %760 = vrot.lane.b32.xlu0 %v705_v27, %s4079_s30  ;;  %v749_v30 = vrot.slane %v707_v25, 7  ;;  %v791_v31 = vrot.slane %v4543_v26, 1  ;;  %v736_v32 = vrot.slane %v705_v27, 7 }
 0x265   :  { %v737_v33 = vrot.slane %v706_v28, 7  ;;  %v778_v34 = vrot.slane %v706_v28, 1  ;;  %v777_v35 = vrot.slane %v705_v27, 1  ;;  %v802_v36 = vrot.slane %v706_v28, 2 }
 0x266   :  { %v801_v37 = vrot.slane %v705_v27, 2  ;;  %v750_v38 = vrot.slane %v4543_v26, 7  ;;  %v790_v39 = vrot.slane %v707_v25, 1  ;;  %v814_v2 = vrot.slane %v707_v25, 2  ;;  %734 = vst.msk [vmem:[#allocation2 + $0x20] sm:$0xfc] %vm724_vm0, %v729_v29  ;;  %3711 = vmatpush3.bf16.msra.mxu0 %v3708_v55  ;;  %3853 = vmatpush3.bf16.msra.mxu1 %v3708_v55 }
 0x267   :  { %v738_v40 = vsel %vm403_vm2, %v736_v32, %v737_v33  ;;  %v779_v14 = vsel %vm445_vm6, %v777_v35, %v778_v34  ;;  %v815_v41 = vrot.slane %v4543_v26, 2  ;;  %v719_v42 = vrot.slane %v705_v27, 6  ;;  %3560 = vmatprep.subr.mxu0 %v833_v56  ;;  %3851 = vmatprep.subr.mxu1 %v833_v56 }
 0x268   :  { %752 = vrot.lane.b32.xlu1 %v749_v30, %s4071_s0  ;;  %762 = vrot.lane.b32.xlu0 %v706_v28, %s4079_s30  ;;  %v803_v44 = vsel %vm470_vm7, %v801_v37, %v802_v36  ;;  %v751_v45 = vsel %vm403_vm2, %v749_v30, %v750_v38  ;;  %v792_v46 = vsel %vm445_vm6, %v790_v39, %v791_v31  ;;  %v720_v47 = vrot.slane %v706_v28, 6 }
 0x269   :  { %v816_v48 = vsel %vm470_vm7, %v814_v2, %v815_v41  ;;  %725 = vst.msk [vmem:[#allocation2] sm:$0xfc] %vm724_vm0, %v719_v42  ;;  %v730_v51 = vrot.slane %v4543_v26, 6  ;;  %v280_v21 = vrot.slane %v279_v18, 2  ;;  %vm1008_vm0 = vcmask 64513  }
 0x26a   :  { %v721_v50 = vsel %vm5632_vm3, %v719_v42, %v720_v47  ;;  %3561 = vmatpush3.msra.mxu0 %v833_v56  ;;  %3854 = vmatpush3.msra.mxu1 %v833_v56  ;;  %v308_v56 = vld [vmem:[%s5634_s2] sm:$0x1]  ;;  %vm1046_vm3 = vcmask 194688  }
 0x26b   :  { %726 = vst.msk [vmem:[#allocation2 + $0x10] sm:$0xff] %vm270_vm1, %v721_v50  ;;  %v731_v52 = vsel %vm5633_vm8, %v729_v29, %v730_v51  ;;  %v281_v22 = vadd.f32 %v280_v21, %v279_v18  ;;  %vm1066_vm8 = vcmask 195584  }
 0x26c   :  { %795 = vrot.lane.b32.xlu1 %v791_v31, %s4081_s29  ;;  %771 = vrot.lane.b32.xlu0 %v4543_v26, %s4079_s30  ;;  %735 = vst.msk [vmem:[#allocation2 + $0x30] sm:$0xff] %vm270_vm1, %v731_v52 }
 0x26d   :  { %v282_v25 = vrot.slane %v281_v22, 1 }
 0x26f   :  { %v283_v26 = vadd.f32 %v282_v25, %v281_v22 }
 0x270   :  { %739 = vrot.lane.b32.xlu0 %v736_v32, %s4071_s0  ;;  %741 = vrot.lane.b32.xlu1 %v738_v40, %s4071_s0 }
 0x271   :  { %v285_v29 = vmul.f32 0.03125, %v283_v26 }
 0x273   :  { %v286_v30 = vsub.f32 %v251_v61, %v285_v29  ;;  %v287_v31 = vsub.f32 %v3532_v59, %v285_v29  ;;  %v288_v32 = vsub.f32 %v261_v5, %v285_v29  ;;  %v289_v33 = vsub.f32 %v3535_v4, %v285_v29 }
 0x274   :  { %782 = vrot.lane.b32.xlu0 %v778_v34, %s4081_s29  ;;  %780 = vrot.lane.b32.xlu1 %v779_v14, %s4081_s29 }
 0x275   :  { %v290_v38 = vmul.f32 %v286_v30, %v286_v30  ;;  %v291_v39 = vmul.f32 %v287_v31, %v287_v31  ;;  %v292_v2 = vmul.f32 %v288_v32, %v288_v32  ;;  %v293_v40 = vmul.f32 %v289_v33, %v289_v33 }
 0x277   :  { %v294_v14 = vsel %vm270_vm1, %v290_v38, 0.0  ;;  %v297_v42 = vsel %vm270_vm1, %v292_v2, 0.0  ;;  %v299_v43 = vsel %vm270_vm1, %v293_v40, 0.0 }
 0x278   :  { %806 = vrot.lane.b32.xlu0 %v802_v36, %s4083_s27  ;;  %804 = vrot.lane.b32.xlu1 %v803_v44, %s4083_s27 }
 0x27c   :  { %754 = vrot.lane.b32.xlu0 %v751_v45, %s4071_s0  ;;  %793 = vrot.lane.b32.xlu1 %v792_v46, %s4081_s29 }
 0x280   :  { %817 = vrot.lane.b32.xlu0 %v816_v48, %s4083_s27  ;;  %819 = vrot.lane.b32.xlu1 %v815_v41, %s4083_s27  ;;  %v295_v41 = vsel %vm270_vm1, %v291_v39, 0.0 }
 0x281   :  { %v296_v15 = vadd.f32 %v295_v41, %v294_v14 }
 0x283   :  { %v298_v44 = vadd.f32 %v297_v42, %v296_v15 }
 0x285   :  { %v300_v45 = vadd.f32 %v299_v43, %v298_v44  ;;  %v968_v43 = vld [vmem:[%s5635_s28] sm:$0x1] }
 0x287   :  { %v301_v48 = vrot.slane %v300_v45, 4 }
 0x289   :  { %v302_v49 = vadd.f32 %v301_v48, %v300_v45 }
 0x28b   :  { %v303_v50 = vrot.slane %v302_v49, 2 }
 0x28d   :  { %v304_v51 = vadd.f32 %v303_v50, %v302_v49 }
 0x28f   :  { %v305_v52 = vrot.slane %v304_v51, 1 }
 0x291   :  { %v306_v53 = vadd.f32 %v305_v52, %v304_v51  ;;  %v1063_v52 = vld [vmem:[#allocation6] sm:$0xff] }
 0x293   :  { %v307_v54 = vmul.f32 0.03125, %v306_v53  ;;  %v1064_v53 = vld [vmem:[#allocation6 + $0x8] sm:$0xff] }
 0x295   :  { %v309_v55 = vadd.f32 1e-05, %v307_v54 }
 0x297   :  { %3882 = vrsqrt.f32 %v309_v55 }
 0x2d6   :  { %v770_v57 = vpop.permute.xlu1 %769  ;;  %v761_v58 = vpop.permute.xlu0 %760 }
 0x2da   :  { %v753_v63 = vpop.permute.xlu1 %752  ;;  %v763_v1 = vpop.permute.xlu0 %762 }
 0x2db   :  { %758 = vst.msk [vmem:[#allocation2 + $0x20] sm:$0xfe] %vm745_vm14, %v753_v63 }
 0x2dc   :  { %775 = vst.msk [vmem:[#allocation2 + $0x20] sm:$0xff] %vm766_vm15, %v770_v57  ;;  %v3883_v57 = vpop.eup %3882 }
 0x2de   :  { %v796_v8 = vpop.permute.xlu1 %795  ;;  %v772_v9 = vpop.permute.xlu0 %771 }
 0x2e2   :  { %v740_v13 = vpop.permute.xlu0 %739  ;;  %v742_v16 = vpop.permute.xlu1 %741 }
 0x2e3   :  { %746 = vst.msk [vmem:[#allocation2] sm:$0xfe] %vm745_vm14, %v740_v13  ;;  %vm1398_vm14 = vcmask 64516  }
 0x2e4   :  { %748 = vst.msk [vmem:[#allocation2 + $0x10] sm:$0xff] %vm747_vm5, %v742_v16 }
 0x2e5   :  { %768 = vst.msk [vmem:[#allocation2 + $0x10] sm:$0xff] %vm766_vm15, %v763_v1  ;;  %767 = vst.msk [vmem:[#allocation2] sm:$0xff] %vm766_vm15, %v761_v58  ;;  %v311_v58 = vmul.f32 %v3883_v57, %v308_v56 }
 0x2e6   :  { %v783_v19 = vpop.permute.xlu0 %782  ;;  %v781_v20 = vpop.permute.xlu1 %780 }
 0x2e7   :  { %789 = vst.msk [vmem:[#allocation2 + $0x10] sm:$0x7f] %vm788_vm9, %v783_v19  ;;  %v315_v59 = vrot.slane %v311_v58, %v4537_v10  ;;  %v3712_v58 = vpack.c.bf16 %v1064_v53, %v1063_v52 }
 0x2e8   :  { %787 = vst.msk [vmem:[#allocation2] sm:$0xff] %vm786_vm10, %v781_v20 }
 0x2e9   :  { %v4614_v60 = vmul.f32 %v315_v59, %v286_v30  ;;  %v4616_v61 = vmul.f32 %v315_v59, %v287_v31  ;;  %v4618_v62 = vmul.f32 %v315_v59, %v288_v32  ;;  %v4620_v63 = vmul.f32 %v315_v59, %v289_v33  ;;  %3713 = vmatprep.subr.bf16.mxu1 %v3712_v58 }
 0x2ea   :  { %v807_v23 = vpop.permute.xlu0 %806  ;;  %v805_v24 = vpop.permute.xlu1 %804 }
 0x2eb   :  { %813 = vst.msk [vmem:[#allocation2 + $0x10] sm:$0x3f] %vm812_vm12, %v807_v23 }
 0x2ec   :  { %811 = vst.msk [vmem:[#allocation2] sm:$0xff] %vm810_vm11, %v805_v24 }
 0x2ee   :  { %v755_v27 = vpop.permute.xlu0 %754  ;;  %v794_v28 = vpop.permute.xlu1 %793 }
 0x2ef   :  { %759 = vst.msk [vmem:[#allocation2 + $0x30] sm:$0xff] %vm747_vm5, %v755_v27 }
 0x2f0   :  { %799 = vst.msk [vmem:[#allocation2 + $0x20] sm:$0xff] %vm786_vm10, %v794_v28 }
 0x2f1   :  { %776 = vst.msk [vmem:[#allocation2 + $0x30] sm:$0xff] %vm766_vm15, %v772_v9 }
 0x2f2   :  { %800 = vst.msk [vmem:[#allocation2 + $0x30] sm:$0x7f] %vm788_vm9, %v796_v8  ;;  %v818_v34 = vpop.permute.xlu0 %817  ;;  %v820_v35 = vpop.permute.xlu1 %819  ;;  %v826_v37 = vld [vmem:[#allocation2 + $0x10] sm:$0xff]  ;;  %vm5637_vm9 = vcmask 1042432  }
 0x2f3   :  { %v825_v36 = vld [vmem:[#allocation2] sm:$0xff]  ;;  %823 = vst.msk [vmem:[#allocation2 + $0x20] sm:$0xff] %vm810_vm11, %v818_v34  ;;  %995 = vst [vmem:[#allocation2 + $0x10] sm:$0xff] %v4076_v0 }
 0x2f4   :  { %824 = vst.msk [vmem:[#allocation2 + $0x30] sm:$0x3f] %vm812_vm12, %v820_v35  ;;  %3562 = vmatprep.mubr.msk.f32.mxu0 %vm834_vm13, %v825_v36  ;;  %993 = vst [vmem:[#allocation2] sm:$0xff] %v4076_v0  ;;  %vm5638_vm12 = vcmask 1041408  }
 0x2f5   :  { %3563 = vmatmul.mubr.msk.f32.vlgmr.msra.gmra.mrb[4].mxu0 %vm834_vm13, %v826_v37 }
 0x2fa   :  { %v827_v46 = vld [vmem:[#allocation2 + $0x20] sm:$0xff] }
 0x2fb   :  { %v828_v47 = vld [vmem:[#allocation2 + $0x30] sm:$0xff]  ;;  %3565 = vmatprep.mubr.msk.f32.mxu1 %vm834_vm13, %v827_v46  ;;  %997 = vst [vmem:[#allocation2 + $0x20] sm:$0xff] %v4076_v0 }
 0x2fc   :  { %999 = vst [vmem:[#allocation2 + $0x30] sm:$0xff] %v4076_v0  ;;  %3566 = vmatmul.mubr.msk.f32.vlgmr.msra.gmra.mrb[4].mxu1 %vm834_vm13, %v828_v47  ;;  %v3388_v47 = vld [vmem:[%s5635_s28 + $0x1] ss:$0 sm:$0xff]  ;;  %vm5639_vm13 = vmmov %vm5637_vm9 }
 0x2fd   :  { %3715 = vmatpush3.bf16.msra.mxu1 %v3712_v58 }
 0x3c8   :  { %v3564_v1 = vpop.f32.mrb[4].mxu0 }
 0x3c9   :  { %v933_v3 = vsel %vm270_vm1, %v3564_v1, 0.0  ;;  %v913_v4 = vpop.f32.mrb[5].mxu0 }
 0x3ca   :  { %v932_v5 = vsel %vm270_vm1, %v913_v4, 0.0 }
 0x3cb   :  { %v934_v6 = vadd.f32 %v933_v3, %v932_v5  ;;  %v1065_v5 = vld [vmem:[#allocation6 + $0x10] sm:$0xff] }
 0x3cc   :  { %3572 = vmatprep.subr.mxu1 %v1065_v5 }
 0x3cd   :  { %3573 = vmatpush3.msra.mxu1 %v1065_v5 }
 0x3cf   :  { %v3567_v7 = vpop.f32.mrb[4].mxu1 }
 0x3d0   :  { %v923_v8 = vpop.f32.mrb[5].mxu1  ;;  %v937_v12 = vsel %vm270_vm1, %v3567_v7, 0.0 }
 0x3d1   :  { %v935_v9 = vsel %vm270_vm1, %v923_v8, 0.0 }
 0x3d2   :  { %v936_v11 = vadd.f32 %v935_v9, %v934_v6 }
 0x3d4   :  { %v938_v13 = vadd.f32 %v937_v12, %v936_v11 }
 0x3d6   :  { %v939_v16 = vrot.slane %v938_v13, 4 }
 0x3d8   :  { %v940_v17 = vadd.f32 %v939_v16, %v938_v13 }
 0x3da   :  { %v941_v18 = vrot.slane %v940_v17, 2 }
 0x3dc   :  { %v942_v19 = vadd.f32 %v941_v18, %v940_v17 }
 0x3de   :  { %v943_v20 = vrot.slane %v942_v19, 1 }
 0x3e0   :  { %v944_v21 = vadd.f32 %v943_v20, %v942_v19 }
 0x3e2   :  { %v945_v22 = vmul.f32 0.03125, %v944_v21 }
 0x3e4   :  { %v946_v23 = vsub.f32 %v913_v4, %v945_v22  ;;  %v947_v24 = vsub.f32 %v3564_v1, %v945_v22  ;;  %v948_v25 = vsub.f32 %v923_v8, %v945_v22  ;;  %v949_v26 = vsub.f32 %v3567_v7, %v945_v22 }
 0x3e6   :  { %v950_v27 = vmul.f32 %v946_v23, %v946_v23  ;;  %v951_v28 = vmul.f32 %v947_v24, %v947_v24  ;;  %v952_v29 = vmul.f32 %v948_v25, %v948_v25  ;;  %v953_v30 = vmul.f32 %v949_v26, %v949_v26 }
 0x3e8   :  { %v954_v31 = vsel %vm270_vm1, %v950_v27, 0.0  ;;  %v955_v32 = vsel %vm270_vm1, %v951_v28, 0.0  ;;  %v957_v34 = vsel %vm270_vm1, %v952_v29, 0.0  ;;  %v959_v36 = vsel %vm270_vm1, %v953_v30, 0.0 }
 0x3e9   :  { %v956_v33 = vadd.f32 %v955_v32, %v954_v31 }
 0x3eb   :  { %v958_v35 = vadd.f32 %v957_v34, %v956_v33  ;;  %v1229_v33 = vld [vmem:[%s5588_s15] sm:$0xff] }
 0x3ec   :  { %3580 = vmatprep.subr.mxu0 %v1229_v33 }
 0x3ed   :  { %v960_v37 = vadd.f32 %v959_v36, %v958_v35  ;;  %3581 = vmatpush3.msra.mxu0 %v1229_v33 }
 0x3ef   :  { %v961_v38 = vrot.slane %v960_v37, 4 }
 0x3f1   :  { %v962_v39 = vadd.f32 %v961_v38, %v960_v37 }
 0x3f3   :  { %v963_v2 = vrot.slane %v962_v39, 2 }
 0x3f5   :  { %v964_v40 = vadd.f32 %v963_v2, %v962_v39 }
 0x3f7   :  { %v965_v14 = vrot.slane %v964_v40, 1 }
 0x3f9   :  { %v966_v41 = vadd.f32 %v965_v14, %v964_v40 }
 0x3fb   :  { %v967_v42 = vmul.f32 0.03125, %v966_v41 }
 0x3fd   :  { %v969_v15 = vadd.f32 1e-05, %v967_v42 }
 0x3ff   :  { %3884 = vrsqrt.f32 %v969_v15 }
 0x409   :  { %v3885_v44 = vpop.eup %3884 }
 0x40a   :  { %v971_v45 = vmul.f32 %v3885_v44, %v968_v43 }
 0x40c   :  { %v975_v46 = vrot.slane %v971_v45, %v4537_v10 }
 0x40e   :  { %v978_v48 = vmul.f32 %v975_v46, %v948_v25  ;;  %v977_v49 = vmul.f32 %v975_v46, %v947_v24  ;;  %v976_v50 = vmul.f32 %v975_v46, %v946_v23  ;;  %v979_v51 = vmul.f32 %v975_v46, %v949_v26 }
 0x410   :  { %v986_v54 = vadd.f32 %v3388_v47, %v977_v49  ;;  %v985_v55 = vadd.f32 %v3388_v47, %v976_v50  ;;  %v988_v56 = vadd.f32 %v3388_v47, %v979_v51  ;;  %v987_v57 = vadd.f32 %v3388_v47, %v978_v48 }
 0x412   :  { %v990_v59 = vmax.f32 %v986_v54, 0.0  ;;  %v989_v1 = vmax.f32 %v985_v55, 0.0  ;;  %v992_v3 = vmax.f32 %v988_v56, 0.0  ;;  %v991_v4 = vmax.f32 %v987_v57, 0.0 }
 0x414   :  { %1022 = vrot.lane.b32.xlu1 %v990_v59, %s4071_s0  ;;  %v1004_v6 = vrot.slane %v990_v59, 7  ;;  %1020 = vrot.lane.b32.xlu0 %v989_v1, %s4071_s0  ;;  %v1003_v7 = vrot.slane %v989_v1, 7  ;;  %v1014_v8 = vrot.slane %v992_v3, 7  ;;  %v1013_v9 = vrot.slane %v991_v4, 7 }
 0x415   :  { %v1037_v11 = vrot.slane %v990_v59, 1  ;;  %v1036_v12 = vrot.slane %v989_v1, 1  ;;  %v1049_v13 = vrot.slane %v992_v3, 1  ;;  %v1048_v16 = vrot.slane %v991_v4, 1 }
 0x416   :  { %v1005_v17 = vsel %vm403_vm2, %v1003_v7, %v1004_v6  ;;  %1009 = vst.msk [vmem:[#allocation2] sm:$0xfe] %vm1008_vm0, %v1003_v7  ;;  %1018 = vst.msk [vmem:[#allocation2 + $0x20] sm:$0xfe] %vm1008_vm0, %v1013_v9  ;;  %v1015_v18 = vsel %vm403_vm2, %v1013_v9, %v1014_v8 }
 0x417   :  { %v1038_v19 = vsel %vm445_vm6, %v1036_v12, %v1037_v11  ;;  %v1050_v20 = vsel %vm445_vm6, %v1048_v16, %v1049_v13  ;;  %1010 = vst.msk [vmem:[#allocation2 + $0x10] sm:$0xff] %vm270_vm1, %v1005_v17  ;;  %1019 = vst.msk [vmem:[#allocation2 + $0x30] sm:$0xff] %vm270_vm1, %v1015_v18  ;;  %v1200_v17 = vld [vmem:[%s5636_s7] sm:$0x1] }
 0x418   :  { %1030 = vrot.lane.b32.xlu1 %v992_v3, %s4071_s0  ;;  %1028 = vrot.lane.b32.xlu0 %v991_v4, %s4071_s0  ;;  %vm5640_vm0 = vmmov %vm5638_vm12 }
 0x41c   :  { %1041 = vrot.lane.b32.xlu1 %v1037_v11, %s4079_s30  ;;  %1039 = vrot.lane.b32.xlu0 %v1038_v19, %s4079_s30 }
 0x420   :  { %1053 = vrot.lane.b32.xlu1 %v1049_v13, %s4079_s30  ;;  %1051 = vrot.lane.b32.xlu0 %v1050_v20, %s4079_s30  ;;  %v3377_v20 = vld [vmem:[%s5634_s2 + $0x1] ss:$0 sm:$0xff]  ;;  %s4085_s2 = smov 48  }
 0x486   :  { %v1023_v21 = vpop.permute.xlu1 %1022  ;;  %v1021_v22 = vpop.permute.xlu0 %1020 }
 0x487   :  { %1027 = vst.msk [vmem:[#allocation2 + $0x10] sm:$0xff] %vm747_vm5, %v1023_v21  ;;  %1026 = vst.msk [vmem:[#allocation2] sm:$0xff] %vm747_vm5, %v1021_v22  ;;  %v3393_v22 = vld [vmem:[%s5636_s7 + $0x1] ss:$0 sm:$0xff] }
 0x48a   :  { %v1031_v23 = vpop.permute.xlu1 %1030  ;;  %v1029_v24 = vpop.permute.xlu0 %1028 }
 0x48b   :  { %1035 = vst.msk [vmem:[#allocation2 + $0x30] sm:$0xff] %vm747_vm5, %v1031_v23  ;;  %1034 = vst.msk [vmem:[#allocation2 + $0x20] sm:$0xff] %vm747_vm5, %v1029_v24 }
 0x48e   :  { %v1042_v25 = vpop.permute.xlu1 %1041  ;;  %v1040_v26 = vpop.permute.xlu0 %1039 }
 0x48f   :  { %1047 = vst.msk [vmem:[#allocation2 + $0x10] sm:$0x7f] %vm1046_vm3, %v1042_v25 }
 0x490   :  { %1045 = vst.msk [vmem:[#allocation2] sm:$0xff] %vm766_vm15, %v1040_v26 }
 0x492   :  { %v1054_v27 = vpop.permute.xlu1 %1053  ;;  %v1052_v28 = vpop.permute.xlu0 %1051 }
 0x493   :  { %1058 = vst.msk [vmem:[#allocation2 + $0x30] sm:$0x7f] %vm1046_vm3, %v1054_v27  ;;  %v325_v27 = vadd.f32 %v3377_v20, %v4614_v60  ;;  %vm5641_vm3 = vcmask 1044480  }
 0x494   :  { %1057 = vst.msk [vmem:[#allocation2 + $0x20] sm:$0xff] %vm766_vm15, %v1052_v28  ;;  %v326_v28 = vadd.f32 %v3377_v20, %v4616_v61 }
 0x496   :  { %v1060_v30 = vld [vmem:[#allocation2 + $0x10] sm:$0xff] }
 0x497   :  { %v1059_v29 = vld [vmem:[#allocation2] sm:$0xff]  ;;  %1387 = vst [vmem:[#allocation2 + $0x10] sm:$0xff] %v4076_v0 }
 0x498   :  { %3574 = vmatprep.mubr.msk.f32.mxu1 %vm1066_vm8, %v1059_v29  ;;  %1385 = vst [vmem:[#allocation2] sm:$0xff] %v4076_v0  ;;  %v327_v29 = vadd.f32 %v3377_v20, %v4618_v62 }
 0x499   :  { %3575 = vmatmul.mubr.msk.f32.vlgmr.msra.gmra.mrb[6].mxu1 %vm1066_vm8, %v1060_v30  ;;  %v328_v30 = vadd.f32 %v3377_v20, %v4620_v63 }
 0x49a   :  { %v1062_v32 = vld [vmem:[#allocation2 + $0x30] sm:$0xff] }
 0x49b   :  { %v1061_v31 = vld [vmem:[#allocation2 + $0x20] sm:$0xff]  ;;  %1391 = vst [vmem:[#allocation2 + $0x30] sm:$0xff] %v4076_v0 }
 0x49c   :  { %3577 = vmatprep.mubr.msk.f32.mxu1 %vm1066_vm8, %v1061_v31  ;;  %1389 = vst [vmem:[#allocation2 + $0x20] sm:$0xff] %v4076_v0 }
 0x49d   :  { %3578 = vmatmul.mubr.msk.f32.gmra.mrb[8].mxu1 %vm1066_vm8, %v1062_v32  ;;  %vm5642_vm8 = vmmov %vm5641_vm3 }
 0x56c   :  { %v3576_v34 = vpop.f32.mrb[6].mxu1 }
 0x56d   :  { %v1165_v35 = vsel %vm270_vm1, %v3576_v34, 0.0  ;;  %v1145_v36 = vpop.f32.mrb[7].mxu1 }
 0x56e   :  { %v1164_v37 = vsel %vm270_vm1, %v1145_v36, 0.0 }
 0x56f   :  { %v1166_v38 = vadd.f32 %v1165_v35, %v1164_v37 }
 0x570   :  { %v3579_v39 = vpop.f32.mrb[8].mxu1 }
 0x571   :  { %v1155_v2 = vpop.f32.mrb[9].mxu1  ;;  %v1169_v41 = vsel %vm270_vm1, %v3579_v39, 0.0 }
 0x572   :  { %v1167_v40 = vsel %vm270_vm1, %v1155_v2, 0.0 }
 0x573   :  { %v1168_v14 = vadd.f32 %v1167_v40, %v1166_v38 }
 0x575   :  { %v1170_v42 = vadd.f32 %v1169_v41, %v1168_v14 }
 0x577   :  { %v1171_v15 = vrot.slane %v1170_v42, 4 }
 0x579   :  { %v1172_v43 = vadd.f32 %v1171_v15, %v1170_v42 }
 0x57b   :  { %v1173_v44 = vrot.slane %v1172_v43, 2 }
 0x57d   :  { %v1174_v45 = vadd.f32 %v1173_v44, %v1172_v43 }
 0x57f   :  { %v1175_v46 = vrot.slane %v1174_v45, 1 }
 0x581   :  { %v1176_v47 = vadd.f32 %v1175_v46, %v1174_v45 }
 0x583   :  { %v1177_v48 = vmul.f32 0.03125, %v1176_v47 }
 0x585   :  { %v1178_v49 = vsub.f32 %v1145_v36, %v1177_v48  ;;  %v1179_v50 = vsub.f32 %v3576_v34, %v1177_v48  ;;  %v1180_v51 = vsub.f32 %v1155_v2, %v1177_v48  ;;  %v1181_v52 = vsub.f32 %v3579_v39, %v1177_v48 }
 0x587   :  { %v1182_v53 = vmul.f32 %v1178_v49, %v1178_v49  ;;  %v1183_v54 = vmul.f32 %v1179_v50, %v1179_v50  ;;  %v1184_v55 = vmul.f32 %v1180_v51, %v1180_v51  ;;  %v1185_v56 = vmul.f32 %v1181_v52, %v1181_v52 }
 0x589   :  { %v1186_v57 = vsel %vm270_vm1, %v1182_v53, 0.0  ;;  %v1187_v58 = vsel %vm270_vm1, %v1183_v54, 0.0  ;;  %v1189_v1 = vsel %vm270_vm1, %v1184_v55, 0.0  ;;  %v1191_v4 = vsel %vm270_vm1, %v1185_v56, 0.0 }
 0x58a   :  { %v1188_v59 = vadd.f32 %v1187_v58, %v1186_v57 }
 0x58c   :  { %v1190_v3 = vadd.f32 %v1189_v1, %v1188_v59 }
 0x58e   :  { %v1192_v5 = vadd.f32 %v1191_v4, %v1190_v3 }
 0x590   :  { %v1193_v6 = vrot.slane %v1192_v5, 4 }
 0x592   :  { %v1194_v7 = vadd.f32 %v1193_v6, %v1192_v5 }
 0x594   :  { %v1195_v8 = vrot.slane %v1194_v7, 2 }
 0x596   :  { %v1196_v9 = vadd.f32 %v1195_v8, %v1194_v7 }
 0x598   :  { %v1197_v11 = vrot.slane %v1196_v9, 1 }
 0x59a   :  { %v1198_v12 = vadd.f32 %v1197_v11, %v1196_v9 }
 0x59c   :  { %v1199_v13 = vmul.f32 0.03125, %v1198_v12 }
 0x59e   :  { %v1201_v16 = vadd.f32 1e-05, %v1199_v13 }
 0x5a0   :  { %3886 = vrsqrt.f32 %v1201_v16 }
 0x5aa   :  { %v3887_v18 = vpop.eup %3886 }
 0x5ab   :  { %v1203_v19 = vmul.f32 %v3887_v18, %v1200_v17 }
 0x5ad   :  { %v1207_v21 = vrot.slane %v1203_v19, %v4537_v10 }
 0x5af   :  { %v1208_v23 = vmul.f32 %v1207_v21, %v1178_v49  ;;  %v1209_v24 = vmul.f32 %v1207_v21, %v1179_v50  ;;  %v1210_v25 = vmul.f32 %v1207_v21, %v1180_v51  ;;  %v1211_v26 = vmul.f32 %v1207_v21, %v1181_v52 }
 0x5b1   :  { %v1217_v31 = vadd.f32 %v3393_v22, %v1208_v23  ;;  %v1218_v32 = vadd.f32 %v3393_v22, %v1209_v24  ;;  %v1219_v33 = vadd.f32 %v3393_v22, %v1210_v25  ;;  %v1220_v34 = vadd.f32 %v3393_v22, %v1211_v26  ;;  %v1587_v23 = vld [vmem:[#allocation8] sm:$0xff]  ;;  %v1588_v24 = vld [vmem:[#allocation8 + $0x8] sm:$0xff]  ;;  %v1589_v26 = vld [vmem:[#allocation8 + $0x10] sm:$0xff] }
 0x5b2   :  { %v3716_v25 = vpack.c.bf16 %v1588_v24, %v1587_v23 }
 0x5b3   :  { %v1221_v35 = vadd.f32 %v1217_v31, %v325_v27  ;;  %v1222_v36 = vadd.f32 %v1218_v32, %v326_v28  ;;  %v1223_v37 = vadd.f32 %v1219_v33, %v327_v29  ;;  %v1224_v38 = vadd.f32 %v1220_v34, %v328_v30  ;;  %v1590_v27 = vld [vmem:[#allocation8 + $0x18] sm:$0xff]  ;;  %v1591_v29 = vld [vmem:[#allocation8 + $0x20] sm:$0xff]  ;;  %v1592_v30 = vld [vmem:[#allocation8 + $0x28] sm:$0xff] }
 0x5b4   :  { %3717 = vmatprep.subr.bf16.mxu1 %v3716_v25  ;;  %v3720_v28 = vpack.c.bf16 %v1590_v27, %v1589_v26  ;;  %v3724_v31 = vpack.c.bf16 %v1592_v30, %v1591_v29  ;;  %v1593_v32 = vld [vmem:[#allocation8 + $0x30] sm:$0xff]  ;;  %v1594_v33 = vld [vmem:[#allocation8 + $0x38] sm:$0xff] }
 0x5b5   :  { %v4688_v39 = vmax.f32 %v1221_v35, 0.0  ;;  %v4690_v2 = vmax.f32 %v1222_v36, 0.0  ;;  %v1227_v40 = vmax.f32 %v1223_v37, 0.0  ;;  %v4692_v60 = vmax.f32 %v1224_v38, 0.0  ;;  %3719 = vmatpush3.bf16.msra.mxu1 %v3716_v25  ;;  %v1595_v35 = vld [vmem:[#allocation8 + $0x40] sm:$0xff] }
 0x5b6   :  { %3721 = vmatprep.subr.bf16.mxu1 %v3720_v28  ;;  %v3728_v34 = vpack.c.bf16 %v1594_v33, %v1593_v32 }
 0x5b7   :  { %1485 = vrot.lane.b32.xlu1 %v1227_v40, %s4083_s27  ;;  %1477 = vrot.lane.b32.xlu0 %v4688_v39, %s4083_s27  ;;  %v1420_v61 = vrot.slane %v1227_v40, 5  ;;  %v1443_v62 = vrot.slane %v1227_v40, 6  ;;  %v1466_v63 = vrot.slane %v1227_v40, 7  ;;  %v1408_v14 = vrot.slane %v4688_v39, 5 }
 0x5b8   :  { %3582 = vmatprep.mubr.msk.f32.mxu0 %vm270_vm1, %v4688_v39  ;;  %v1507_v41 = vrot.slane %v4692_v60, 1  ;;  %v1431_v42 = vrot.slane %v4688_v39, 6  ;;  %v1531_v15 = vrot.slane %v4692_v60, 2  ;;  %v1454_v43 = vrot.slane %v4688_v39, 7 }
 0x5b9   :  { %3583 = vmatmul.mubr.msk.f32.vlgmr.msra.gmra.mrb[6].mxu0 %vm270_vm1, %v4690_v2  ;;  %v1555_v44 = vrot.slane %v4692_v60, 3  ;;  %v1494_v45 = vrot.slane %v4690_v2, 1  ;;  %v1518_v46 = vrot.slane %v4690_v2, 2  ;;  %v1409_v47 = vrot.slane %v4690_v2, 5  ;;  %3723 = vmatpush3.bf16.msra.mxu1 %v3720_v28 }
 0x5ba   :  { %3585 = vmatprep.mubr.msk.f32.mxu0 %vm270_vm1, %v1227_v40  ;;  %v1542_v48 = vrot.slane %v4690_v2, 3  ;;  %v1432_v49 = vrot.slane %v4690_v2, 6  ;;  %v1394_v50 = vrot.slane %v4690_v2, 4  ;;  %v1455_v51 = vrot.slane %v4690_v2, 7  ;;  %3725 = vmatprep.subr.bf16.mxu1 %v3724_v31 }
 0x5bb   :  { %1423 = vrot.lane.b32.xlu1 %v1420_v61, %s4071_s0  ;;  %1479 = vrot.lane.b32.xlu0 %v4690_v2, %s4083_s27  ;;  %v1410_v52 = vsel %vm5637_vm9, %v1408_v14, %v1409_v47  ;;  %v1421_v53 = vrot.slane %v4692_v60, 5  ;;  %v1493_v54 = vrot.slane %v4688_v39, 1  ;;  %v1444_v55 = vrot.slane %v4692_v60, 6 }
 0x5bc   :  { %v1433_v56 = vsel %vm5638_vm12, %v1431_v42, %v1432_v49  ;;  %v1456_v57 = vsel %vm403_vm2, %v1454_v43, %v1455_v51  ;;  %v1517_v58 = vrot.slane %v4688_v39, 2  ;;  %v1467_v59 = vrot.slane %v4692_v60, 7 }
 0x5bd   :  { %3586 = vmatmul.mubr.msk.f32.gmra.mrb[8].mxu0 %vm270_vm1, %v4692_v60  ;;  %v1422_v1 = vsel %vm5639_vm13, %v1420_v61, %v1421_v53  ;;  %v1495_v3 = vsel %vm445_vm6, %v1493_v54, %v1494_v45  ;;  %v1445_v4 = vsel %vm5640_vm0, %v1443_v62, %v1444_v55  ;;  %v1541_v5 = vrot.slane %v4688_v39, 3  ;;  %3727 = vmatpush3.bf16.msra.mxu1 %v3724_v31 }
 0x5be   :  { %v1519_v6 = vsel %vm470_vm7, %v1517_v58, %v1518_v46  ;;  %v1468_v7 = vsel %vm403_vm2, %v1466_v63, %v1467_v59  ;;  %v1530_v8 = vrot.slane %v1227_v40, 2  ;;  %v1393_v9 = vrot.slane %v4688_v39, 4  ;;  %3729 = vmatprep.subr.bf16.mxu1 %v3728_v34 }
 0x5bf   :  { %1446 = vrot.lane.b32.xlu1 %v1443_v62, %s4079_s30  ;;  %1487 = vrot.lane.b32.xlu0 %v4692_v60, %s4083_s27  ;;  %v1543_v11 = vsel %vm5641_vm3, %v1541_v5, %v1542_v48  ;;  %v1554_v12 = vrot.slane %v1227_v40, 3  ;;  %v1506_v13 = vrot.slane %v1227_v40, 1  ;;  %v1401_v16 = vrot.slane %v1227_v40, 4 }
 0x5c0   :  { %v1532_v17 = vsel %vm470_vm7, %v1530_v8, %v1531_v15  ;;  %v1395_v18 = vsel %vm181_vm4, %v1393_v9, %v1394_v50  ;;  %v1402_v19 = vrot.slane %v4692_v60, 4  ;;  %1399 = vst.msk [vmem:[#allocation2] sm:$0xf0] %vm1398_vm14, %v1393_v9  ;;  %vm1463_vm9 = vcmask 261313  }
 0x5c1   :  { %1400 = vst.msk [vmem:[#allocation2 + $0x10] sm:$0xff] %vm270_vm1, %v1395_v18  ;;  %v1556_v20 = vsel %vm5642_vm8, %v1554_v12, %v1555_v44  ;;  %v1508_v21 = vsel %vm445_vm6, %v1506_v13, %v1507_v41  ;;  %3731 = vmatpush3.bf16.msra.mxu1 %v3728_v34  ;;  %vm1504_vm12 = vcmask 391488   ;;  %vm1528_vm13 = vcmask 456064  }
 0x5c2   :  { %1406 = vst.msk [vmem:[#allocation2 + $0x20] sm:$0xf0] %vm1398_vm14, %v1401_v16  ;;  %v1403_v22 = vsel %vm181_vm4, %v1401_v16, %v1402_v19  ;;  %3604 = vmatprep.subr.mxu1 %v1595_v35  ;;  %vm1440_vm14 = vcmask 195714   ;;  %vm1502_vm0 = vcmask 392512   ;;  %vm1552_vm3 = vcmask 520640  }
 0x5c3   :  { %1469 = vrot.lane.b32.xlu1 %v1466_v63, %s4081_s29  ;;  %1411 = vrot.lane.b32.xlu0 %v1408_v14, %s4071_s0  ;;  %1407 = vst.msk [vmem:[#allocation2 + $0x30] sm:$0xff] %vm270_vm1, %v1403_v22  ;;  %vm1417_vm1 = vcmask 130115   ;;  %vm1573_vm8 = vcmask 585216  }
 0x5c5   :  { %3605 = vmatpush3.msra.mxu1 %v1595_v35 }
 0x5c7   :  { %1511 = vrot.lane.b32.xlu1 %v1507_v41, %s4084_s23  ;;  %1434 = vrot.lane.b32.xlu0 %v1431_v42, %s4079_s30 }
 0x5cb   :  { %1535 = vrot.lane.b32.xlu1 %v1531_v15, %s4085_s2  ;;  %1457 = vrot.lane.b32.xlu0 %v1454_v43, %s4081_s29 }
 0x5cf   :  { %1559 = vrot.lane.b32.xlu1 %v1555_v44, %s4086_s4  ;;  %1498 = vrot.lane.b32.xlu0 %v1494_v45, %s4084_s23 }
 0x5d3   :  { %1522 = vrot.lane.b32.xlu0 %v1518_v46, %s4085_s2  ;;  %1413 = vrot.lane.b32.xlu1 %v1410_v52, %s4071_s0 }
 0x5d7   :  { %1546 = vrot.lane.b32.xlu0 %v1542_v48, %s4086_s4  ;;  %1436 = vrot.lane.b32.xlu1 %v1433_v56, %s4079_s30 }
 0x5db   :  { %1567 = vrot.lane.b32.xlu0 %v1394_v50, %s4087_s3  ;;  %1459 = vrot.lane.b32.xlu1 %v1456_v57, %s4081_s29 }
 0x5df   :  { %1425 = vrot.lane.b32.xlu0 %v1422_v1, %s4071_s0  ;;  %1496 = vrot.lane.b32.xlu1 %v1495_v3, %s4084_s23 }
 0x5e3   :  { %1448 = vrot.lane.b32.xlu0 %v1445_v4, %s4079_s30  ;;  %1520 = vrot.lane.b32.xlu1 %v1519_v6, %s4085_s2 }
 0x5e7   :  { %1471 = vrot.lane.b32.xlu0 %v1468_v7, %s4081_s29  ;;  %1544 = vrot.lane.b32.xlu1 %v1543_v11, %s4086_s4 }
 0x5eb   :  { %1533 = vrot.lane.b32.xlu0 %v1532_v17, %s4085_s2  ;;  %1565 = vrot.lane.b32.xlu1 %v1395_v18, %s4087_s3 }
 0x5ef   :  { %1557 = vrot.lane.b32.xlu0 %v1556_v20, %s4086_s4  ;;  %1509 = vrot.lane.b32.xlu1 %v1508_v21, %s4084_s23  ;;  %s4090_s4 = smov 96  }
 0x5f3   :  { %1575 = vrot.lane.b32.xlu0 %v1403_v22, %s4087_s3  ;;  %1577 = vrot.lane.b32.xlu1 %v1402_v19, %s4087_s3 }
 0x629   :  { %v1486_v36 = vpop.permute.xlu1 %1485  ;;  %v1478_v37 = vpop.permute.xlu0 %1477 }
 0x62d   :  { %v1424_v38 = vpop.permute.xlu1 %1423  ;;  %v1480_v39 = vpop.permute.xlu0 %1479 }
 0x62e   :  { %1429 = vst.msk [vmem:[#allocation2 + $0x20] sm:$0xf8] %vm1417_vm1, %v1424_v38 }
 0x631   :  { %v1447_v2 = vpop.permute.xlu1 %1446  ;;  %v1488_v40 = vpop.permute.xlu0 %1487 }
 0x632   :  { %1452 = vst.msk [vmem:[#allocation2 + $0x20] sm:$0xfc] %vm1440_vm14, %v1447_v2 }
 0x635   :  { %v1470_v60 = vpop.permute.xlu1 %1469  ;;  %v1412_v61 = vpop.permute.xlu0 %1411 }
 0x636   :  { %1475 = vst.msk [vmem:[#allocation2 + $0x20] sm:$0xfe] %vm1463_vm9, %v1470_v60 }
 0x637   :  { %1418 = vst.msk [vmem:[#allocation2] sm:$0xf8] %vm1417_vm1, %v1412_v61  ;;  %vm1526_vm1 = vcmask 458112  }
 0x638   :  { %1491 = vst.msk [vmem:[#allocation2 + $0x20] sm:$0xff] %vm810_vm11, %v1486_v36 }
 0x639   :  { %v1512_v62 = vpop.permute.xlu1 %1511  ;;  %v1435_v63 = vpop.permute.xlu0 %1434 }
 0x63a   :  { %1441 = vst.msk [vmem:[#allocation2] sm:$0xfc] %vm1440_vm14, %v1435_v63  ;;  %vm1550_vm14 = vcmask 523712  }
 0x63d   :  { %v1536_v14 = vpop.permute.xlu1 %1535  ;;  %v1458_v41 = vpop.permute.xlu0 %1457 }
 0x63e   :  { %1464 = vst.msk [vmem:[#allocation2] sm:$0xfe] %vm1463_vm9, %v1458_v41  ;;  %vm5643_vm9 = vcmask 1041408  }
 0x63f   :  { %1483 = vst.msk [vmem:[#allocation2] sm:$0xff] %vm810_vm11, %v1478_v37 }
 0x641   :  { %v1560_v42 = vpop.permute.xlu1 %1559  ;;  %v1499_v15 = vpop.permute.xlu0 %1498 }
 0x645   :  { %v1523_v43 = vpop.permute.xlu0 %1522  ;;  %v1414_v44 = vpop.permute.xlu1 %1413 }
 0x646   :  { %1419 = vst.msk [vmem:[#allocation2 + $0x10] sm:$0xff] %vm747_vm5, %v1414_v44  ;;  %v1364_v44 = vld [vmem:[%s5589_s16] sm:$0x1] }
 0x649   :  { %v1547_v45 = vpop.permute.xlu0 %1546  ;;  %v1437_v46 = vpop.permute.xlu1 %1436 }
 0x64a   :  { %1442 = vst.msk [vmem:[#allocation2 + $0x10] sm:$0xff] %vm766_vm15, %v1437_v46 }
 0x64d   :  { %v1568_v47 = vpop.permute.xlu0 %1567  ;;  %v1460_v48 = vpop.permute.xlu1 %1459 }
 0x64e   :  { %1465 = vst.msk [vmem:[#allocation2 + $0x10] sm:$0xff] %vm786_vm10, %v1460_v48 }
 0x64f   :  { %1484 = vst.msk [vmem:[#allocation2 + $0x10] sm:$0xff] %vm810_vm11, %v1480_v39 }
 0x650   :  { %1505 = vst.msk [vmem:[#allocation2 + $0x10] sm:$0x7f] %vm1504_vm12, %v1499_v15 }
 0x651   :  { %1529 = vst.msk [vmem:[#allocation2 + $0x10] sm:$0x3f] %vm1528_vm13, %v1523_v43  ;;  %v1426_v49 = vpop.permute.xlu0 %1425  ;;  %v1497_v50 = vpop.permute.xlu1 %1496 }
 0x652   :  { %1430 = vst.msk [vmem:[#allocation2 + $0x30] sm:$0xff] %vm747_vm5, %v1426_v49  ;;  %vm1571_vm5 = vcmask 589312  }
 0x653   :  { %1503 = vst.msk [vmem:[#allocation2] sm:$0xff] %vm1502_vm0, %v1497_v50 }
 0x654   :  { %1553 = vst.msk [vmem:[#allocation2 + $0x10] sm:$0x1f] %vm1552_vm3, %v1547_v45 }
 0x655   :  { %1574 = vst.msk [vmem:[#allocation2 + $0x10] sm:$0xf] %vm1573_vm8, %v1568_v47  ;;  %v1449_v51 = vpop.permute.xlu0 %1448  ;;  %v1521_v52 = vpop.permute.xlu1 %1520 }
 0x656   :  { %1453 = vst.msk [vmem:[#allocation2 + $0x30] sm:$0xff] %vm766_vm15, %v1449_v51  ;;  %vm1596_vm15 = vcmask 588800  }
 0x657   :  { %1527 = vst.msk [vmem:[#allocation2] sm:$0xff] %vm1526_vm1, %v1521_v52 }
 0x659   :  { %v1472_v53 = vpop.permute.xlu0 %1471  ;;  %v1545_v54 = vpop.permute.xlu1 %1544 }
 0x65a   :  { %1476 = vst.msk [vmem:[#allocation2 + $0x30] sm:$0xff] %vm786_vm10, %v1472_v53  ;;  %vm1327_vm10 = vcmask 130048  }
 0x65b   :  { %1551 = vst.msk [vmem:[#allocation2] sm:$0xff] %vm1550_vm14, %v1545_v54 }
 0x65c   :  { %v1584_v55 = vld [vmem:[#allocation2 + $0x10] sm:$0xff]  ;;  %1492 = vst.msk [vmem:[#allocation2 + $0x30] sm:$0xff] %vm810_vm11, %v1488_v40  ;;  %vm1770_vm11 = vcmask 130050  }
 0x65d   :  { %1757 = vst [vmem:[#allocation2 + $0x10] sm:$0xff] %v4076_v0  ;;  %1516 = vst.msk [vmem:[#allocation2 + $0x30] sm:$0x7f] %vm1504_vm12, %v1512_v62  ;;  %v1534_v56 = vpop.permute.xlu0 %1533  ;;  %v1566_v57 = vpop.permute.xlu1 %1565 }
 0x65e   :  { %1540 = vst.msk [vmem:[#allocation2 + $0x30] sm:$0x3f] %vm1528_vm13, %v1536_v14  ;;  %vm5644_vm12 = vmmov %vm5643_vm9  ;;  %vm1791_vm13 = vcmask 261249  }
 0x65f   :  { %1572 = vst.msk [vmem:[#allocation2] sm:$0xff] %vm1571_vm5, %v1566_v57 }
 0x660   :  { %1564 = vst.msk [vmem:[#allocation2 + $0x30] sm:$0x1f] %vm1552_vm3, %v1560_v42  ;;  %vm1832_vm3 = vcmask 523648  }
 0x661   :  { %v1558_v58 = vpop.permute.xlu0 %1557  ;;  %v1510_v59 = vpop.permute.xlu1 %1509 }
 0x662   :  { %1515 = vst.msk [vmem:[#allocation2 + $0x20] sm:$0xff] %vm1502_vm0, %v1510_v59  ;;  %vm1812_vm0 = vcmask 392448  }
 0x663   :  { %1539 = vst.msk [vmem:[#allocation2 + $0x20] sm:$0xff] %vm1526_vm1, %v1534_v56  ;;  %vm1793_vm1 = vcmask 261248  }
 0x664   :  { %1563 = vst.msk [vmem:[#allocation2 + $0x20] sm:$0xff] %vm1550_vm14, %v1558_v58  ;;  %vm1834_vm14 = vcmask 522624  }
 0x665   :  { %v1576_v1 = vpop.permute.xlu0 %1575  ;;  %v1578_v3 = vpop.permute.xlu1 %1577 }
 0x666   :  { %v1583_v4 = vld [vmem:[#allocation2] sm:$0xff]  ;;  %1581 = vst.msk [vmem:[#allocation2 + $0x20] sm:$0xff] %vm1571_vm5, %v1576_v1  ;;  %vm1858_vm5 = vcmask 652800  }
 0x667   :  { %1582 = vst.msk [vmem:[#allocation2 + $0x30] sm:$0xf] %vm1573_vm8, %v1578_v3  ;;  %3606 = vmatprep.mubr.msk.f32.mxu1 %vm1596_vm15, %v1583_v4  ;;  %1755 = vst [vmem:[#allocation2] sm:$0xff] %v4076_v0  ;;  %vm1856_vm8 = vcmask 654848  }
 0x668   :  { %3607 = vmatmul.mubr.msk.f32.vlgmr.msra.gmra.mrb[10].mxu1 %vm1596_vm15, %v1584_v55 }
 0x66d   :  { %v1585_v5 = vld [vmem:[#allocation2 + $0x20] sm:$0xff] }
 0x66e   :  { %v1586_v6 = vld [vmem:[#allocation2 + $0x30] sm:$0xff]  ;;  %3609 = vmatprep.mubr.msk.f32.mxu1 %vm1596_vm15, %v1585_v5  ;;  %1759 = vst [vmem:[#allocation2 + $0x20] sm:$0xff] %v4076_v0 }
 0x66f   :  { %1761 = vst [vmem:[#allocation2 + $0x30] sm:$0xff] %v4076_v0  ;;  %3610 = vmatmul.mubr.msk.f32.gmra.mrb[12].mxu1 %vm1596_vm15, %v1586_v6  ;;  %vm1885_vm15 = vcmask 654336  }
 0x68c   :  { %v3584_v7 = vpop.f32.mrb[6].mxu0 }
 0x68d   :  { %v1329_v8 = vsel %vm1327_vm10, %v3584_v7, 0.0  ;;  %v1308_v9 = vpop.f32.mrb[7].mxu0 }
 0x68e   :  { %v1328_v11 = vsel %vm1327_vm10, %v1308_v9, 0.0 }
 0x68f   :  { %v1330_v12 = vadd.f32 %v1329_v8, %v1328_v11 }
 0x690   :  { %v3587_v13 = vpop.f32.mrb[8].mxu0 }
 0x691   :  { %v1318_v16 = vpop.f32.mrb[9].mxu0  ;;  %v1333_v19 = vsel %vm1327_vm10, %v3587_v13, 0.0 }
 0x692   :  { %v1331_v17 = vsel %vm1327_vm10, %v1318_v16, 0.0 }
 0x693   :  { %v1332_v18 = vadd.f32 %v1331_v17, %v1330_v12 }
 0x695   :  { %v1334_v20 = vadd.f32 %v1333_v19, %v1332_v18 }
 0x697   :  { %v1335_v21 = vrot.slane %v1334_v20, 4 }
 0x699   :  { %v1336_v22 = vadd.f32 %v1335_v21, %v1334_v20 }
 0x69b   :  { %v1337_v23 = vrot.slane %v1336_v22, 2 }
 0x69d   :  { %v1338_v24 = vadd.f32 %v1337_v23, %v1336_v22 }
 0x69f   :  { %v1339_v25 = vrot.slane %v1338_v24, 1 }
 0x6a1   :  { %v1340_v26 = vadd.f32 %v1339_v25, %v1338_v24 }
 0x6a3   :  { %v1341_v27 = vmul.f32 0.03125, %v1340_v26 }
 0x6a5   :  { %v1342_v28 = vsub.f32 %v1308_v9, %v1341_v27  ;;  %v1343_v29 = vsub.f32 %v3584_v7, %v1341_v27  ;;  %v1344_v30 = vsub.f32 %v1318_v16, %v1341_v27  ;;  %v1345_v31 = vsub.f32 %v3587_v13, %v1341_v27 }
 0x6a7   :  { %v1346_v32 = vmul.f32 %v1342_v28, %v1342_v28  ;;  %v1347_v33 = vmul.f32 %v1343_v29, %v1343_v29  ;;  %v1348_v34 = vmul.f32 %v1344_v30, %v1344_v30  ;;  %v1349_v35 = vmul.f32 %v1345_v31, %v1345_v31 }
 0x6a9   :  { %v1350_v36 = vsel %vm1327_vm10, %v1346_v32, 0.0  ;;  %v1351_v37 = vsel %vm1327_vm10, %v1347_v33, 0.0  ;;  %v1353_v39 = vsel %vm1327_vm10, %v1348_v34, 0.0  ;;  %v1355_v40 = vsel %vm1327_vm10, %v1349_v35, 0.0 }
 0x6aa   :  { %v1352_v38 = vadd.f32 %v1351_v37, %v1350_v36 }
 0x6ac   :  { %v1354_v2 = vadd.f32 %v1353_v39, %v1352_v38  ;;  %v1730_v38 = vld [vmem:[%s5583_s10] sm:$0x1] }
 0x6ae   :  { %v1356_v60 = vadd.f32 %v1355_v40, %v1354_v2 }
 0x6b0   :  { %v1357_v61 = vrot.slane %v1356_v60, 4 }
 0x6b2   :  { %v1358_v62 = vadd.f32 %v1357_v61, %v1356_v60  ;;  %v3403_v60 = vld [vmem:[%s5583_s10 + $0x1] ss:$0 sm:$0xff] }
 0x6b4   :  { %v1359_v63 = vrot.slane %v1358_v62, 2 }
 0x6b6   :  { %v1360_v14 = vadd.f32 %v1359_v63, %v1358_v62 }
 0x6b8   :  { %v1361_v41 = vrot.slane %v1360_v14, 1 }
 0x6ba   :  { %v1362_v42 = vadd.f32 %v1361_v41, %v1360_v14  ;;  %v1875_v41 = vld [vmem:[#allocation9] sm:$0xff] }
 0x6bc   :  { %v1363_v15 = vmul.f32 0.03125, %v1362_v42  ;;  %v1876_v42 = vld [vmem:[#allocation9 + $0x8] sm:$0xff] }
 0x6be   :  { %v1365_v43 = vadd.f32 1e-05, %v1363_v15 }
 0x6c0   :  { %3888 = vrsqrt.f32 %v1365_v43 }
 0x6ca   :  { %v3889_v45 = vpop.eup %3888 }
 0x6cb   :  { %v1367_v46 = vmul.f32 %v3889_v45, %v1364_v44 }
 0x6cd   :  { %v1371_v47 = vrot.slane %v1367_v46, %v4537_v10  ;;  %v3732_v46 = vpack.c.bf16 %v1876_v42, %v1875_v41 }
 0x6cf   :  { %v4817_v48 = vmul.f32 %v1371_v47, %v1342_v28  ;;  %v4819_v49 = vmul.f32 %v1371_v47, %v1343_v29  ;;  %v4821_v50 = vmul.f32 %v1371_v47, %v1344_v30  ;;  %v4823_v51 = vmul.f32 %v1371_v47, %v1345_v31  ;;  %3733 = vmatprep.subr.bf16.mxu0 %v3732_v46 }
 0x6d0   :  { %3735 = vmatpush3.bf16.msra.mxu0 %v3732_v46 }
 0x73b   :  { %v3608_v52 = vpop.f32.mrb[10].mxu1 }
 0x73c   :  { %v1695_v53 = vsel %vm1327_vm10, %v3608_v52, 0.0  ;;  %v1675_v54 = vpop.f32.mrb[11].mxu1 }
 0x73d   :  { %v1694_v55 = vsel %vm1327_vm10, %v1675_v54, 0.0 }
 0x73e   :  { %v1696_v56 = vadd.f32 %v1695_v53, %v1694_v55 }
 0x742   :  { %v3611_v57 = vpop.f32.mrb[12].mxu1 }
 0x743   :  { %v1685_v58 = vpop.f32.mrb[13].mxu1  ;;  %v1699_v3 = vsel %vm1327_vm10, %v3611_v57, 0.0 }
 0x744   :  { %v1697_v59 = vsel %vm1327_vm10, %v1685_v58, 0.0 }
 0x745   :  { %v1698_v1 = vadd.f32 %v1697_v59, %v1696_v56 }
 0x747   :  { %v1700_v4 = vadd.f32 %v1699_v3, %v1698_v1 }
 0x749   :  { %v1701_v5 = vrot.slane %v1700_v4, 4 }
 0x74b   :  { %v1702_v6 = vadd.f32 %v1701_v5, %v1700_v4 }
 0x74d   :  { %v1703_v7 = vrot.slane %v1702_v6, 2 }
 0x74f   :  { %v1704_v8 = vadd.f32 %v1703_v7, %v1702_v6 }
 0x751   :  { %v1705_v9 = vrot.slane %v1704_v8, 1 }
 0x753   :  { %v1706_v11 = vadd.f32 %v1705_v9, %v1704_v8 }
 0x755   :  { %v1707_v12 = vmul.f32 0.03125, %v1706_v11 }
 0x757   :  { %v1708_v13 = vsub.f32 %v1675_v54, %v1707_v12  ;;  %v1709_v16 = vsub.f32 %v3608_v52, %v1707_v12  ;;  %v1710_v17 = vsub.f32 %v1685_v58, %v1707_v12  ;;  %v1711_v18 = vsub.f32 %v3611_v57, %v1707_v12 }
 0x759   :  { %v1712_v19 = vmul.f32 %v1708_v13, %v1708_v13  ;;  %v1713_v20 = vmul.f32 %v1709_v16, %v1709_v16  ;;  %v1714_v21 = vmul.f32 %v1710_v17, %v1710_v17  ;;  %v1715_v22 = vmul.f32 %v1711_v18, %v1711_v18 }
 0x75b   :  { %v1716_v23 = vsel %vm1327_vm10, %v1712_v19, 0.0  ;;  %v1717_v24 = vsel %vm1327_vm10, %v1713_v20, 0.0  ;;  %v1719_v26 = vsel %vm1327_vm10, %v1714_v21, 0.0  ;;  %v1721_v28 = vsel %vm1327_vm10, %v1715_v22, 0.0 }
 0x75c   :  { %v1718_v25 = vadd.f32 %v1717_v24, %v1716_v23 }
 0x75e   :  { %v1720_v27 = vadd.f32 %v1719_v26, %v1718_v25 }
 0x760   :  { %v1722_v29 = vadd.f32 %v1721_v28, %v1720_v27  ;;  %v1879_v27 = vld [vmem:[#allocation9 + $0x20] sm:$0xff]  ;;  %v1880_v28 = vld [vmem:[#allocation9 + $0x28] sm:$0xff] }
 0x762   :  { %v1723_v30 = vrot.slane %v1722_v29, 4 }
 0x764   :  { %v1724_v31 = vadd.f32 %v1723_v30, %v1722_v29  ;;  %v3740_v29 = vpack.c.bf16 %v1880_v28, %v1879_v27  ;;  %v1881_v30 = vld [vmem:[#allocation9 + $0x30] sm:$0xff] }
 0x766   :  { %v1725_v32 = vrot.slane %v1724_v31, 2 }
 0x768   :  { %v1726_v33 = vadd.f32 %v1725_v32, %v1724_v31  ;;  %v1882_v31 = vld [vmem:[#allocation9 + $0x38] sm:$0xff] }
 0x769   :  { %v3744_v32 = vpack.c.bf16 %v1882_v31, %v1881_v30 }
 0x76a   :  { %v1727_v34 = vrot.slane %v1726_v33, 1 }
 0x76c   :  { %v1728_v35 = vadd.f32 %v1727_v34, %v1726_v33  ;;  %v1883_v33 = vld [vmem:[#allocation9 + $0x40] sm:$0xff]  ;;  %v1884_v34 = vld [vmem:[#allocation9 + $0x48] sm:$0xff] }
 0x76e   :  { %v1729_v36 = vmul.f32 0.03125, %v1728_v35  ;;  %v3748_v35 = vpack.c.bf16 %v1884_v34, %v1883_v33 }
 0x770   :  { %v1731_v37 = vadd.f32 1e-05, %v1729_v36 }
 0x772   :  { %3890 = vrsqrt.f32 %v1731_v37 }
 0x77c   :  { %v3891_v39 = vpop.eup %3890 }
 0x77d   :  { %v1733_v2 = vmul.f32 %v3891_v39, %v1730_v38 }
 0x77f   :  { %v1737_v40 = vrot.slane %v1733_v2, %v4537_v10 }
 0x781   :  { %v1740_v61 = vmul.f32 %v1737_v40, %v1710_v17  ;;  %v1739_v62 = vmul.f32 %v1737_v40, %v1709_v16  ;;  %v1738_v63 = vmul.f32 %v1737_v40, %v1708_v13  ;;  %v1741_v14 = vmul.f32 %v1737_v40, %v1711_v18  ;;  %v1877_v16 = vld [vmem:[#allocation9 + $0x10] sm:$0xff]  ;;  %v1878_v17 = vld [vmem:[#allocation9 + $0x18] sm:$0xff] }
 0x782   :  { %v3736_v22 = vpack.c.bf16 %v1878_v17, %v1877_v16 }
 0x783   :  { %v1749_v15 = vadd.f32 %v3403_v60, %v1740_v61  ;;  %v1748_v43 = vadd.f32 %v3403_v60, %v1739_v62  ;;  %v1747_v44 = vadd.f32 %v3403_v60, %v1738_v63  ;;  %v1750_v45 = vadd.f32 %v3403_v60, %v1741_v14 }
 0x784   :  { %3737 = vmatprep.subr.bf16.mxu0 %v3736_v22 }
 0x785   :  { %v1753_v47 = vmax.f32 %v1749_v15, 0.0  ;;  %v1752_v52 = vmax.f32 %v1748_v43, 0.0  ;;  %v1751_v53 = vmax.f32 %v1747_v44, 0.0  ;;  %v4840_v54 = vmax.f32 %v1750_v45, 0.0  ;;  %3739 = vmatpush3.bf16.msra.mxu0 %v3736_v22 }
 0x786   :  { %3741 = vmatprep.subr.bf16.mxu0 %v3740_v29 }
 0x787   :  { %v1775_v55 = vrot.slane %v1753_v47, 6  ;;  %1808 = vrot.lane.b32.xlu1 %v1752_v52, %s4083_s27  ;;  %1806 = vrot.lane.b32.xlu0 %v1751_v53, %s4083_s27  ;;  %v1824_v56 = vrot.slane %v1752_v52, 1  ;;  %v1782_v57 = vrot.slane %v1751_v53, 7  ;;  %v1795_v58 = vrot.slane %v1753_v47, 7 }
 0x788   :  { %v1848_v59 = vrot.slane %v1752_v52, 2  ;;  %v1837_v1 = vrot.slane %v4840_v54, 1  ;;  %v1823_v3 = vrot.slane %v1751_v53, 1  ;;  %v1847_v4 = vrot.slane %v1751_v53, 2 }
 0x789   :  { %v1783_v5 = vrot.slane %v1752_v52, 7  ;;  %v1836_v6 = vrot.slane %v1753_v47, 1  ;;  %v1796_v7 = vrot.slane %v4840_v54, 7  ;;  %v1860_v8 = vrot.slane %v1753_v47, 2  ;;  %1780 = vst.msk [vmem:[#allocation2 + $0x20] sm:$0xfc] %vm1770_vm11, %v1775_v55  ;;  %3743 = vmatpush3.bf16.msra.mxu0 %v3740_v29 }
 0x78a   :  { %v1825_v9 = vsel %vm445_vm6, %v1823_v3, %v1824_v56  ;;  %v1849_v11 = vsel %vm470_vm7, %v1847_v4, %v1848_v59  ;;  %v1861_v12 = vrot.slane %v4840_v54, 2  ;;  %v1765_v13 = vrot.slane %v1751_v53, 6  ;;  %3745 = vmatprep.subr.bf16.mxu0 %v3744_v32 }
 0x78b   :  { %1817 = vrot.lane.b32.xlu1 %v4840_v54, %s4083_s27  ;;  %1815 = vrot.lane.b32.xlu0 %v1753_v47, %s4083_s27  ;;  %v1784_v18 = vsel %vm403_vm2, %v1782_v57, %v1783_v5  ;;  %v1838_v19 = vsel %vm445_vm6, %v1836_v6, %v1837_v1  ;;  %v1797_v20 = vsel %vm403_vm2, %v1795_v58, %v1796_v7  ;;  %v1766_v23 = vrot.slane %v1752_v52, 6 }
 0x78c   :  { %v1862_v21 = vsel %vm470_vm7, %v1860_v8, %v1861_v12  ;;  %1771 = vst.msk [vmem:[#allocation2] sm:$0xfc] %vm1770_vm11, %v1765_v13  ;;  %v1776_v24 = vrot.slane %v4840_v54, 6  ;;  %vm2059_vm11 = vcmask 130049  }
 0x78d   :  { %v1767_v25 = vsel %vm5643_vm9, %v1765_v13, %v1766_v23  ;;  %3747 = vmatpush3.bf16.msra.mxu0 %v3744_v32  ;;  %vm2097_vm9 = vcmask 391424  }
 0x78e   :  { %v1777_v26 = vsel %vm5644_vm12, %v1775_v55, %v1776_v24  ;;  %1772 = vst.msk [vmem:[#allocation2 + $0x10] sm:$0xff] %vm1327_vm10, %v1767_v25  ;;  %3749 = vmatprep.subr.bf16.mxu0 %v3748_v35  ;;  %vm2120_vm12 = vcmask 392192  }
 0x78f   :  { %1828 = vrot.lane.b32.xlu1 %v1824_v56, %s4085_s2  ;;  %1785 = vrot.lane.b32.xlu0 %v1782_v57, %s4079_s30  ;;  %1781 = vst.msk [vmem:[#allocation2 + $0x30] sm:$0xff] %vm1327_vm10, %v1777_v26 }
 0x791   :  { %3751 = vmatpush3.bf16.msra.mxu0 %v3748_v35 }
 0x793   :  { %1798 = vrot.lane.b32.xlu1 %v1795_v58, %s4079_s30  ;;  %1852 = vrot.lane.b32.xlu0 %v1848_v59, %s4087_s3 }
 0x797   :  { %1841 = vrot.lane.b32.xlu1 %v1837_v1, %s4085_s2  ;;  %1826 = vrot.lane.b32.xlu0 %v1825_v9, %s4085_s2 }
 0x79b   :  { %1850 = vrot.lane.b32.xlu0 %v1849_v11, %s4087_s3  ;;  %1787 = vrot.lane.b32.xlu1 %v1784_v18, %s4079_s30 }
 0x79f   :  { %1839 = vrot.lane.b32.xlu0 %v1838_v19, %s4085_s2  ;;  %1800 = vrot.lane.b32.xlu1 %v1797_v20, %s4079_s30 }
 0x7a3   :  { %1863 = vrot.lane.b32.xlu0 %v1862_v21, %s4087_s3  ;;  %1865 = vrot.lane.b32.xlu1 %v1861_v12, %s4087_s3 }
 0x7f9   :  { %v1809_v36 = vpop.permute.xlu1 %1808  ;;  %v1807_v37 = vpop.permute.xlu0 %1806 }
 0x7fd   :  { %v1818_v38 = vpop.permute.xlu1 %1817  ;;  %v1816_v39 = vpop.permute.xlu0 %1815 }
 0x801   :  { %v1829_v2 = vpop.permute.xlu1 %1828  ;;  %v1786_v40 = vpop.permute.xlu0 %1785 }
 0x802   :  { %1792 = vst.msk [vmem:[#allocation2] sm:$0xfe] %vm1791_vm13, %v1786_v40 }
 0x803   :  { %1813 = vst.msk [vmem:[#allocation2] sm:$0xff] %vm1812_vm0, %v1807_v37 }
 0x805   :  { %v1799_v60 = vpop.permute.xlu1 %1798  ;;  %v1853_v61 = vpop.permute.xlu0 %1852 }
 0x806   :  { %1804 = vst.msk [vmem:[#allocation2 + $0x20] sm:$0xfe] %vm1791_vm13, %v1799_v60  ;;  %v2114_v60 = vld [vmem:[#allocation11] sm:$0xff]  ;;  %vm330_vm13 = vcmask 261120  }
 0x807   :  { %1821 = vst.msk [vmem:[#allocation2 + $0x20] sm:$0xff] %vm1812_vm0, %v1816_v39  ;;  %v2019_v39 = vld [vmem:[%s5585_s12] sm:$0x1] }
 0x808   :  { %331 = vst.msk [vmem:[#allocation2 + $0x8] sm:$0xff] %vm330_vm13, %v4076_v0  ;;  %333 = vst.msk [vmem:[#allocation2 + $0x18] sm:$0xff] %vm330_vm13, %v4076_v0 }
 0x809   :  { %v1842_v62 = vpop.permute.xlu1 %1841  ;;  %v1827_v63 = vpop.permute.xlu0 %1826  ;;  %335 = vst.msk [vmem:[#allocation2 + $0x28] sm:$0xff] %vm330_vm13, %v4076_v0  ;;  %337 = vst.msk [vmem:[#allocation2 + $0x38] sm:$0xff] %vm330_vm13, %v4076_v0 }
 0x80a   :  { %1833 = vst.msk [vmem:[#allocation2] sm:$0xff] %vm1832_vm3, %v1827_v63 }
 0x80b   :  { %710 = vst.msk [vmem:[#allocation2 + $0x8] sm:$0xff] %vm330_vm13, %v4076_v0  ;;  %712 = vst.msk [vmem:[#allocation2 + $0x18] sm:$0xff] %vm330_vm13, %v4076_v0 }
 0x80c   :  { %714 = vst.msk [vmem:[#allocation2 + $0x28] sm:$0xff] %vm330_vm13, %v4076_v0  ;;  %716 = vst.msk [vmem:[#allocation2 + $0x38] sm:$0xff] %vm330_vm13, %v4076_v0 }
 0x80d   :  { %v1851_v14 = vpop.permute.xlu0 %1850  ;;  %v1788_v41 = vpop.permute.xlu1 %1787  ;;  %994 = vst.msk [vmem:[#allocation2 + $0x8] sm:$0xff] %vm330_vm13, %v4076_v0  ;;  %996 = vst.msk [vmem:[#allocation2 + $0x18] sm:$0xff] %vm330_vm13, %v4076_v0 }
 0x80e   :  { %1857 = vst.msk [vmem:[#allocation2] sm:$0xff] %vm1856_vm8, %v1851_v14  ;;  %v3408_v14 = vld [vmem:[%s5585_s12 + $0x1] ss:$0 sm:$0xff] }
 0x80f   :  { %1794 = vst.msk [vmem:[#allocation2 + $0x10] sm:$0xff] %vm1793_vm1, %v1788_v41 }
 0x810   :  { %1814 = vst.msk [vmem:[#allocation2 + $0x10] sm:$0xff] %vm1812_vm0, %v1809_v36 }
 0x811   :  { %1835 = vst.msk [vmem:[#allocation2 + $0x10] sm:$0x7f] %vm1834_vm14, %v1829_v2  ;;  %v1840_v42 = vpop.permute.xlu0 %1839  ;;  %v1801_v15 = vpop.permute.xlu1 %1800 }
 0x812   :  { %1859 = vst.msk [vmem:[#allocation2 + $0x10] sm:$0x3f] %vm1858_vm5, %v1853_v61  ;;  %v2115_v61 = vld [vmem:[#allocation11 + $0x8] sm:$0xff] }
 0x813   :  { %1845 = vst.msk [vmem:[#allocation2 + $0x20] sm:$0xff] %vm1832_vm3, %v1840_v42  ;;  %v3752_v63 = vpack.c.bf16 %v2115_v61, %v2114_v60 }
 0x814   :  { %1805 = vst.msk [vmem:[#allocation2 + $0x30] sm:$0xff] %vm1793_vm1, %v1801_v15 }
 0x815   :  { %1822 = vst.msk [vmem:[#allocation2 + $0x30] sm:$0xff] %vm1812_vm0, %v1818_v38  ;;  %v1864_v43 = vpop.permute.xlu0 %1863  ;;  %v1866_v44 = vpop.permute.xlu1 %1865  ;;  %v1871_v45 = vld [vmem:[#allocation2] sm:$0xff]  ;;  %3753 = vmatprep.subr.bf16.mxu1 %v3752_v63 }
 0x816   :  { %1846 = vst.msk [vmem:[#allocation2 + $0x30] sm:$0x7f] %vm1834_vm14, %v1842_v62  ;;  %3632 = vmatprep.mubr.msk.f32.mxu0 %vm1885_vm15, %v1871_v45  ;;  %2044 = vst [vmem:[#allocation2] sm:$0xff] %v4076_v0  ;;  %3755 = vmatpush3.bf16.msra.mxu1 %v3752_v63  ;;  %v2117_v45 = vld [vmem:[#allocation11 + $0x18] sm:$0xff]  ;;  %vm2452_vm14 = vcmask 130052  }
 0x817   :  { %1869 = vst.msk [vmem:[#allocation2 + $0x20] sm:$0xff] %vm1856_vm8, %v1864_v43 }
 0x818   :  { %1870 = vst.msk [vmem:[#allocation2 + $0x30] sm:$0x3f] %vm1858_vm5, %v1866_v44  ;;  %v2116_v44 = vld [vmem:[#allocation11 + $0x10] sm:$0xff]  ;;  %vm2621_vm5 = vcmask 125952  }
 0x819   :  { %v1872_v46 = vld [vmem:[#allocation2 + $0x10] sm:$0xff]  ;;  %998 = vst.msk [vmem:[#allocation2 + $0x28] sm:$0xff] %vm330_vm13, %v4076_v0  ;;  %1000 = vst.msk [vmem:[#allocation2 + $0x38] sm:$0xff] %vm330_vm13, %v4076_v0 }
 0x81a   :  { %3633 = vmatmul.mubr.msk.f32.vlgmr.msra.gmra.mrb[10].mxu0 %vm1885_vm15, %v1872_v46  ;;  %2046 = vst [vmem:[#allocation2 + $0x10] sm:$0xff] %v4076_v0  ;;  %1386 = vst.msk [vmem:[#allocation2 + $0x8] sm:$0xff] %vm330_vm13, %v4076_v0 }
 0x81b   :  { %1388 = vst.msk [vmem:[#allocation2 + $0x18] sm:$0xff] %vm330_vm13, %v4076_v0  ;;  %1390 = vst.msk [vmem:[#allocation2 + $0x28] sm:$0xff] %vm330_vm13, %v4076_v0 }
 0x81c   :  { %1392 = vst.msk [vmem:[#allocation2 + $0x38] sm:$0xff] %vm330_vm13, %v4076_v0  ;;  %1756 = vst.msk [vmem:[#allocation2 + $0x8] sm:$0xff] %vm330_vm13, %v4076_v0 }
 0x81d   :  { %1758 = vst.msk [vmem:[#allocation2 + $0x18] sm:$0xff] %vm330_vm13, %v4076_v0  ;;  %1760 = vst.msk [vmem:[#allocation2 + $0x28] sm:$0xff] %vm330_vm13, %v4076_v0 }
 0x81e   :  { %v1873_v47 = vld [vmem:[#allocation2 + $0x20] sm:$0xff]  ;;  %1762 = vst.msk [vmem:[#allocation2 + $0x38] sm:$0xff] %vm330_vm13, %v4076_v0  ;;  %2045 = vst.msk [vmem:[#allocation2 + $0x8] sm:$0xff] %vm330_vm13, %v4076_v0 }
 0x81f   :  { %v1874_v52 = vld [vmem:[#allocation2 + $0x30] sm:$0xff]  ;;  %3635 = vmatprep.mubr.msk.f32.mxu0 %vm1885_vm15, %v1873_v47  ;;  %2048 = vst [vmem:[#allocation2 + $0x20] sm:$0xff] %v4076_v0  ;;  %2047 = vst.msk [vmem:[#allocation2 + $0x18] sm:$0xff] %vm330_vm13, %v4076_v0 }
 0x820   :  { %2050 = vst [vmem:[#allocation2 + $0x30] sm:$0xff] %v4076_v0  ;;  %3636 = vmatmul.mubr.msk.f32.gmra.mrb[12].mxu0 %vm1885_vm15, %v1874_v52  ;;  %2049 = vst.msk [vmem:[#allocation2 + $0x28] sm:$0xff] %vm330_vm13, %v4076_v0  ;;  %vm5645_vm15 = vcmask 1042432  }
 0x821   :  { %2051 = vst.msk [vmem:[#allocation2 + $0x38] sm:$0xff] %vm330_vm13, %v4076_v0  ;;  %2440 = vst.msk [vmem:[#allocation2 + $0x8] sm:$0xff] %vm330_vm13, %v4076_v0 }
 0x822   :  { %2442 = vst.msk [vmem:[#allocation2 + $0x18] sm:$0xff] %vm330_vm13, %v4076_v0  ;;  %2444 = vst.msk [vmem:[#allocation2 + $0x28] sm:$0xff] %vm330_vm13, %v4076_v0 }
 0x823   :  { %2446 = vst.msk [vmem:[#allocation2 + $0x38] sm:$0xff] %vm330_vm13, %v4076_v0 }
 0x8ed   :  { %v3634_v53 = vpop.f32.mrb[10].mxu0 }
 0x8ee   :  { %v1984_v54 = vsel %vm1327_vm10, %v3634_v53, 0.0  ;;  %v1964_v55 = vpop.f32.mrb[11].mxu0 }
 0x8ef   :  { %v1983_v56 = vsel %vm1327_vm10, %v1964_v55, 0.0 }
 0x8f0   :  { %v1985_v57 = vadd.f32 %v1984_v54, %v1983_v56  ;;  %v3756_v54 = vpack.c.bf16 %v2117_v45, %v2116_v44 }
 0x8f2   :  { %3757 = vmatprep.subr.bf16.mxu1 %v3756_v54 }
 0x8f3   :  { %v3637_v58 = vpop.f32.mrb[12].mxu0  ;;  %3759 = vmatpush3.bf16.msra.mxu1 %v3756_v54 }
 0x8f4   :  { %v1974_v59 = vpop.f32.mrb[13].mxu0  ;;  %v1988_v4 = vsel %vm1327_vm10, %v3637_v58, 0.0 }
 0x8f5   :  { %v1986_v1 = vsel %vm1327_vm10, %v1974_v59, 0.0 }
 0x8f6   :  { %v1987_v3 = vadd.f32 %v1986_v1, %v1985_v57  ;;  %v2119_v1 = vld [vmem:[#allocation11 + $0x28] sm:$0xff] }
 0x8f8   :  { %v1989_v5 = vadd.f32 %v1988_v4, %v1987_v3 }
 0x8fa   :  { %v1990_v6 = vrot.slane %v1989_v5, 4 }
 0x8fc   :  { %v1991_v7 = vadd.f32 %v1990_v6, %v1989_v5 }
 0x8fe   :  { %v1992_v8 = vrot.slane %v1991_v7, 2 }
 0x900   :  { %v1993_v9 = vadd.f32 %v1992_v8, %v1991_v7 }
 0x902   :  { %v1994_v11 = vrot.slane %v1993_v9, 1 }
 0x904   :  { %v1995_v12 = vadd.f32 %v1994_v11, %v1993_v9 }
 0x906   :  { %v1996_v13 = vmul.f32 0.03125, %v1995_v12 }
 0x908   :  { %v1997_v16 = vsub.f32 %v1964_v55, %v1996_v13  ;;  %v1998_v17 = vsub.f32 %v3634_v53, %v1996_v13  ;;  %v1999_v18 = vsub.f32 %v1974_v59, %v1996_v13  ;;  %v2000_v19 = vsub.f32 %v3637_v58, %v1996_v13  ;;  %v2118_v59 = vld [vmem:[#allocation11 + $0x20] sm:$0xff] }
 0x90a   :  { %v2001_v20 = vmul.f32 %v1997_v16, %v1997_v16  ;;  %v2002_v21 = vmul.f32 %v1998_v17, %v1998_v17  ;;  %v2003_v22 = vmul.f32 %v1999_v18, %v1999_v18  ;;  %v2004_v23 = vmul.f32 %v2000_v19, %v2000_v19 }
 0x90c   :  { %v2005_v24 = vsel %vm1327_vm10, %v2001_v20, 0.0  ;;  %v2006_v25 = vsel %vm1327_vm10, %v2002_v21, 0.0  ;;  %v2008_v27 = vsel %vm1327_vm10, %v2003_v22, 0.0  ;;  %v2010_v29 = vsel %vm1327_vm10, %v2004_v23, 0.0 }
 0x90d   :  { %v2007_v26 = vadd.f32 %v2006_v25, %v2005_v24 }
 0x90f   :  { %v2009_v28 = vadd.f32 %v2008_v27, %v2007_v26 }
 0x911   :  { %v2011_v30 = vadd.f32 %v2010_v29, %v2009_v28 }
 0x913   :  { %v2012_v31 = vrot.slane %v2011_v30, 4 }
 0x915   :  { %v2013_v32 = vadd.f32 %v2012_v31, %v2011_v30  ;;  %v2283_v31 = vld [vmem:[#allocation12] sm:$0xff] }
 0x917   :  { %v2014_v33 = vrot.slane %v2013_v32, 2 }
 0x919   :  { %v2015_v34 = vadd.f32 %v2014_v33, %v2013_v32  ;;  %v2284_v32 = vld [vmem:[#allocation12 + $0x8] sm:$0xff] }
 0x91a   :  { %v3764_v33 = vpack.c.bf16 %v2284_v32, %v2283_v31 }
 0x91b   :  { %v2016_v35 = vrot.slane %v2015_v34, 1 }
 0x91c   :  { %3765 = vmatprep.subr.bf16.mxu0 %v3764_v33 }
 0x91d   :  { %v2017_v36 = vadd.f32 %v2016_v35, %v2015_v34  ;;  %3767 = vmatpush3.bf16.msra.mxu0 %v3764_v33 }
 0x91f   :  { %v2018_v37 = vmul.f32 0.03125, %v2017_v36 }
 0x921   :  { %v2020_v38 = vadd.f32 1e-05, %v2018_v37 }
 0x923   :  { %3892 = vrsqrt.f32 %v2020_v38 }
 0x92d   :  { %v3893_v2 = vpop.eup %3892 }
 0x92e   :  { %v2022_v40 = vmul.f32 %v3893_v2, %v2019_v39 }
 0x930   :  { %v2026_v62 = vrot.slane %v2022_v40, %v4537_v10 }
 0x932   :  { %v2029_v41 = vmul.f32 %v2026_v62, %v1999_v18  ;;  %v2028_v42 = vmul.f32 %v2026_v62, %v1998_v17  ;;  %v2027_v15 = vmul.f32 %v2026_v62, %v1997_v16  ;;  %v2030_v43 = vmul.f32 %v2026_v62, %v2000_v19 }
 0x933   :  { %v3760_v16 = vpack.c.bf16 %v2119_v1, %v2118_v59 }
 0x934   :  { %v2038_v46 = vadd.f32 %v3408_v14, %v2029_v41  ;;  %v2037_v47 = vadd.f32 %v3408_v14, %v2028_v42  ;;  %v2036_v52 = vadd.f32 %v3408_v14, %v2027_v15  ;;  %v2039_v53 = vadd.f32 %v3408_v14, %v2030_v43 }
 0x935   :  { %3761 = vmatprep.subr.bf16.mxu1 %v3760_v16 }
 0x936   :  { %v2042_v55 = vmax.f32 %v2038_v46, 0.0  ;;  %v2041_v56 = vmax.f32 %v2037_v47, 0.0  ;;  %v2040_v57 = vmax.f32 %v2036_v52, 0.0  ;;  %v2043_v58 = vmax.f32 %v2039_v53, 0.0  ;;  %3763 = vmatpush3.bf16.msra.mxu1 %v3760_v16 }
 0x938   :  { %v2064_v3 = vrot.slane %v2042_v55, 7  ;;  %2073 = vrot.lane.b32.xlu1 %v2041_v56, %s4079_s30  ;;  %v2055_v4 = vrot.slane %v2041_v56, 7  ;;  %2071 = vrot.lane.b32.xlu0 %v2040_v57, %s4079_s30  ;;  %v2054_v5 = vrot.slane %v2040_v57, 7  ;;  %v2065_v6 = vrot.slane %v2043_v58, 7 }
 0x939   :  { %v2088_v7 = vrot.slane %v2041_v56, 1  ;;  %v2087_v8 = vrot.slane %v2040_v57, 1  ;;  %v2100_v9 = vrot.slane %v2043_v58, 1  ;;  %v2099_v11 = vrot.slane %v2042_v55, 1 }
 0x93a   :  { %v2056_v12 = vsel %vm403_vm2, %v2054_v5, %v2055_v4  ;;  %2060 = vst.msk [vmem:[#allocation2] sm:$0xfe] %vm2059_vm11, %v2054_v5  ;;  %2069 = vst.msk [vmem:[#allocation2 + $0x20] sm:$0xfe] %vm2059_vm11, %v2064_v3  ;;  %v2066_v13 = vsel %vm403_vm2, %v2064_v3, %v2065_v6  ;;  %vm5646_vm11 = vcmask 1041408  }
 0x93b   :  { %v2089_v17 = vsel %vm445_vm6, %v2087_v8, %v2088_v7  ;;  %v2101_v18 = vsel %vm445_vm6, %v2099_v11, %v2100_v9  ;;  %2061 = vst.msk [vmem:[#allocation2 + $0x10] sm:$0xff] %vm1327_vm10, %v2056_v12  ;;  %2070 = vst.msk [vmem:[#allocation2 + $0x30] sm:$0xff] %vm1327_vm10, %v2066_v13 }
 0x93c   :  { %2081 = vrot.lane.b32.xlu1 %v2043_v58, %s4079_s30  ;;  %2079 = vrot.lane.b32.xlu0 %v2042_v55, %s4079_s30 }
 0x940   :  { %2092 = vrot.lane.b32.xlu1 %v2088_v7, %s4083_s27  ;;  %2090 = vrot.lane.b32.xlu0 %v2089_v17, %s4083_s27  ;;  %v2254_v17 = vld [vmem:[%s5587_s14] sm:$0x1] }
 0x944   :  { %2104 = vrot.lane.b32.xlu1 %v2100_v9, %s4083_s27  ;;  %2102 = vrot.lane.b32.xlu0 %v2101_v18, %s4083_s27 }
 0x9aa   :  { %v2074_v19 = vpop.permute.xlu1 %2073  ;;  %v2072_v20 = vpop.permute.xlu0 %2071 }
 0x9ab   :  { %2078 = vst.msk [vmem:[#allocation2 + $0x10] sm:$0xff] %vm1793_vm1, %v2074_v19  ;;  %2077 = vst.msk [vmem:[#allocation2] sm:$0xff] %vm1793_vm1, %v2072_v20  ;;  %v3398_v20 = vld [vmem:[%s5589_s16 + $0x1] ss:$0 sm:$0xff] }
 0x9ae   :  { %v2082_v21 = vpop.permute.xlu1 %2081  ;;  %v2080_v22 = vpop.permute.xlu0 %2079 }
 0x9af   :  { %2086 = vst.msk [vmem:[#allocation2 + $0x30] sm:$0xff] %vm1793_vm1, %v2082_v21  ;;  %2085 = vst.msk [vmem:[#allocation2 + $0x20] sm:$0xff] %vm1793_vm1, %v2080_v22  ;;  %v3413_v22 = vld [vmem:[%s5587_s14 + $0x1] ss:$0 sm:$0xff] }
 0x9b2   :  { %v2093_v23 = vpop.permute.xlu1 %2092  ;;  %v2091_v24 = vpop.permute.xlu0 %2090 }
 0x9b3   :  { %2098 = vst.msk [vmem:[#allocation2 + $0x10] sm:$0x7f] %vm2097_vm9, %v2093_v23 }
 0x9b4   :  { %2096 = vst.msk [vmem:[#allocation2] sm:$0xff] %vm1812_vm0, %v2091_v24 }
 0x9b6   :  { %v2105_v25 = vpop.permute.xlu1 %2104  ;;  %v2103_v26 = vpop.permute.xlu0 %2102 }
 0x9b7   :  { %2109 = vst.msk [vmem:[#allocation2 + $0x30] sm:$0x7f] %vm2097_vm9, %v2105_v25  ;;  %vm5647_vm9 = vcmask 1044480  }
 0x9b8   :  { %2108 = vst.msk [vmem:[#allocation2 + $0x20] sm:$0xff] %vm1812_vm0, %v2103_v26 }
 0x9ba   :  { %v2111_v28 = vld [vmem:[#allocation2 + $0x10] sm:$0xff] }
 0x9bb   :  { %v2110_v27 = vld [vmem:[#allocation2] sm:$0xff]  ;;  %2441 = vst [vmem:[#allocation2 + $0x10] sm:$0xff] %v4076_v0 }
 0x9bc   :  { %3650 = vmatprep.mubr.msk.f32.mxu1 %vm2120_vm12, %v2110_v27  ;;  %2439 = vst [vmem:[#allocation2] sm:$0xff] %v4076_v0  ;;  %v1381_v27 = vadd.f32 %v3398_v20, %v4817_v48  ;;  %v2634_v48 = vld [vmem:[%s5590_s17] sm:$0xff] }
 0x9bd   :  { %3651 = vmatmul.mubr.msk.f32.vlgmr.msra.gmra.mrb[14].mxu1 %vm2120_vm12, %v2111_v28  ;;  %v1382_v28 = vadd.f32 %v3398_v20, %v4819_v49  ;;  %v2635_v49 = vld [vmem:[%s5590_s17 + $0x8] sm:$0xff] }
 0x9be   :  { %v2113_v30 = vld [vmem:[#allocation2 + $0x30] sm:$0xff] }
 0x9bf   :  { %v2112_v29 = vld [vmem:[#allocation2 + $0x20] sm:$0xff]  ;;  %2445 = vst [vmem:[#allocation2 + $0x30] sm:$0xff] %v4076_v0 }
 0x9c0   :  { %3653 = vmatprep.mubr.msk.f32.mxu1 %vm2120_vm12, %v2112_v29  ;;  %2443 = vst [vmem:[#allocation2 + $0x20] sm:$0xff] %v4076_v0  ;;  %v1383_v29 = vadd.f32 %v3398_v20, %v4821_v50 }
 0x9c1   :  { %3654 = vmatmul.mubr.msk.f32.gmra.mrb[16].mxu1 %vm2120_vm12, %v2113_v30  ;;  %v1384_v30 = vadd.f32 %v3398_v20, %v4823_v51  ;;  %vm5648_vm12 = vmmov %vm5645_vm15 }
 0xa90   :  { %v3652_v34 = vpop.f32.mrb[14].mxu1 }
 0xa91   :  { %v2219_v35 = vsel %vm1327_vm10, %v3652_v34, 0.0  ;;  %v2199_v36 = vpop.f32.mrb[15].mxu1 }
 0xa92   :  { %v2218_v37 = vsel %vm1327_vm10, %v2199_v36, 0.0 }
 0xa93   :  { %v2220_v38 = vadd.f32 %v2219_v35, %v2218_v37 }
 0xa94   :  { %v3655_v39 = vpop.f32.mrb[16].mxu1 }
 0xa95   :  { %v2209_v2 = vpop.f32.mrb[17].mxu1  ;;  %v2223_v61 = vsel %vm1327_vm10, %v3655_v39, 0.0 }
 0xa96   :  { %v2221_v40 = vsel %vm1327_vm10, %v2209_v2, 0.0 }
 0xa97   :  { %v2222_v60 = vadd.f32 %v2221_v40, %v2220_v38 }
 0xa99   :  { %v2224_v62 = vadd.f32 %v2223_v61, %v2222_v60  ;;  %v3769_v60 = vpack.c.bf16 %v2635_v49, %v2634_v48  ;;  %v2643_v48 = vld [vmem:[%s5590_s17 + $0x48] sm:$0xff] }
 0xa9b   :  { %v2225_v63 = vrot.slane %v2224_v62, 4 }
 0xa9d   :  { %v2226_v14 = vadd.f32 %v2225_v63, %v2224_v62 }
 0xa9f   :  { %v2227_v41 = vrot.slane %v2226_v14, 2 }
 0xaa1   :  { %v2228_v42 = vadd.f32 %v2227_v41, %v2226_v14 }
 0xaa3   :  { %v2229_v15 = vrot.slane %v2228_v42, 1 }
 0xaa5   :  { %v2230_v43 = vadd.f32 %v2229_v15, %v2228_v42 }
 0xaa7   :  { %v2231_v44 = vmul.f32 0.03125, %v2230_v43 }
 0xaa9   :  { %v2232_v45 = vsub.f32 %v2199_v36, %v2231_v44  ;;  %v2233_v46 = vsub.f32 %v3652_v34, %v2231_v44  ;;  %v2234_v47 = vsub.f32 %v2209_v2, %v2231_v44  ;;  %v2235_v52 = vsub.f32 %v3655_v39, %v2231_v44 }
 0xaaa   :  { %v4088_v39 = vmov 0.0|0.0  }
 0xaab   :  { %v2236_v53 = vmul.f32 %v2232_v45, %v2232_v45  ;;  %v2237_v54 = vmul.f32 %v2233_v46, %v2233_v46  ;;  %v2238_v55 = vmul.f32 %v2234_v47, %v2234_v47  ;;  %v2239_v56 = vmul.f32 %v2235_v52, %v2235_v52  ;;  %3768 = vmatprep.subr.bf16.mxu0 %v4088_v39 }
 0xaac   :  { %3795 = vmatprep.subr.bf16.mxu1 %v4088_v39 }
 0xaad   :  { %v2240_v57 = vsel %vm1327_vm10, %v2236_v53, 0.0  ;;  %v2241_v58 = vsel %vm1327_vm10, %v2237_v54, 0.0  ;;  %v2243_v1 = vsel %vm1327_vm10, %v2238_v55, 0.0  ;;  %v2245_v4 = vsel %vm1327_vm10, %v2239_v56, 0.0 }
 0xaae   :  { %v2242_v59 = vadd.f32 %v2241_v58, %v2240_v57 }
 0xab0   :  { %v2244_v3 = vadd.f32 %v2243_v1, %v2242_v59 }
 0xab2   :  { %v2246_v5 = vadd.f32 %v2245_v4, %v2244_v3 }
 0xab4   :  { %v2247_v6 = vrot.slane %v2246_v5, 4 }
 0xab6   :  { %v2248_v7 = vadd.f32 %v2247_v6, %v2246_v5 }
 0xab8   :  { %v2249_v8 = vrot.slane %v2248_v7, 2 }
 0xaba   :  { %v2250_v9 = vadd.f32 %v2249_v8, %v2248_v7 }
 0xabc   :  { %v2251_v11 = vrot.slane %v2250_v9, 1 }
 0xabe   :  { %v2252_v12 = vadd.f32 %v2251_v11, %v2250_v9  ;;  %v2636_v11 = vld [vmem:[%s5590_s17 + $0x10] sm:$0xff] }
 0xac0   :  { %v2253_v13 = vmul.f32 0.03125, %v2252_v12  ;;  %v2637_v12 = vld [vmem:[%s5590_s17 + $0x18] sm:$0xff] }
 0xac2   :  { %v2255_v16 = vadd.f32 1e-05, %v2253_v13 }
 0xac4   :  { %3894 = vrsqrt.f32 %v2255_v16 }
 0xace   :  { %v3895_v18 = vpop.eup %3894 }
 0xacf   :  { %v2257_v19 = vmul.f32 %v3895_v18, %v2254_v17 }
 0xad1   :  { %v2261_v21 = vrot.slane %v2257_v19, %v4537_v10 }
 0xad3   :  { %v2262_v23 = vmul.f32 %v2261_v21, %v2232_v45  ;;  %v2263_v24 = vmul.f32 %v2261_v21, %v2233_v46  ;;  %v2264_v25 = vmul.f32 %v2261_v21, %v2234_v47  ;;  %v2265_v26 = vmul.f32 %v2261_v21, %v2235_v52 }
 0xad5   :  { %v2271_v31 = vadd.f32 %v3413_v22, %v2262_v23  ;;  %v2272_v32 = vadd.f32 %v3413_v22, %v2263_v24  ;;  %v2273_v33 = vadd.f32 %v3413_v22, %v2264_v25  ;;  %v2274_v34 = vadd.f32 %v3413_v22, %v2265_v26  ;;  %v2638_v23 = vld [vmem:[%s5590_s17 + $0x20] sm:$0xff]  ;;  %v2639_v24 = vld [vmem:[%s5590_s17 + $0x28] sm:$0xff] }
 0xad7   :  { %v2275_v35 = vadd.f32 %v2271_v31, %v1381_v27  ;;  %v2276_v36 = vadd.f32 %v2272_v32, %v1382_v28  ;;  %v2277_v37 = vadd.f32 %v2273_v33, %v1383_v29  ;;  %v2278_v38 = vadd.f32 %v2274_v34, %v1384_v30  ;;  %v2640_v34 = vld [vmem:[%s5590_s17 + $0x30] sm:$0xff] }
 0xad8   :  { %v3772_v27 = vpack.c.bf16 %v2637_v12, %v2636_v11  ;;  %v3775_v32 = vpack.c.bf16 %v2639_v24, %v2638_v23 }
 0xad9   :  { %v5020_v50 = vmax.f32 %v2275_v35, 0.0  ;;  %v5022_v51 = vmax.f32 %v2276_v36, 0.0  ;;  %v5024_v2 = vmax.f32 %v2277_v37, 0.0  ;;  %v5026_v40 = vmax.f32 %v2278_v38, 0.0  ;;  %v2641_v35 = vld [vmem:[%s5590_s17 + $0x38] sm:$0xff]  ;;  %v2642_v38 = vld [vmem:[%s5590_s17 + $0x40] sm:$0xff] }
 0xada   :  { %v3778_v37 = vpack.c.bf16 %v2641_v35, %v2640_v34  ;;  %v3781_v49 = vpack.c.bf16 %v2643_v48, %v2642_v38 }
 0xadb   :  { %2533 = vrot.lane.b32.xlu0 %v5022_v51, %s4087_s3  ;;  %2531 = vrot.lane.b32.xlu1 %v5020_v50, %s4087_s3  ;;  %v2485_v61 = vrot.slane %v5020_v50, 6  ;;  %v2462_v62 = vrot.slane %v5020_v50, 5  ;;  %v2447_v63 = vrot.slane %v5020_v50, 4  ;;  %v2448_v14 = vrot.slane %v5022_v51, 4 }
 0xadc   :  { %3660 = vmatprep.mubr.msk.f32.mxu0 %vm1327_vm10, %v5020_v50  ;;  %v2474_v41 = vrot.slane %v5024_v2, 5  ;;  %v2508_v42 = vrot.slane %v5020_v50, 7  ;;  %v2497_v15 = vrot.slane %v5024_v2, 6  ;;  %v2548_v43 = vrot.slane %v5022_v51, 1 }
 0xadd   :  { %3661 = vmatmul.mubr.msk.f32.vlgmr.msra.gmra.mrb[14].mxu0 %vm1327_vm10, %v5022_v51  ;;  %v2449_v44 = vsel %vm181_vm4, %v2447_v63, %v2448_v14  ;;  %v2520_v45 = vrot.slane %v5024_v2, 7  ;;  %v2572_v46 = vrot.slane %v5022_v51, 2  ;;  %v2561_v47 = vrot.slane %v5026_v40, 1  ;;  %2453 = vst.msk [vmem:[#allocation2] sm:$0xf0] %vm2452_vm14, %v2447_v63  ;;  %v2646_v63 = vld [vmem:[%s5590_s17 + $0x60] sm:$0xff] }
 0xade   :  { %2622 = vst.msk [vmem:[#allocation2 + $0x18] sm:$0xf] %vm2621_vm5, %v2448_v14  ;;  %3663 = vmatprep.mubr.msk.f32.mxu0 %vm1327_vm10, %v5024_v2  ;;  %v2596_v52 = vrot.slane %v5022_v51, 3  ;;  %v2547_v53 = vrot.slane %v5020_v50, 1  ;;  %v2463_v54 = vrot.slane %v5022_v51, 5  ;;  %v2571_v55 = vrot.slane %v5020_v50, 2  ;;  %3770 = vmatpush1.bf16.msra.mxu0 %v3769_v60 }
 0xadf   :  { %2620 = vst.msk [vmem:[#allocation2 + $0x8] sm:$0xff] %vm1327_vm10, %v2449_v44  ;;  %2454 = vst.msk [vmem:[#allocation2 + $0x10] sm:$0xff] %vm1327_vm10, %v2449_v44  ;;  %2541 = vrot.lane.b32.xlu0 %v5026_v40, %s4087_s3  ;;  %2539 = vrot.lane.b32.xlu1 %v5024_v2, %s4087_s3  ;;  %v2486_v56 = vrot.slane %v5022_v51, 6  ;;  %v2595_v57 = vrot.slane %v5020_v50, 3  ;;  %v2509_v58 = vrot.slane %v5022_v51, 7  ;;  %v2560_v59 = vrot.slane %v5024_v2, 1 }
 0xae0   :  { %v5069_v1 = vsel %vm445_vm6, %v2547_v53, %v2548_v43  ;;  %v5072_v3 = vsel %vm5645_vm15, %v2462_v62, %v2463_v54  ;;  %v5077_v4 = vsel %vm470_vm7, %v2571_v55, %v2572_v46  ;;  %v2475_v5 = vrot.slane %v5026_v40, 5  ;;  %3771 = vmatprep.subr.bf16.mxu0 %v4088_v39  ;;  %vm5649_vm15 = vmmov %vm5646_vm11  ;;  %v2644_v50 = vld [vmem:[%s5590_s17 + $0x50] sm:$0xff]  ;;  %v2645_v60 = vld [vmem:[%s5590_s17 + $0x58] sm:$0xff] }
 0xae1   :  { %3664 = vmatmul.mubr.msk.f32.gmra.mrb[16].mxu0 %vm1327_vm10, %v5026_v40  ;;  %v5084_v6 = vsel %vm5646_vm11, %v2485_v61, %v2486_v56  ;;  %v5089_v7 = vsel %vm5647_vm9, %v2595_v57, %v2596_v52  ;;  %v5092_v8 = vsel %vm403_vm2, %v2508_v42, %v2509_v58  ;;  %v5097_v9 = vsel %vm445_vm6, %v2560_v59, %v2561_v47  ;;  %vm5650_vm11 = vmmov %vm5647_vm9  ;;  %v2647_v14 = vld [vmem:[%s5590_s17 + $0x68] sm:$0xff]  ;;  %v2648_v51 = vld [vmem:[%s5590_s17 + $0x70] sm:$0xff] }
 0xae2   :  { %v5106_v13 = vsel %vm5648_vm12, %v2474_v41, %v2475_v5  ;;  %v2584_v16 = vrot.slane %v5024_v2, 2  ;;  %v2585_v17 = vrot.slane %v5026_v40, 2  ;;  %v2498_v18 = vrot.slane %v5026_v40, 6  ;;  %3773 = vmatpush1.bf16.msra.mxu0 %v3772_v27  ;;  %v2651_v44 = vld [vmem:[%s5590_s17 + $0x88] sm:$0xff] }
 0xae3   :  { %2488 = vrot.lane.b32.xlu1 %v2485_v61, %s4083_s27  ;;  %2465 = vrot.lane.b32.xlu0 %v2462_v62, %s4079_s30  ;;  %v2608_v19 = vrot.slane %v5024_v2, 3  ;;  %v2609_v20 = vrot.slane %v5026_v40, 3  ;;  %v2521_v21 = vrot.slane %v5026_v40, 7  ;;  %v2455_v22 = vrot.slane %v5024_v2, 4 }
 0xae4   :  { %v5126_v25 = vsel %vm470_vm7, %v2584_v16, %v2585_v17  ;;  %v5131_v26 = vsel %vm5649_vm15, %v2497_v15, %v2498_v18  ;;  %v2456_v33 = vrot.slane %v5026_v40, 4  ;;  %3774 = vmatprep.subr.bf16.mxu0 %v4088_v39  ;;  %v3784_v2 = vpack.c.bf16 %v2645_v60, %v2644_v50 }
 0xae5   :  { %v5133_v28 = vld [vmem:[#allocation2 + $0x18] sm:$0xff]  ;;  %v5138_v30 = vsel %vm5650_vm11, %v2608_v19, %v2609_v20  ;;  %v5143_v31 = vsel %vm403_vm2, %v2520_v45, %v2521_v21  ;;  %2460 = vst.msk [vmem:[#allocation2 + $0x20] sm:$0xf0] %vm2452_vm14, %v2455_v22  ;;  %vm2494_vm14 = vcmask 392450   ;;  %vm2556_vm9 = vcmask 786048  }
 0xae6   :  { %v2627_v29 = vld [vmem:[#allocation2 + $0x8] sm:$0xff]  ;;  %2813 = vst.msk [vmem:[#allocation2 + $0x18] sm:$0xff] %vm330_vm13, %v4076_v0  ;;  %v2457_v36 = vsel %vm181_vm4, %v2455_v22, %v2456_v33  ;;  %3776 = vmatpush1.bf16.msra.mxu0 %v3775_v32  ;;  %vm2471_vm4 = vcmask 261251   ;;  %vm2580_vm12 = vcmask 917248   ;;  %vm2604_vm15 = vcmask 1048448  }
 0xae7   :  { %3419 = vmatprep.mubr.msk.f32.mxu0 %vm1327_vm10, %v2627_v29  ;;  %2811 = vst.msk [vmem:[#allocation2 + $0x8] sm:$0xff] %vm330_vm13, %v4076_v0  ;;  %2477 = vrot.lane.b32.xlu1 %v2474_v41, %s4079_s30  ;;  %v3787_v41 = vpack.c.bf16 %v2647_v14, %v2646_v63  ;;  %vm2558_vm11 = vcmask 785024  }
 0xae8   :  { %2511 = vrot.lane.b32.xlu0 %v2508_v42, %s4085_s2  ;;  %2625 = vst.msk [vmem:[#allocation2 + $0x38] sm:$0xf] %vm2621_vm5, %v2456_v33  ;;  %3777 = vmatprep.subr.bf16.mxu0 %v4088_v39  ;;  %v2649_v42 = vld [vmem:[%s5590_s17 + $0x78] sm:$0xff]  ;;  %vm2517_vm5 = vcmask 523649  }
 0xae9   :  { %2461 = vst.msk [vmem:[#allocation2 + $0x30] sm:$0xff] %vm1327_vm10, %v2457_v36  ;;  %2624 = vst.msk [vmem:[#allocation2 + $0x28] sm:$0xff] %vm1327_vm10, %v2457_v36 }
 0xaea   :  { %3779 = vmatpush1.bf16.msra.mxu0 %v3778_v37 }
 0xaeb   :  { %2500 = vrot.lane.b32.xlu1 %v2497_v15, %s4083_s27  ;;  %3780 = vmatprep.subr.bf16.mxu0 %v4088_v39  ;;  %v3790_v15 = vpack.c.bf16 %v2649_v42, %v2648_v51 }
 0xaec   :  { %2552 = vrot.lane.b32.xlu0 %v2548_v43, %s4089_s1  ;;  %v2650_v43 = vld [vmem:[%s5590_s17 + $0x80] sm:$0xff] }
 0xaee   :  { %3782 = vmatpush1.bf16.msra.mxu0 %v3781_v49 }
 0xaef   :  { %2523 = vrot.lane.b32.xlu1 %v2520_v45, %s4085_s2  ;;  %v5190_v61 = vld [vmem:[#allocation2 + $0x38] sm:$0xff]  ;;  %3783 = vmatprep.subr.bf16.mxu0 %v4088_v39  ;;  %v3793_v45 = vpack.c.bf16 %v2651_v44, %v2650_v43 }
 0xaf0   :  { %2576 = vrot.lane.b32.xlu0 %v2572_v46, %s4090_s4  ;;  %v5193_v62 = vld [vmem:[#allocation2 + $0x28] sm:$0xff]  ;;  %2817 = vst.msk [vmem:[#allocation2 + $0x38] sm:$0xff] %vm330_vm13, %v4076_v0 }
 0xaf1   :  { %2815 = vst.msk [vmem:[#allocation2 + $0x28] sm:$0xff] %vm330_vm13, %v4076_v0 }
 0xaf2   :  { %3785 = vmatpush1.bf16.msra.mxu0 %v3784_v2 }
 0xaf3   :  { %2565 = vrot.lane.b32.xlu1 %v2561_v47, %s4089_s1  ;;  %3786 = vmatprep.subr.bf16.mxu0 %v4088_v39 }
 0xaf4   :  { %2600 = vrot.lane.b32.xlu0 %v2596_v52, %s4091_s9 }
 0xaf6   :  { %3788 = vmatpush1.bf16.msra.mxu0 %v3787_v41 }
 0xaf7   :  { %2550 = vrot.lane.b32.xlu1 %v5069_v1, %s4089_s1  ;;  %3789 = vmatprep.subr.bf16.mxu0 %v4088_v39 }
 0xaf8   :  { %2467 = vrot.lane.b32.xlu0 %v5072_v3, %s4079_s30 }
 0xafa   :  { %3791 = vmatpush1.bf16.msra.mxu0 %v3790_v15 }
 0xafb   :  { %2574 = vrot.lane.b32.xlu1 %v5077_v4, %s4090_s4  ;;  %3792 = vmatprep.subr.bf16.mxu0 %v4088_v39 }
 0xafc   :  { %2490 = vrot.lane.b32.xlu0 %v5084_v6, %s4083_s27 }
 0xafe   :  { %3794 = vmatpush1.bf16.msra.mxu0 %v3793_v45 }
 0xaff   :  { %2598 = vrot.lane.b32.xlu1 %v5089_v7, %s4091_s9 }
 0xb00   :  { %2513 = vrot.lane.b32.xlu0 %v5092_v8, %s4085_s2 }
 0xb03   :  { %2563 = vrot.lane.b32.xlu1 %v5097_v9, %s4089_s1 }
 0xb04   :  { %2479 = vrot.lane.b32.xlu0 %v5106_v13, %s4079_s30 }
 0xb07   :  { %2587 = vrot.lane.b32.xlu1 %v5126_v25, %s4090_s4 }
 0xb08   :  { %2502 = vrot.lane.b32.xlu0 %v5131_v26, %s4083_s27 }
 0xb0b   :  { %2611 = vrot.lane.b32.xlu1 %v5138_v30, %s4091_s9 }
 0xb0c   :  { %2525 = vrot.lane.b32.xlu0 %v5143_v31, %s4085_s2 }
 0xb0f   :  { %2613 = vrot.lane.b32.xlu1 %v2609_v20, %s4091_s9 }
 0xb10   :  { %2589 = vrot.lane.b32.xlu0 %v2585_v17, %s4090_s4 }
 0xb4d   :  { %v2534_v46 = vpop.permute.xlu0 %2533  ;;  %v2532_v47 = vpop.permute.xlu1 %2531 }
 0xb51   :  { %v5257_v52 = vpop.permute.xlu0 %2541  ;;  %v2540_v53 = vpop.permute.xlu1 %2539 }
 0xb55   :  { %v2489_v54 = vpop.permute.xlu1 %2488  ;;  %v2466_v55 = vpop.permute.xlu0 %2465 }
 0xb56   :  { %2472 = vst.msk [vmem:[#allocation2] sm:$0xf8] %vm2471_vm4, %v2466_v55 }
 0xb57   :  { %2495 = vst.msk [vmem:[#allocation2] sm:$0xfc] %vm2494_vm14, %v2489_v54 }
 0xb59   :  { %v2478_v56 = vpop.permute.xlu1 %2477 }
 0xb5a   :  { %v2512_v57 = vpop.permute.xlu0 %2511  ;;  %2483 = vst.msk [vmem:[#allocation2 + $0x20] sm:$0xf8] %vm2471_vm4, %v2478_v56  ;;  %vm2582_vm4 = vcmask 915200  }
 0xb5b   :  { %2518 = vst.msk [vmem:[#allocation2] sm:$0xfe] %vm2517_vm5, %v2512_v57 }
 0xb5c   :  { %2537 = vst.msk [vmem:[#allocation2] sm:$0xff] %vm1856_vm8, %v2532_v47 }
 0xb5d   :  { %v2501_v40 = vpop.permute.xlu1 %2500 }
 0xb5e   :  { %v2553_v58 = vpop.permute.xlu0 %2552  ;;  %2506 = vst.msk [vmem:[#allocation2 + $0x20] sm:$0xfc] %vm2494_vm14, %v2501_v40  ;;  %vm2606_vm14 = vcmask 1045376  }
 0xb61   :  { %v2524_v59 = vpop.permute.xlu1 %2523 }
 0xb62   :  { %v2577_v1 = vpop.permute.xlu0 %2576  ;;  %2529 = vst.msk [vmem:[#allocation2 + $0x20] sm:$0xfe] %vm2517_vm5, %v2524_v59  ;;  %vm2887_vm5 = vcmask 1048320  }
 0xb63   :  { %2545 = vst.msk [vmem:[#allocation2 + $0x20] sm:$0xff] %vm1856_vm8, %v2540_v53 }
 0xb65   :  { %v2566_v3 = vpop.permute.xlu1 %2565 }
 0xb66   :  { %v2601_v4 = vpop.permute.xlu0 %2600 }
 0xb69   :  { %v2551_v5 = vpop.permute.xlu1 %2550 }
 0xb6a   :  { %v2468_v6 = vpop.permute.xlu0 %2467  ;;  %2557 = vst.msk [vmem:[#allocation2] sm:$0xff] %vm2556_vm9, %v2551_v5 }
 0xb6b   :  { %2473 = vst.msk [vmem:[#allocation2 + $0x10] sm:$0xff] %vm1793_vm1, %v2468_v6 }
 0xb6d   :  { %v2575_v7 = vpop.permute.xlu1 %2574 }
 0xb6e   :  { %v2491_v8 = vpop.permute.xlu0 %2490  ;;  %2581 = vst.msk [vmem:[#allocation2] sm:$0xff] %vm2580_vm12, %v2575_v7 }
 0xb6f   :  { %2496 = vst.msk [vmem:[#allocation2 + $0x10] sm:$0xff] %vm1812_vm0, %v2491_v8 }
 0xb71   :  { %v2599_v9 = vpop.permute.xlu1 %2598 }
 0xb72   :  { %v2514_v11 = vpop.permute.xlu0 %2513  ;;  %2605 = vst.msk [vmem:[#allocation2] sm:$0xff] %vm2604_vm15, %v2599_v9 }
 0xb73   :  { %2519 = vst.msk [vmem:[#allocation2 + $0x10] sm:$0xff] %vm1832_vm3, %v2514_v11 }
 0xb74   :  { %2538 = vst.msk [vmem:[#allocation2 + $0x10] sm:$0xff] %vm1856_vm8, %v2534_v46 }
 0xb75   :  { %2559 = vst.msk [vmem:[#allocation2 + $0x10] sm:$0x7f] %vm2558_vm11, %v2553_v58  ;;  %v2564_v12 = vpop.permute.xlu1 %2563 }
 0xb76   :  { %2583 = vst.msk [vmem:[#allocation2 + $0x10] sm:$0x3f] %vm2582_vm4, %v2577_v1  ;;  %v2480_v13 = vpop.permute.xlu0 %2479 }
 0xb77   :  { %2607 = vst.msk [vmem:[#allocation2 + $0x10] sm:$0x1f] %vm2606_vm14, %v2601_v4 }
 0xb78   :  { %2569 = vst.msk [vmem:[#allocation2 + $0x20] sm:$0xff] %vm2556_vm9, %v2564_v12  ;;  %v2925_v12 = vld [vmem:[%s5592_s19] sm:$0xff]  ;;  %vm2848_vm9 = vcmask 523520  }
 0xb79   :  { %2484 = vst.msk [vmem:[#allocation2 + $0x30] sm:$0xff] %vm1793_vm1, %v2480_v13  ;;  %v2588_v16 = vpop.permute.xlu1 %2587  ;;  %v2626_v18 = vld [vmem:[#allocation2] sm:$0xff]  ;;  %v2926_v13 = vld [vmem:[%s5592_s19 + $0x8] sm:$0xff]  ;;  %vm2867_vm1 = vcmask 785920  }
 0xb7a   :  { %v2503_v17 = vpop.permute.xlu0 %2502  ;;  %2593 = vst.msk [vmem:[#allocation2 + $0x20] sm:$0xff] %vm2580_vm12, %v2588_v16  ;;  %2729 = vmatmul.mubr.f32.vlgmr.msra.gmra.mrb[18].mxu0 %v2626_v18  ;;  %2810 = vst [vmem:[#allocation2] sm:$0xff] %v4076_v0  ;;  %v2927_v16 = vld [vmem:[%s5592_s19 + $0x10] sm:$0xff]  ;;  %v2928_v18 = vld [vmem:[%s5592_s19 + $0x18] sm:$0xff]  ;;  %vm2889_vm12 = vcmask 1047296  }
 0xb7b   :  { %2507 = vst.msk [vmem:[#allocation2 + $0x30] sm:$0xff] %vm1812_vm0, %v2503_v17  ;;  %3420 = vmatprep.mubr.msk.f32.mxu0 %vm1327_vm10, %v5133_v28  ;;  %v3796_v17 = vpack.c.bf16 %v2926_v13, %v2925_v12  ;;  %vm2908_vm0 = vcmask 259072  }
 0xb7d   :  { %v2612_v19 = vpop.permute.xlu1 %2611  ;;  %3797 = vmatpush1.bf16.msra.mxu1 %v3796_v17 }
 0xb7e   :  { %v2526_v20 = vpop.permute.xlu0 %2525  ;;  %v2628_v21 = vld [vmem:[#allocation2 + $0x10] sm:$0xff]  ;;  %2617 = vst.msk [vmem:[#allocation2 + $0x20] sm:$0xff] %vm2604_vm15, %v2612_v19  ;;  %v3799_v19 = vpack.c.bf16 %v2928_v18, %v2927_v16  ;;  %3798 = vmatprep.subr.bf16.mxu1 %v4088_v39  ;;  %vm3118_vm15 = vcmask 261121  }
 0xb7f   :  { %2530 = vst.msk [vmem:[#allocation2 + $0x30] sm:$0xff] %vm1832_vm3, %v2526_v20  ;;  %2734 = vmatmul.mubr.f32.gmra.mrb[20].mxu0 %v2628_v21  ;;  %2812 = vst [vmem:[#allocation2 + $0x10] sm:$0xff] %v4076_v0  ;;  %v2929_v20 = vld [vmem:[%s5592_s19 + $0x20] sm:$0xff]  ;;  %v2930_v21 = vld [vmem:[%s5592_s19 + $0x28] sm:$0xff]  ;;  %vm5651_vm3 = vcmask 1041408  }
 0xb80   :  { %2546 = vst.msk [vmem:[#allocation2 + $0x30] sm:$0xff] %vm1856_vm8, %v5257_v52  ;;  %3421 = vmatprep.mubr.msk.f32.mxu0 %vm1327_vm10, %v5193_v62  ;;  %vm5652_vm8 = vmmov %vm5651_vm3 }
 0xb81   :  { %2570 = vst.msk [vmem:[#allocation2 + $0x30] sm:$0x7f] %vm2558_vm11, %v2566_v3  ;;  %v2614_v22 = vpop.permute.xlu1 %2613  ;;  %v2418_v3 = vld [vmem:[%s5597_s24] sm:$0x1]  ;;  %3800 = vmatpush1.bf16.msra.mxu1 %v3799_v19 }
 0xb82   :  { %v2590_v23 = vpop.permute.xlu0 %2589  ;;  %3801 = vmatprep.subr.bf16.mxu1 %v4088_v39 }
 0xb83   :  { %2594 = vst.msk [vmem:[#allocation2 + $0x30] sm:$0x3f] %vm2582_vm4, %v2590_v23  ;;  %v2931_v23 = vld [vmem:[%s5592_s19 + $0x30] sm:$0xff] }
 0xb84   :  { %2618 = vst.msk [vmem:[#allocation2 + $0x30] sm:$0x1f] %vm2606_vm14, %v2614_v22  ;;  %v3802_v22 = vpack.c.bf16 %v2930_v21, %v2929_v20  ;;  %v2937_v20 = vld [vmem:[%s5592_s19 + $0x60] sm:$0xff]  ;;  %v2938_v21 = vld [vmem:[%s5592_s19 + $0x68] sm:$0xff] }
 0xb85   :  { %v2630_v24 = vld [vmem:[#allocation2 + $0x20] sm:$0xff] }
 0xb86   :  { %2739 = vmatmul.mubr.f32.gmra.mrb[22].mxu0 %v2630_v24  ;;  %2814 = vst [vmem:[#allocation2 + $0x20] sm:$0xff] %v4076_v0  ;;  %v2932_v24 = vld [vmem:[%s5592_s19 + $0x38] sm:$0xff]  ;;  %3803 = vmatpush1.bf16.msra.mxu1 %v3802_v22  ;;  %v2785_v22 = vld [vmem:[%s5591_s18] sm:$0x1] }
 0xb87   :  { %3422 = vmatprep.mubr.msk.f32.mxu0 %vm1327_vm10, %v5190_v61  ;;  %3804 = vmatprep.subr.bf16.mxu1 %v4088_v39  ;;  %vm2825_vm10 = vcmask 261122  }
 0xb8b   :  { %v2632_v25 = vld [vmem:[#allocation2 + $0x30] sm:$0xff] }
 0xb8c   :  { %2744 = vmatmul.mubr.f32.gmra.mrb[24].mxu0 %v2632_v25  ;;  %2816 = vst [vmem:[#allocation2 + $0x30] sm:$0xff] %v4076_v0  ;;  %v3805_v25 = vpack.c.bf16 %v2932_v24, %v2931_v23  ;;  %v3814_v23 = vpack.c.bf16 %v2938_v21, %v2937_v20 }
 0xb8e   :  { %3806 = vmatpush1.bf16.msra.mxu1 %v3805_v25 }
 0xb8f   :  { %3807 = vmatprep.subr.bf16.mxu1 %v4088_v39 }
 0xbb0   :  { %v3662_v26 = vpop.f32.mrb[14].mxu0 }
 0xbb1   :  { %v2383_v27 = vsel %vm330_vm13, %v3662_v26, 0.0  ;;  %v2363_v28 = vpop.f32.mrb[15].mxu0 }
 0xbb2   :  { %v2382_v29 = vsel %vm330_vm13, %v2363_v28, 0.0 }
 0xbb3   :  { %v2384_v30 = vadd.f32 %v2383_v27, %v2382_v29  ;;  %v2934_v27 = vld [vmem:[%s5592_s19 + $0x48] sm:$0xff]  ;;  %v2935_v29 = vld [vmem:[%s5592_s19 + $0x50] sm:$0xff] }
 0xbb4   :  { %v3665_v31 = vpop.f32.mrb[16].mxu0 }
 0xbb5   :  { %v2373_v32 = vpop.f32.mrb[17].mxu0  ;;  %v2387_v35 = vsel %vm330_vm13, %v3665_v31, 0.0 }
 0xbb6   :  { %v2385_v33 = vsel %vm330_vm13, %v2373_v32, 0.0 }
 0xbb7   :  { %v2386_v34 = vadd.f32 %v2385_v33, %v2384_v30  ;;  %v2936_v30 = vld [vmem:[%s5592_s19 + $0x58] sm:$0xff] }
 0xbb9   :  { %v2388_v36 = vadd.f32 %v2387_v35, %v2386_v34 }
 0xbbb   :  { %v2389_v37 = vrot.slane %v2388_v36, 4 }
 0xbbd   :  { %v2390_v38 = vadd.f32 %v2389_v37, %v2388_v36 }
 0xbbf   :  { %v2391_v48 = vrot.slane %v2390_v38, 2 }
 0xbc1   :  { %v2392_v49 = vadd.f32 %v2391_v48, %v2390_v38 }
 0xbc3   :  { %v2393_v50 = vrot.slane %v2392_v49, 1 }
 0xbc5   :  { %v2394_v60 = vadd.f32 %v2393_v50, %v2392_v49 }
 0xbc7   :  { %v2395_v61 = vmul.f32 0.03125, %v2394_v60 }
 0xbc9   :  { %v2396_v62 = vsub.f32 %v2363_v28, %v2395_v61  ;;  %v2397_v2 = vsub.f32 %v3662_v26, %v2395_v61  ;;  %v2398_v63 = vsub.f32 %v2373_v32, %v2395_v61  ;;  %v2399_v14 = vsub.f32 %v3665_v31, %v2395_v61  ;;  %v2933_v26 = vld [vmem:[%s5592_s19 + $0x40] sm:$0xff] }
 0xbca   :  { %v3808_v28 = vpack.c.bf16 %v2934_v27, %v2933_v26  ;;  %v3811_v31 = vpack.c.bf16 %v2936_v30, %v2935_v29  ;;  %v2939_v26 = vld [vmem:[%s5592_s19 + $0x70] sm:$0xff]  ;;  %v2940_v27 = vld [vmem:[%s5592_s19 + $0x78] sm:$0xff]  ;;  %v3423_v30 = vld [vmem:[%s5591_s18 + $0x1] ss:$0 sm:$0xff] }
 0xbcb   :  { %v2400_v41 = vmul.f32 %v2396_v62, %v2396_v62  ;;  %v2401_v51 = vmul.f32 %v2397_v2, %v2397_v2  ;;  %v2402_v42 = vmul.f32 %v2398_v63, %v2398_v63  ;;  %v2403_v15 = vmul.f32 %v2399_v14, %v2399_v14 }
 0xbcc   :  { %3809 = vmatpush1.bf16.msra.mxu1 %v3808_v28  ;;  %v3817_v29 = vpack.c.bf16 %v2940_v27, %v2939_v26 }
 0xbcd   :  { %v2404_v43 = vsel %vm330_vm13, %v2400_v41, 0.0  ;;  %v2405_v44 = vsel %vm330_vm13, %v2401_v51, 0.0  ;;  %v2407_v46 = vsel %vm330_vm13, %v2402_v42, 0.0  ;;  %v2409_v52 = vsel %vm330_vm13, %v2403_v15, 0.0  ;;  %3810 = vmatprep.subr.bf16.mxu1 %v4088_v39 }
 0xbce   :  { %v2406_v45 = vadd.f32 %v2405_v44, %v2404_v43 }
 0xbd0   :  { %v2408_v47 = vadd.f32 %v2407_v46, %v2406_v45  ;;  %3812 = vmatpush1.bf16.msra.mxu1 %v3811_v31 }
 0xbd1   :  { %3813 = vmatprep.subr.bf16.mxu1 %v4088_v39 }
 0xbd2   :  { %v2410_v53 = vadd.f32 %v2409_v52, %v2408_v47 }
 0xbd4   :  { %v2411_v54 = vrot.slane %v2410_v53, 4  ;;  %3815 = vmatpush1.bf16.msra.mxu1 %v3814_v23 }
 0xbd5   :  { %3816 = vmatprep.subr.bf16.mxu1 %v4088_v39 }
 0xbd6   :  { %v2412_v55 = vadd.f32 %v2411_v54, %v2410_v53 }
 0xbd8   :  { %v2413_v56 = vrot.slane %v2412_v55, 2  ;;  %3818 = vmatpush1.bf16.msra.mxu1 %v3817_v29 }
 0xbd9   :  { %3819 = vmatprep.subr.bf16.mxu1 %v4088_v39 }
 0xbda   :  { %v2414_v57 = vadd.f32 %v2413_v56, %v2412_v55 }
 0xbdc   :  { %v2415_v40 = vrot.slane %v2414_v57, 1 }
 0xbde   :  { %v2416_v58 = vadd.f32 %v2415_v40, %v2414_v57 }
 0xbe0   :  { %v2417_v59 = vmul.f32 0.03125, %v2416_v58 }
 0xbe2   :  { %v2419_v1 = vadd.f32 1e-05, %v2417_v59 }
 0xbe4   :  { %3896 = vrsqrt.f32 %v2419_v1 }
 0xbee   :  { %v3897_v4 = vpop.eup %3896 }
 0xbef   :  { %v2421_v5 = vmul.f32 %v3897_v4, %v2418_v3 }
 0xbf1   :  { %v2425_v6 = vrot.slane %v2421_v5, %v4537_v10 }
 0xbf3   :  { %v5304_v7 = vmul.f32 %v2425_v6, %v2396_v62  ;;  %v5306_v8 = vmul.f32 %v2425_v6, %v2397_v2  ;;  %v5308_v9 = vmul.f32 %v2425_v6, %v2398_v63  ;;  %v5310_v11 = vmul.f32 %v2425_v6, %v2399_v14 }
 0xc4d   :  { %v2730_v32 = vpop.f32.mrb[18].mxu0 }
 0xc4e   :  { %v2732_v33 = vpop.f32.mrb[19].mxu0  ;;  %v2749_v35 = vsel %vm330_vm13, %v2730_v32, 0.0 }
 0xc52   :  { %v2735_v34 = vpop.f32.mrb[20].mxu0 }
 0xc53   :  { %v2750_v36 = vsel %vm330_vm13, %v2735_v34, 0.0  ;;  %v2737_v37 = vpop.f32.mrb[21].mxu0 }
 0xc54   :  { %v2751_v38 = vadd.f32 %v2750_v36, %v2749_v35 }
 0xc59   :  { %v2740_v48 = vpop.f32.mrb[22].mxu0 }
 0xc5a   :  { %v2752_v49 = vsel %vm330_vm13, %v2740_v48, 0.0  ;;  %v2742_v50 = vpop.f32.mrb[23].mxu0 }
 0xc5b   :  { %v2753_v60 = vadd.f32 %v2752_v49, %v2751_v38  ;;  %v2942_v49 = vld [vmem:[%s5592_s19 + $0x88] sm:$0xff] }
 0xc5f   :  { %v2745_v61 = vpop.f32.mrb[24].mxu0 }
 0xc60   :  { %v2754_v62 = vsel %vm330_vm13, %v2745_v61, 0.0  ;;  %v2747_v2 = vpop.f32.mrb[25].mxu0 }
 0xc61   :  { %v2755_v63 = vadd.f32 %v2754_v62, %v2753_v60 }
 0xc63   :  { %v2756_v14 = vrot.slane %v2755_v63, 4 }
 0xc65   :  { %v2757_v41 = vadd.f32 %v2756_v14, %v2755_v63 }
 0xc67   :  { %v2758_v51 = vrot.slane %v2757_v41, 2 }
 0xc69   :  { %v2759_v42 = vadd.f32 %v2758_v51, %v2757_v41 }
 0xc6b   :  { %v2760_v15 = vrot.slane %v2759_v42, 1 }
 0xc6d   :  { %v2761_v43 = vadd.f32 %v2760_v15, %v2759_v42 }
 0xc6f   :  { %v2762_v44 = vmul.f32 0.03125, %v2761_v43 }
 0xc71   :  { %v2763_v45 = vsub.f32 %v2730_v32, %v2762_v44  ;;  %v2764_v46 = vsub.f32 %v2735_v34, %v2762_v44  ;;  %v2765_v47 = vsub.f32 %v2740_v48, %v2762_v44  ;;  %v2766_v52 = vsub.f32 %v2745_v61, %v2762_v44  ;;  %v2941_v48 = vld [vmem:[%s5592_s19 + $0x80] sm:$0xff] }
 0xc72   :  { %v3820_v50 = vpack.c.bf16 %v2942_v49, %v2941_v48  ;;  %v3176_v48 = vld [vmem:[%s5594_s21 + $0x18] sm:$0xff] }
 0xc73   :  { %v2767_v53 = vmul.f32 %v2763_v45, %v2763_v45  ;;  %v2768_v54 = vmul.f32 %v2764_v46, %v2764_v46  ;;  %v2769_v55 = vmul.f32 %v2765_v47, %v2765_v47  ;;  %v2770_v56 = vmul.f32 %v2766_v52, %v2766_v52 }
 0xc74   :  { %3821 = vmatpush1.bf16.msra.mxu1 %v3820_v50 }
 0xc75   :  { %v2771_v57 = vsel %vm330_vm13, %v2767_v53, 0.0  ;;  %v2772_v40 = vsel %vm330_vm13, %v2768_v54, 0.0  ;;  %v2774_v59 = vsel %vm330_vm13, %v2769_v55, 0.0  ;;  %v2776_v3 = vsel %vm330_vm13, %v2770_v56, 0.0  ;;  %3822 = vmatprep.subr.bf16.mxu1 %v4088_v39 }
 0xc76   :  { %v2773_v58 = vadd.f32 %v2772_v40, %v2771_v57 }
 0xc78   :  { %v2775_v1 = vadd.f32 %v2774_v59, %v2773_v58 }
 0xc7a   :  { %v2777_v4 = vadd.f32 %v2776_v3, %v2775_v1 }
 0xc7c   :  { %v2778_v5 = vrot.slane %v2777_v4, 4 }
 0xc7e   :  { %v2779_v6 = vadd.f32 %v2778_v5, %v2777_v4 }
 0xc80   :  { %v2780_v12 = vrot.slane %v2779_v6, 2 }
 0xc82   :  { %v2781_v13 = vadd.f32 %v2780_v12, %v2779_v6 }
 0xc84   :  { %v2782_v16 = vrot.slane %v2781_v13, 1 }
 0xc86   :  { %v2783_v17 = vadd.f32 %v2782_v16, %v2781_v13 }
 0xc88   :  { %v2784_v18 = vmul.f32 0.03125, %v2783_v17 }
 0xc8a   :  { %v2786_v19 = vadd.f32 1e-05, %v2784_v18 }
 0xc8c   :  { %3898 = vrsqrt.f32 %v2786_v19 }
 0xc96   :  { %v3899_v24 = vpop.eup %3898 }
 0xc97   :  { %v2788_v25 = vmul.f32 %v3899_v24, %v2785_v22 }
 0xc99   :  { %v2792_v28 = vrot.slane %v2788_v25, %v4537_v10 }
 0xc9b   :  { %v2795_v31 = vmul.f32 %v2792_v28, %v2765_v47  ;;  %v2796_v32 = vmul.f32 %v2792_v28, %v2766_v52  ;;  %v2794_v33 = vmul.f32 %v2792_v28, %v2764_v46  ;;  %v2793_v34 = vmul.f32 %v2792_v28, %v2763_v45  ;;  %v2943_v45 = vld [vmem:[%s5592_s19 + $0x90] sm:$0xff]  ;;  %v2944_v46 = vld [vmem:[%s5592_s19 + $0x98] sm:$0xff] }
 0xc9c   :  { %v3823_v1 = vpack.c.bf16 %v2944_v46, %v2943_v45 }
 0xc9d   :  { %v2804_v35 = vadd.f32 %v3423_v30, %v2795_v31  ;;  %v2805_v36 = vadd.f32 %v3423_v30, %v2796_v32  ;;  %v2803_v37 = vadd.f32 %v3423_v30, %v2794_v33  ;;  %v2802_v38 = vadd.f32 %v3423_v30, %v2793_v34 }
 0xc9e   :  { %3824 = vmatpush1.bf16.msra.mxu1 %v3823_v1 }
 0xc9f   :  { %v2808_v60 = vmax.f32 %v2804_v35, 0.0  ;;  %v5389_v61 = vmax.f32 %v2805_v36, 0.0  ;;  %v2807_v62 = vmax.f32 %v2803_v37, 0.0  ;;  %v2806_v2 = vmax.f32 %v2802_v38, 0.0  ;;  %v3173_v35 = vld [vmem:[%s5594_s21] sm:$0xff]  ;;  %v3174_v36 = vld [vmem:[%s5594_s21 + $0x8] sm:$0xff] }
 0xca0   :  { %v3175_v37 = vld [vmem:[%s5594_s21 + $0x10] sm:$0xff]  ;;  %v3825_v38 = vpack.c.bf16 %v3174_v36, %v3173_v35 }
 0xca1   :  { %v2911_v63 = vrot.slane %v5389_v61, 2  ;;  %2863 = vrot.lane.b32.xlu0 %v2807_v62, %s4087_s3  ;;  %2861 = vrot.lane.b32.xlu1 %v2806_v2, %s4087_s3  ;;  %v2879_v14 = vrot.slane %v2807_v62, 1  ;;  %v2837_v41 = vrot.slane %v2806_v2, 7  ;;  %v2878_v51 = vrot.slane %v2806_v2, 1 }
 0xca2   :  { %v2838_v42 = vrot.slane %v2807_v62, 7  ;;  %v2902_v15 = vrot.slane %v2806_v2, 2  ;;  %v2903_v43 = vrot.slane %v2807_v62, 2  ;;  %v2850_v44 = vrot.slane %v2808_v60, 7  ;;  %3826 = vmatprep.subr.bf16.mxu0 %v3825_v38 }
 0xca3   :  { %v2880_v47 = vsel %vm445_vm6, %v2878_v51, %v2879_v14  ;;  %v2891_v52 = vrot.slane %v2808_v60, 1  ;;  %v2892_v53 = vrot.slane %v5389_v61, 1  ;;  %v2851_v54 = vrot.slane %v5389_v61, 7  ;;  %2916 = vst.msk [vmem:[#allocation2 + $0x38] sm:$0x3f] %vm2908_vm0, %v2911_v63  ;;  %3828 = vmatpush3.bf16.msra.mxu0 %v3825_v38 }
 0xca4   :  { %v2839_v55 = vsel %vm403_vm2, %v2837_v41, %v2838_v42  ;;  %v2904_v39 = vsel %vm470_vm7, %v2902_v15, %v2903_v43  ;;  %v2820_v56 = vrot.slane %v2806_v2, 6  ;;  %v2821_v57 = vrot.slane %v2807_v62, 6  ;;  %2909 = vst.msk [vmem:[#allocation2 + $0x18] sm:$0x3f] %vm2908_vm0, %v2903_v43 }
 0xca5   :  { %2883 = vrot.lane.b32.xlu1 %v2879_v14, %s4090_s4  ;;  %2840 = vrot.lane.b32.xlu0 %v2837_v41, %s4083_s27  ;;  %2907 = vst.msk [vmem:[#allocation2 + $0x8] sm:$0xff] %vm330_vm13, %v2904_v39  ;;  %v2893_v40 = vsel %vm445_vm6, %v2891_v52, %v2892_v53  ;;  %v2852_v58 = vsel %vm403_vm2, %v2850_v44, %v2851_v54  ;;  %v2830_v59 = vrot.slane %v2808_v60, 6  ;;  %v2831_v4 = vrot.slane %v5389_v61, 6 }
 0xca6   :  { %2826 = vst.msk [vmem:[#allocation2] sm:$0xfc] %vm2825_vm10, %v2820_v56  ;;  %v2822_v3 = vsel %vm5651_vm3, %v2820_v56, %v2821_v57  ;;  %v2910_v5 = vrot.slane %v2808_v60, 2  ;;  %v3829_v49 = vpack.c.bf16 %v3176_v48, %v3175_v37  ;;  %v3428_v37 = vld [vmem:[%s5593_s20 + $0x1] ss:$0 sm:$0xff] }
 0xca7   :  { %2827 = vst.msk [vmem:[#allocation2 + $0x10] sm:$0xff] %vm330_vm13, %v2822_v3  ;;  %v2832_v6 = vsel %vm5652_vm8, %v2830_v59, %v2831_v4 }
 0xca8   :  { %2835 = vst.msk [vmem:[#allocation2 + $0x20] sm:$0xfc] %vm2825_vm10, %v2830_v59  ;;  %v2912_v12 = vsel %vm470_vm7, %v2910_v5, %v2911_v63  ;;  %vm2846_vm7 = vcmask 523521   ;;  %3830 = vmatprep.subr.bf16.mxu0 %v3829_v49 }
 0xca9   :  { %2881 = vrot.lane.b32.xlu0 %v2880_v47, %s4090_s4  ;;  %2842 = vrot.lane.b32.xlu1 %v2839_v55, %s4083_s27  ;;  %2836 = vst.msk [vmem:[#allocation2 + $0x30] sm:$0xff] %vm330_vm13, %v2832_v6  ;;  %2915 = vst.msk [vmem:[#allocation2 + $0x28] sm:$0xff] %vm330_vm13, %v2912_v12 }
 0xcaa   :  { %v2924_v13 = vld [vmem:[#allocation2 + $0x38] sm:$0xff]  ;;  %3832 = vmatpush3.bf16.msra.mxu0 %v3829_v49 }
 0xcab   :  { %v2920_v16 = vld [vmem:[#allocation2 + $0x18] sm:$0xff]  ;;  %3110 = vst.msk [vmem:[#allocation2 + $0x38] sm:$0xff] %vm330_vm13, %v4076_v0 }
 0xcac   :  { %v2918_v17 = vld [vmem:[#allocation2 + $0x8] sm:$0xff]  ;;  %3106 = vst.msk [vmem:[#allocation2 + $0x18] sm:$0xff] %vm330_vm13, %v4076_v0 }
 0xcad   :  { %3424 = vmatprep.mubr.msk.f32.mxu1 %vm330_vm13, %v2918_v17  ;;  %3104 = vst.msk [vmem:[#allocation2 + $0x8] sm:$0xff] %vm330_vm13, %v4076_v0  ;;  %2853 = vrot.lane.b32.xlu0 %v2850_v44, %s4083_s27 }
 0xcae   :  { %2870 = vrot.lane.b32.xlu1 %v2808_v60, %s4087_s3 }
 0xcb0   :  { %v2922_v18 = vld [vmem:[#allocation2 + $0x28] sm:$0xff] }
 0xcb1   :  { %2894 = vrot.lane.b32.xlu0 %v2893_v40, %s4090_s4  ;;  %3108 = vst.msk [vmem:[#allocation2 + $0x28] sm:$0xff] %vm330_vm13, %v4076_v0 }
 0xcb2   :  { %2855 = vrot.lane.b32.xlu1 %v2852_v58, %s4083_s27 }
 0xcb5   :  { %2872 = vrot.lane.b32.xlu0 %v5389_v61, %s4087_s3 }
 0xcb6   :  { %2896 = vrot.lane.b32.xlu1 %v2892_v53, %s4090_s4 }
 0xd13   :  { %v2864_v19 = vpop.permute.xlu0 %2863  ;;  %v2862_v20 = vpop.permute.xlu1 %2861 }
 0xd17   :  { %v2884_v21 = vpop.permute.xlu1 %2883  ;;  %v2841_v22 = vpop.permute.xlu0 %2840 }
 0xd18   :  { %2847 = vst.msk [vmem:[#allocation2] sm:$0xfe] %vm2846_vm7, %v2841_v22 }
 0xd19   :  { %2868 = vst.msk [vmem:[#allocation2] sm:$0xff] %vm2867_vm1, %v2862_v20 }
 0xd1b   :  { %v2882_v23 = vpop.permute.xlu0 %2881  ;;  %v2843_v24 = vpop.permute.xlu1 %2842 }
 0xd1c   :  { %2888 = vst.msk [vmem:[#allocation2] sm:$0xff] %vm2887_vm5, %v2882_v23 }
 0xd1d   :  { %2849 = vst.msk [vmem:[#allocation2 + $0x10] sm:$0xff] %vm2848_vm9, %v2843_v24 }
 0xd1e   :  { %2869 = vst.msk [vmem:[#allocation2 + $0x10] sm:$0xff] %vm2867_vm1, %v2864_v19 }
 0xd1f   :  { %2890 = vst.msk [vmem:[#allocation2 + $0x10] sm:$0x7f] %vm2889_vm12, %v2884_v21  ;;  %v2854_v25 = vpop.permute.xlu0 %2853 }
 0xd20   :  { %2859 = vst.msk [vmem:[#allocation2 + $0x20] sm:$0xfe] %vm2846_vm7, %v2854_v25  ;;  %v2871_v26 = vpop.permute.xlu1 %2870 }
 0xd21   :  { %2876 = vst.msk [vmem:[#allocation2 + $0x20] sm:$0xff] %vm2867_vm1, %v2871_v26 }
 0xd23   :  { %v2895_v27 = vpop.permute.xlu0 %2894  ;;  %v2917_v28 = vld [vmem:[#allocation2] sm:$0xff] }
 0xd24   :  { %2900 = vst.msk [vmem:[#allocation2 + $0x20] sm:$0xff] %vm2887_vm5, %v2895_v27  ;;  %v2856_v29 = vpop.permute.xlu1 %2855  ;;  %3022 = vmatmul.mubr.f32.vlgmr.msra.gmra.mrb[18].mxu1 %v2917_v28  ;;  %3103 = vst [vmem:[#allocation2] sm:$0xff] %v4076_v0  ;;  %v3078_v27 = vld [vmem:[%s5593_s20] sm:$0x1] }
 0xd25   :  { %2860 = vst.msk [vmem:[#allocation2 + $0x30] sm:$0xff] %vm2848_vm9, %v2856_v29  ;;  %3425 = vmatprep.mubr.msk.f32.mxu1 %vm330_vm13, %v2920_v16  ;;  %v3177_v28 = vld [vmem:[%s5594_s21 + $0x20] sm:$0xff]  ;;  %v3178_v29 = vld [vmem:[%s5594_s21 + $0x28] sm:$0xff] }
 0xd26   :  { %v2919_v30 = vld [vmem:[#allocation2 + $0x10] sm:$0xff] }
 0xd27   :  { %3105 = vst [vmem:[#allocation2 + $0x10] sm:$0xff] %v4076_v0  ;;  %v2873_v31 = vpop.permute.xlu0 %2872 }
 0xd28   :  { %2877 = vst.msk [vmem:[#allocation2 + $0x30] sm:$0xff] %vm2867_vm1, %v2873_v31  ;;  %v2897_v32 = vpop.permute.xlu1 %2896  ;;  %3027 = vmatmul.mubr.f32.gmra.mrb[20].mxu1 %v2919_v30  ;;  %v3833_v30 = vpack.c.bf16 %v3178_v29, %v3177_v28 }
 0xd29   :  { %2901 = vst.msk [vmem:[#allocation2 + $0x30] sm:$0x7f] %vm2889_vm12, %v2897_v32  ;;  %3426 = vmatprep.mubr.msk.f32.mxu1 %vm330_vm13, %v2922_v18 }
 0xd2a   :  { %3834 = vmatprep.subr.bf16.mxu0 %v3833_v30 }
 0xd2b   :  { %v2921_v33 = vld [vmem:[#allocation2 + $0x20] sm:$0xff]  ;;  %3836 = vmatpush3.bf16.msra.mxu0 %v3833_v30 }
 0xd2c   :  { %3032 = vmatmul.mubr.f32.gmra.mrb[22].mxu1 %v2921_v33  ;;  %3107 = vst [vmem:[#allocation2 + $0x20] sm:$0xff] %v4076_v0  ;;  %v3179_v33 = vld [vmem:[%s5594_s21 + $0x30] sm:$0xff] }
 0xd2d   :  { %3427 = vmatprep.mubr.msk.f32.mxu1 %vm330_vm13, %v2924_v13 }
 0xd30   :  { %v2923_v34 = vld [vmem:[#allocation2 + $0x30] sm:$0xff] }
 0xd31   :  { %3037 = vmatmul.mubr.f32.gmra.mrb[24].mxu1 %v2923_v34  ;;  %3109 = vst [vmem:[#allocation2 + $0x30] sm:$0xff] %v4076_v0  ;;  %v3180_v34 = vld [vmem:[%s5594_s21 + $0x38] sm:$0xff] }
 0xd32   :  { %v3837_v36 = vpack.c.bf16 %v3180_v34, %v3179_v33 }
 0xd34   :  { %3838 = vmatprep.subr.bf16.mxu0 %v3837_v36 }
 0xd35   :  { %3840 = vmatpush3.bf16.msra.mxu0 %v3837_v36 }
 0xdf7   :  { %v3023_v0 = vpop.f32.mrb[18].mxu1 }
 0xdf8   :  { %v3025_v50 = vpop.f32.mrb[19].mxu1  ;;  %v3042_v61 = vsel %vm330_vm13, %v3023_v0, 0.0 }
 0xdf9   :  { %v3181_v50 = vld [vmem:[%s5594_s21 + $0x40] sm:$0xff] }
 0xdfb   :  { %v3028_v60 = vpop.f32.mrb[20].mxu1 }
 0xdfc   :  { %v3043_v62 = vsel %vm330_vm13, %v3028_v60, 0.0  ;;  %v3030_v2 = vpop.f32.mrb[21].mxu1 }
 0xdfd   :  { %v3044_v63 = vadd.f32 %v3043_v62, %v3042_v61 }
 0xdff   :  { %v3033_v14 = vpop.f32.mrb[22].mxu1 }
 0xe00   :  { %v3045_v41 = vsel %vm330_vm13, %v3033_v14, 0.0  ;;  %v3035_v51 = vpop.f32.mrb[23].mxu1 }
 0xe01   :  { %v3046_v42 = vadd.f32 %v3045_v41, %v3044_v63 }
 0xe04   :  { %v3038_v15 = vpop.f32.mrb[24].mxu1 }
 0xe05   :  { %v3047_v43 = vsel %vm330_vm13, %v3038_v15, 0.0  ;;  %v3040_v44 = vpop.f32.mrb[25].mxu1 }
 0xe06   :  { %v3048_v45 = vadd.f32 %v3047_v43, %v3046_v42  ;;  %v3183_v43 = vld [vmem:[%s5594_s21 + $0x50] sm:$0xff]  ;;  %v3184_v44 = vld [vmem:[%s5594_s21 + $0x58] sm:$0xff] }
 0xe08   :  { %v3049_v46 = vrot.slane %v3048_v45, 4 }
 0xe0a   :  { %v3050_v47 = vadd.f32 %v3049_v46, %v3048_v45 }
 0xe0c   :  { %v3051_v52 = vrot.slane %v3050_v47, 2 }
 0xe0e   :  { %v3052_v53 = vadd.f32 %v3051_v52, %v3050_v47 }
 0xe10   :  { %v3053_v54 = vrot.slane %v3052_v53, 1 }
 0xe12   :  { %v3054_v55 = vadd.f32 %v3053_v54, %v3052_v53 }
 0xe14   :  { %v3055_v39 = vmul.f32 0.03125, %v3054_v55 }
 0xe16   :  { %v3056_v56 = vsub.f32 %v3023_v0, %v3055_v39  ;;  %v3057_v57 = vsub.f32 %v3028_v60, %v3055_v39  ;;  %v3058_v40 = vsub.f32 %v3033_v14, %v3055_v39  ;;  %v3059_v58 = vsub.f32 %v3038_v15, %v3055_v39  ;;  %v3182_v60 = vld [vmem:[%s5594_s21 + $0x48] sm:$0xff] }
 0xe17   :  { %v3841_v14 = vpack.c.bf16 %v3182_v60, %v3181_v50 }
 0xe18   :  { %v3060_v59 = vmul.f32 %v3056_v56, %v3056_v56  ;;  %v3061_v1 = vmul.f32 %v3057_v57, %v3057_v57  ;;  %v3062_v3 = vmul.f32 %v3058_v40, %v3058_v40  ;;  %v3063_v4 = vmul.f32 %v3059_v58, %v3059_v58 }
 0xe19   :  { %3842 = vmatprep.subr.bf16.mxu0 %v3841_v14 }
 0xe1a   :  { %v3064_v5 = vsel %vm330_vm13, %v3060_v59, 0.0  ;;  %v3065_v6 = vsel %vm330_vm13, %v3061_v1, 0.0  ;;  %v3067_v13 = vsel %vm330_vm13, %v3062_v3, 0.0  ;;  %v3069_v17 = vsel %vm330_vm13, %v3063_v4, 0.0  ;;  %3844 = vmatpush3.bf16.msra.mxu0 %v3841_v14 }
 0xe1b   :  { %v3066_v12 = vadd.f32 %v3065_v6, %v3064_v5 }
 0xe1d   :  { %v3068_v16 = vadd.f32 %v3067_v13, %v3066_v12 }
 0xe1f   :  { %v3070_v18 = vadd.f32 %v3069_v17, %v3068_v16 }
 0xe21   :  { %v3071_v19 = vrot.slane %v3070_v18, 4 }
 0xe23   :  { %v3072_v20 = vadd.f32 %v3071_v19, %v3070_v18 }
 0xe25   :  { %v3073_v21 = vrot.slane %v3072_v20, 2 }
 0xe27   :  { %v3074_v22 = vadd.f32 %v3073_v21, %v3072_v20 }
 0xe29   :  { %v3075_v23 = vrot.slane %v3074_v22, 1 }
 0xe2b   :  { %v3076_v24 = vadd.f32 %v3075_v23, %v3074_v22 }
 0xe2d   :  { %v3077_v25 = vmul.f32 0.03125, %v3076_v24 }
 0xe2f   :  { %v3079_v26 = vadd.f32 1e-05, %v3077_v25 }
 0xe31   :  { %3900 = vrsqrt.f32 %v3079_v26 }
 0xe3b   :  { %v3901_v31 = vpop.eup %3900 }
 0xe3c   :  { %v3081_v32 = vmul.f32 %v3901_v31, %v3078_v27 }
 0xe3e   :  { %v3085_v35 = vrot.slane %v3081_v32, %v4537_v10 }
 0xe40   :  { %v3089_v38 = vmul.f32 %v3085_v35, %v3059_v58  ;;  %v3087_v48 = vmul.f32 %v3085_v35, %v3057_v57  ;;  %v3086_v49 = vmul.f32 %v3085_v35, %v3056_v56  ;;  %v3088_v0 = vmul.f32 %v3085_v35, %v3058_v40 }
 0xe41   :  { %v3845_v40 = vpack.c.bf16 %v3184_v44, %v3183_v43 }
 0xe42   :  { %v3098_v61 = vadd.f32 %v3428_v37, %v3089_v38  ;;  %v3096_v62 = vadd.f32 %v3428_v37, %v3087_v48  ;;  %v3095_v2 = vadd.f32 %v3428_v37, %v3086_v49  ;;  %v3097_v63 = vadd.f32 %v3428_v37, %v3088_v0 }
 0xe43   :  { %3846 = vmatprep.subr.bf16.mxu0 %v3845_v40 }
 0xe44   :  { %v3102_v41 = vmax.f32 %v3098_v61, 0.0  ;;  %v3100_v51 = vmax.f32 %v3096_v62, 0.0  ;;  %v3099_v42 = vmax.f32 %v3095_v2, 0.0  ;;  %v3101_v15 = vmax.f32 %v3097_v63, 0.0  ;;  %3848 = vmatpush3.bf16.msra.mxu0 %v3845_v40  ;;  %v3418_v40 = vld [vmem:[%s5597_s24 + $0x1] ss:$0 sm:$0xff] }
 0xe45   :  { %s4092_s24 = smov [#allocation14]  }
 0xe46   :  { %v3124_v45 = vrot.slane %v3102_v41, 7  ;;  %3132 = vrot.lane.b32.xlu1 %v3100_v51, %s4083_s27  ;;  %v3114_v46 = vrot.slane %v3100_v51, 7  ;;  %3130 = vrot.lane.b32.xlu0 %v3099_v42, %s4083_s27  ;;  %v3113_v47 = vrot.slane %v3099_v42, 7  ;;  %v3123_v52 = vrot.slane %v3101_v15, 7  ;;  %s3357_s9 = sshll.u32 %s4092_s24, 4  ;;  %s3358_s9 = int_to_ptr.vmem [resolvable:$true] %s3357_s9 }
 0xe47   :  { %v3147_v53 = vrot.slane %v3100_v51, 1  ;;  %v3146_v54 = vrot.slane %v3099_v42, 1  ;;  %v3159_v55 = vrot.slane %v3102_v41, 1  ;;  %v3158_v39 = vrot.slane %v3101_v15, 1  ;;  %s4036_s26 = scalar_lea.vmem %s3358_s9, 512  ;;  %p4041_p7 = scmp.lt.s32.totalorder %s3358_s9, %s3358_s9 }
 0xe48   :  { %v3115_v56 = vsel %vm403_vm2, %v3113_v47, %v3114_v46  ;;  %3119 = vst.msk [vmem:[#allocation2] sm:$0xfe] %vm3118_vm15, %v3113_v47  ;;  %3128 = vst.msk [vmem:[#allocation2 + $0x20] sm:$0xfe] %vm3118_vm15, %v3123_v52  ;;  %v3125_v57 = vsel %vm403_vm2, %v3123_v52, %v3124_v45  ;;  %vm3156_vm2 = vcmask 784896   ;;  %p4037_p6 = scmp.ne.s32.totalorder %s3358_s9, %s4036_s26  ;;  %p4042_p8 = scmp.lt.s32.totalorder %s4036_s26, %s4036_s26 }
 0xe49   :  { %v3148_v58 = vsel %vm445_vm6, %v3146_v54, %v3147_v53  ;;  %v3160_v59 = vsel %vm445_vm6, %v3158_v39, %v3159_v55  ;;  %3120 = vst.msk [vmem:[#allocation2 + $0x10] sm:$0xff] %vm330_vm13, %v3115_v56  ;;  %3129 = vst.msk [vmem:[#allocation2 + $0x30] sm:$0xff] %vm330_vm13, %v3125_v57  ;;  %vm3185_vm6 = vcmask 785408  }
 0xe4a   :  { %3140 = vrot.lane.b32.xlu1 %v3102_v41, %s4083_s27  ;;  %3138 = vrot.lane.b32.xlu0 %v3101_v15, %s4083_s27  ;;  %p4043_p9 = por %p4042_p8, %p4041_p7 }
 0xe4c   :  { %p4044_p10 = pnand %p4043_p9, %p4037_p6 }
 0xe4e   :  { %3151 = vrot.lane.b32.xlu1 %v3147_v53, %s4087_s3  ;;  %3149 = vrot.lane.b32.xlu0 %v3148_v58, %s4087_s3 }
 0xe52   :  { %3163 = vrot.lane.b32.xlu1 %v3159_v55, %s4087_s3  ;;  %3161 = vrot.lane.b32.xlu0 %v3160_v59, %s4087_s3  ;;  %s5653_s3 = sld [smem:[#allocation30_spill]] }
 0xe58   :  { %v3319_v39 = vld [vmem:[%s5653_s3] sm:$0x1]  ;;  %v3433_v59 = vld [vmem:[%s5653_s3 + $0x1] ss:$0 sm:$0xff] }
 0xeb8   :  { %v3133_v1 = vpop.permute.xlu1 %3132  ;;  %v3131_v3 = vpop.permute.xlu0 %3130 }
 0xeb9   :  { %3137 = vst.msk [vmem:[#allocation2 + $0x10] sm:$0xff] %vm2848_vm9, %v3133_v1  ;;  %3136 = vst.msk [vmem:[#allocation2] sm:$0xff] %vm2848_vm9, %v3131_v3 }
 0xebc   :  { %v3141_v4 = vpop.permute.xlu1 %3140  ;;  %v3139_v5 = vpop.permute.xlu0 %3138 }
 0xebd   :  { %3145 = vst.msk [vmem:[#allocation2 + $0x30] sm:$0xff] %vm2848_vm9, %v3141_v4  ;;  %3144 = vst.msk [vmem:[#allocation2 + $0x20] sm:$0xff] %vm2848_vm9, %v3139_v5 }
 0xec0   :  { %v3152_v6 = vpop.permute.xlu1 %3151  ;;  %v3150_v12 = vpop.permute.xlu0 %3149 }
 0xec1   :  { %3157 = vst.msk [vmem:[#allocation2 + $0x10] sm:$0x7f] %vm3156_vm2, %v3152_v6  ;;  %v2435_v6 = vadd.f32 %v3418_v40, %v5304_v7 }
 0xec2   :  { %3155 = vst.msk [vmem:[#allocation2] sm:$0xff] %vm2867_vm1, %v3150_v12  ;;  %v2436_v12 = vadd.f32 %v3418_v40, %v5306_v8 }
 0xec4   :  { %v3164_v13 = vpop.permute.xlu1 %3163  ;;  %v3162_v16 = vpop.permute.xlu0 %3161 }
 0xec5   :  { %3168 = vst.msk [vmem:[#allocation2 + $0x30] sm:$0x7f] %vm3156_vm2, %v3164_v13  ;;  %v2437_v13 = vadd.f32 %v3418_v40, %v5308_v9 }
 0xec6   :  { %3167 = vst.msk [vmem:[#allocation2 + $0x20] sm:$0xff] %vm2867_vm1, %v3162_v16  ;;  %v2438_v16 = vadd.f32 %v3418_v40, %v5310_v11 }
 0xec8   :  { %v3170_v18 = vld [vmem:[#allocation2 + $0x10] sm:$0xff] }
 0xec9   :  { %v3169_v17 = vld [vmem:[#allocation2] sm:$0xff] }
 0xeca   :  { %3690 = vmatprep.mubr.msk.f32.mxu0 %vm3185_vm6, %v3169_v17 }
 0xecb   :  { %3691 = vmatmul.mubr.msk.f32.vlgmr.msra.gmra.mrb[26].mxu0 %vm3185_vm6, %v3170_v18 }
 0xecc   :  { %v3172_v20 = vld [vmem:[#allocation2 + $0x30] sm:$0xff] }
 0xecd   :  { %v3171_v19 = vld [vmem:[#allocation2 + $0x20] sm:$0xff] }
 0xece   :  { %3693 = vmatprep.mubr.msk.f32.mxu0 %vm3185_vm6, %v3171_v19 }
 0xecf   :  { %3694 = vmatmul.mubr.msk.f32.gmra.mrb[28].mxu0 %vm3185_vm6, %v3172_v20 }
 0xf9e   :  { %v3692_v21 = vpop.f32.mrb[26].mxu0 }
 0xf9f   :  { %v3284_v22 = vsel %vm330_vm13, %v3692_v21, 0.0  ;;  %v3264_v23 = vpop.f32.mrb[27].mxu0 }
 0xfa0   :  { %v3283_v24 = vsel %vm330_vm13, %v3264_v23, 0.0 }
 0xfa1   :  { %v3285_v25 = vadd.f32 %v3284_v22, %v3283_v24 }
 0xfa2   :  { %v3695_v26 = vpop.f32.mrb[28].mxu0 }
 0xfa3   :  { %v3274_v27 = vpop.f32.mrb[29].mxu0  ;;  %v3288_v30 = vsel %vm330_vm13, %v3695_v26, 0.0 }
 0xfa4   :  { %v3286_v28 = vsel %vm330_vm13, %v3274_v27, 0.0 }
 0xfa5   :  { %v3287_v29 = vadd.f32 %v3286_v28, %v3285_v25 }
 0xfa7   :  { %v3289_v31 = vadd.f32 %v3288_v30, %v3287_v29 }
 0xfa9   :  { %v3290_v32 = vrot.slane %v3289_v31, 4 }
 0xfab   :  { %v3291_v33 = vadd.f32 %v3290_v32, %v3289_v31 }
 0xfad   :  { %v3292_v34 = vrot.slane %v3291_v33, 2 }
 0xfaf   :  { %v3293_v35 = vadd.f32 %v3292_v34, %v3291_v33 }
 0xfb1   :  { %v3294_v36 = vrot.slane %v3293_v35, 1 }
 0xfb3   :  { %v3295_v37 = vadd.f32 %v3294_v36, %v3293_v35 }
 0xfb5   :  { %v3296_v38 = vmul.f32 0.03125, %v3295_v37 }
 0xfb7   :  { %v3297_v48 = vsub.f32 %v3264_v23, %v3296_v38  ;;  %v3298_v49 = vsub.f32 %v3692_v21, %v3296_v38  ;;  %v3299_v0 = vsub.f32 %v3274_v27, %v3296_v38  ;;  %v3300_v50 = vsub.f32 %v3695_v26, %v3296_v38 }
 0xfb9   :  { %v3301_v60 = vmul.f32 %v3297_v48, %v3297_v48  ;;  %v3302_v61 = vmul.f32 %v3298_v49, %v3298_v49  ;;  %v3303_v62 = vmul.f32 %v3299_v0, %v3299_v0  ;;  %v3304_v2 = vmul.f32 %v3300_v50, %v3300_v50 }
 0xfbb   :  { %v3305_v63 = vsel %vm330_vm13, %v3301_v60, 0.0  ;;  %v3306_v14 = vsel %vm330_vm13, %v3302_v61, 0.0  ;;  %v3308_v51 = vsel %vm330_vm13, %v3303_v62, 0.0  ;;  %v3310_v15 = vsel %vm330_vm13, %v3304_v2, 0.0 }
 0xfbc   :  { %v3307_v41 = vadd.f32 %v3306_v14, %v3305_v63 }
 0xfbe   :  { %v3309_v42 = vadd.f32 %v3308_v51, %v3307_v41 }
 0xfc0   :  { %v3311_v43 = vadd.f32 %v3310_v15, %v3309_v42 }
 0xfc2   :  { %v3312_v44 = vrot.slane %v3311_v43, 4 }
 0xfc4   :  { %v3313_v45 = vadd.f32 %v3312_v44, %v3311_v43 }
 0xfc6   :  { %v3314_v46 = vrot.slane %v3313_v45, 2 }
 0xfc8   :  { %v3315_v47 = vadd.f32 %v3314_v46, %v3313_v45 }
 0xfca   :  { %v3316_v52 = vrot.slane %v3315_v47, 1 }
 0xfcc   :  { %v3317_v53 = vadd.f32 %v3316_v52, %v3315_v47 }
 0xfce   :  { %v3318_v54 = vmul.f32 0.03125, %v3317_v53 }
 0xfd0   :  { %v3320_v55 = vadd.f32 1e-05, %v3318_v54 }
 0xfd2   :  { %3902 = vrsqrt.f32 %v3320_v55 }
 0xfdc   :  { %v3903_v56 = vpop.eup %3902 }
 0xfdd   :  { %v3322_v57 = vmul.f32 %v3903_v56, %v3319_v39 }
 0xfdf   :  { %v3326_v58 = vrot.slane %v3322_v57, %v4537_v10 }
 0xfe1   :  { %v3327_v1 = vmul.f32 %v3326_v58, %v3297_v48  ;;  %v3328_v3 = vmul.f32 %v3326_v58, %v3298_v49  ;;  %v3329_v4 = vmul.f32 %v3326_v58, %v3299_v0  ;;  %v3330_v5 = vmul.f32 %v3326_v58, %v3300_v50 }
 0xfe3   :  { %v3336_v17 = vadd.f32 %v3433_v59, %v3327_v1  ;;  %v3337_v18 = vadd.f32 %v3433_v59, %v3328_v3  ;;  %v3338_v19 = vadd.f32 %v3433_v59, %v3329_v4  ;;  %v3339_v10 = vadd.f32 %v3433_v59, %v3330_v5 }
 0xfe5   :  { %v3342_v20 = vadd.f32 %v3338_v19, %v2437_v13  ;;  %v3340_v21 = vadd.f32 %v3336_v17, %v2435_v6  ;;  %v3341_v22 = vadd.f32 %v3337_v18, %v2436_v12  ;;  %v3343_v23 = vadd.f32 %v3339_v10, %v2438_v16 }
 0xfe7   :  { %v3346_v24 = vmax.f32 %v3342_v20, 0.0  ;;  %v3344_v25 = vmax.f32 %v3340_v21, 0.0  ;;  %v3345_v26 = vmax.f32 %v3341_v22, 0.0  ;;  %v3347_v7 = vmax.f32 %v3343_v23, 0.0 }
 0xfe9   :  { %3350 = vst.msk [vmem:[#allocation14 + $0x10] sm:$0xff] %vm330_vm13, %v3346_v24  ;;  %3348 = vst.msk [vmem:[#allocation14] sm:$0xff] %vm330_vm13, %v3344_v25 }
 0xfea   :  { %3349 = vst.msk [vmem:[#allocation14 + $0x8] sm:$0xff] %vm330_vm13, %v3345_v26  ;;  %3351 = vst.msk [vmem:[#allocation14 + $0x18] sm:$0xff] %vm330_vm13, %v3347_v7 }
 0xfeb   :  { %4047 = shalt.err (!%p4044_p10)
}
 0xfec   :  { %s5654_s25 = sld [smem:[#allocation31_spill]] }
 0xff2   :  { %s4048_s7 = scalar_lea.hbm %s5654_s25, 512 }
 0xff3   :  { %p4049_p11 = scmp.ne.s32.totalorder %s5654_s25, %s4048_s7  ;;  %p4052_p12 = scmp.lt.u32.totalorder %s4048_s7, %s5654_s25 }
 0xff5   :  { %p4054_p13 = pnand %p4052_p12, %p4049_p11 }
 0xff7   :  { %4057 = shalt.err (!%p4054_p13)
}
 0xff8   :  { %3363 = dma.vmem_to_hbm [thread:$0]  %s3358_s9, 512, %s5654_s25, [#allocation5], %s4070_s5, %s4070_s5, %s4071_s0  }
 0xff9   :  { %4066 = dma.done.wait [#allocation5], 512  }
 0xffa   :  { %4067 = vsyncadd [#allocation5], 4294966784 }
 0xffb   :  { %3367 = vsyncpa [#allocation4], 1 }
 0xffc   :  { %3368 = vsyncpa [#allocation7], 1 }
 0xffd   :  { %3369 = vsyncpa [#allocation10], 1 }
 0xffe   :  { %3370 = vsyncpa [#allocation13], 1 }
 0xfff   :  { %3371 = vsyncpa [#allocation5], 1 }

</bundles_post_ra>
